<compile_context>
chip_gen: v6e
topology: v6e:2x2x1
jax: 0.10.0
libtpu: 0.0.40
codegen_flags: <defaults>
</compile_context>

<pallas_src>
import functools
import math

import jax
import jax.numpy as jnp
from jax import lax
from jax.experimental import pallas as pl
from jax.experimental.pallas import tpu as pltpu

# ---------------- scaled-down config ----------------
BATCH = 2
IMG_C, IMG_H, IMG_W = 3, 14, 14        # real module: 3 x 224 x 224
PATCH = 2                              # stem stride/kernel (real backbone: /32)
GRID_HW = IMG_H // PATCH               # 7 -> 7*7 = 49 "boxes", same as reference
NUM_BOXES = GRID_HW * GRID_HW          # 49
PATCH_K = IMG_C * PATCH * PATCH        # 12
FEAT_DIM = 64                          # scaled-down from 2048
HIDDEN = 32                            # params.hidden_size
SEQ = 8                                # expression length
VOCAB = 30
NUM_HEADS = 4
HEAD_DIM = HIDDEN // NUM_HEADS
INTERMEDIATE = 64
NUM_LAYERS = 2
LN_EPS = 1e-12
TOTAL_LEN = SEQ + NUM_BOXES            # 57
PAD_LEN = 64                           # padded joint length (multiple of 8)


# ---------------- in-kernel helpers (traced inside the Pallas body) ----------------
def _ln_f32(x, g, b, eps):
    mu = jnp.mean(x, axis=-1, keepdims=True)
    xc = x - mu
    var = jnp.mean(xc * xc, axis=-1, keepdims=True)
    return xc * lax.rsqrt(var + eps) * g + b


def _gelu_tanh(y):
    # BERT tanh-approx GELU (EUP-friendly).  TODO(synk): reference BERT gelu is
    # erf-based; expect ~1e-3 numerical difference.
    c = math.sqrt(2.0 / math.pi)
    return 0.5 * y * (1.0 + jnp.tanh(c * (y + 0.044715 * y * y * y)))


# ---------------- single fused forward kernel ----------------
def _fused_forward_kernel(patch_ref, base_ref, bias_ref,
                          sw_ref, sb_ref, ow_ref, ob_ref, vw_ref, vb_ref,
                          eg_ref, eb_ref,
                          qkvw_ref, qkvb_ref, aow_ref, aob_ref,
                          ln1g_ref, ln1b_ref, f1w_ref, f1b_ref,
                          f2w_ref, f2b_ref, ln2g_ref, ln2b_ref,
                          out_ref, probs_ref,
                          *, scale, num_layers):
    # ---- visual stem: patches @ stem_w -> @ object_visual_w -> @ visual_proj_w
    pt = patch_ref[0].astype(jnp.bfloat16)                                # (49, 12)
    f = jnp.dot(pt, sw_ref[...], preferred_element_type=jnp.float32) + sb_ref[...]
    f = jnp.dot(f.astype(jnp.bfloat16), ow_ref[...],
                preferred_element_type=jnp.float32) + ob_ref[...]
    vis = jnp.dot(f.astype(jnp.bfloat16), vw_ref[...],
                  preferred_element_type=jnp.float32) + vb_ref[...]       # (49, H)

    # place visual embeddings on the object rows [SEQ, SEQ+NUM_BOXES) of the
    # padded joint sequence (text rows get 0 visual; pad rows are masked).
    vis_full = jnp.concatenate(
        [jnp.zeros((SEQ, HIDDEN), jnp.float32),
         vis,
         jnp.zeros((PAD_LEN - TOTAL_LEN, HIDDEN), jnp.float32)], axis=0)  # (Lp, H)

    # ---- embeddings + embedding LayerNorm
    x = base_ref[0] + vis_full                                            # (Lp, H) f32
    x = _ln_f32(x, eg_ref[...], eb_ref[...], LN_EPS)
    bias = bias_ref[0]                                                    # (1, Lp)

    # ---- encoder layers (statically unrolled)
    for l in range(num_layers):
        last = (l == num_layers - 1)

        # fused Q/K/V projection: one (Lp, H) x (H, 3H) matmul (bf16 -> f32 acc)
        qkv = jnp.dot(x.astype(jnp.bfloat16), qkvw_ref[l],
                      preferred_element_type=jnp.float32) + qkvb_ref[l]   # (Lp, 3H)

        ctx_parts = []
        for h in range(NUM_HEADS):
            lo = h * HEAD_DIM
            q_h = (qkv[:, lo:lo + HEAD_DIM] * scale).astype(jnp.bfloat16)        # (Lp, Dh)
            k_h = qkv[:, HIDDEN + lo:HIDDEN + lo + HEAD_DIM].astype(jnp.bfloat16)
            v_h = qkv[:, 2 * HIDDEN + lo:2 * HIDDEN + lo + HEAD_DIM].astype(jnp.bfloat16)
            s = lax.dot_general(q_h, k_h, (((1,), (1,)), ((), ())),
                                preferred_element_type=jnp.float32) + bias       # (Lp, Lp)
            s = s - jnp.max(s, axis=-1, keepdims=True)
            e = jnp.exp(s)
            p = e * pl.reciprocal(jnp.sum(e, axis=-1, keepdims=True), approx=True)
            if last:
                probs_ref[0, h] = p.astype(probs_ref.dtype)
            ctx_parts.append(jnp.dot(p.astype(jnp.bfloat16), v_h,
                                     preferred_element_type=jnp.float32))        # (Lp, Dh)
        ctx = jnp.concatenate(ctx_parts, axis=-1)                                # (Lp, H)

        # attention output projection + residual + LN1
        attn_out = jnp.dot(ctx.astype(jnp.bfloat16), aow_ref[l],
                           preferred_element_type=jnp.float32) + aob_ref[l]
        h1 = _ln_f32(x + attn_out, ln1g_ref[l], ln1b_ref[l], LN_EPS)

        # FFN + residual + LN2
        ffn = jnp.dot(h1.astype(jnp.bfloat16), f1w_ref[l],
                      preferred_element_type=jnp.float32) + f1b_ref[l]
        ffn = _gelu_tanh(ffn)
        ffn2 = jnp.dot(ffn.astype(jnp.bfloat16), f2w_ref[l],
                       preferred_element_type=jnp.float32) + f2b_ref[l]
        x = _ln_f32(h1 + ffn2, ln2g_ref[l], ln2b_ref[l], LN_EPS)

    out_ref[0] = x.astype(out_ref.dtype)


def pallas_fused_forward(patches, base, mask_bias, p):
    B = patches.shape[0]
    L = NUM_LAYERS
    bmap3 = lambda b: (b, 0, 0)
    wmap2 = lambda b: (0, 0)
    wmap3 = lambda b: (0, 0, 0)
    in_specs = [
        pl.BlockSpec((1, NUM_BOXES, PATCH_K), bmap3),          # patches
        pl.BlockSpec((1, PAD_LEN, HIDDEN), bmap3),             # base embeddings
        pl.BlockSpec((1, 1, PAD_LEN), bmap3),                  # mask bias
        pl.BlockSpec((PATCH_K, FEAT_DIM), wmap2),              # stem_w
        pl.BlockSpec((1, FEAT_DIM), wmap2),                    # stem_b
        pl.BlockSpec((FEAT_DIM, HIDDEN), wmap2),               # ov_w
        pl.BlockSpec((1, HIDDEN), wmap2),                      # ov_b
        pl.BlockSpec((HIDDEN, HIDDEN), wmap2),                 # vis_w
        pl.BlockSpec((1, HIDDEN), wmap2),                      # vis_b
        pl.BlockSpec((1, HIDDEN), wmap2),                      # emb_ln_g
        pl.BlockSpec((1, HIDDEN), wmap2),                      # emb_ln_b
        pl.BlockSpec((L, HIDDEN, 3 * HIDDEN), wmap3),          # qkv_w (stacked)
        pl.BlockSpec((L, 1, 3 * HIDDEN), wmap3),               # qkv_b
        pl.BlockSpec((L, HIDDEN, HIDDEN), wmap3),              # ao_w
        pl.BlockSpec((L, 1, HIDDEN), wmap3),                   # ao_b
        pl.BlockSpec((L, 1, HIDDEN), wmap3),                   # ln1_g
        pl.BlockSpec((L, 1, HIDDEN), wmap3),                   # ln1_b
        pl.BlockSpec((L, HIDDEN, INTERMEDIATE), wmap3),        # ff1_w
        pl.BlockSpec((L, 1, INTERMEDIATE), wmap3),             # ff1_b
        pl.BlockSpec((L, INTERMEDIATE, HIDDEN), wmap3),        # ff2_w
        pl.BlockSpec((L, 1, HIDDEN), wmap3),                   # ff2_b
        pl.BlockSpec((L, 1, HIDDEN), wmap3),                   # ln2_g
        pl.BlockSpec((L, 1, HIDDEN), wmap3),                   # ln2_b
    ]
    out_shape = (jax.ShapeDtypeStruct((B, PAD_LEN, HIDDEN), jnp.float32),
                 jax.ShapeDtypeStruct((B, NUM_HEADS, PAD_LEN, PAD_LEN), jnp.float32))
    out_specs = (pl.BlockSpec((1, PAD_LEN, HIDDEN), bmap3),
                 pl.BlockSpec((1, NUM_HEADS, PAD_LEN, PAD_LEN), lambda b: (b, 0, 0, 0)))

    hidden, probs = pl.pallas_call(
        functools.partial(_fused_forward_kernel,
                          scale=1.0 / math.sqrt(HEAD_DIM),
                          num_layers=NUM_LAYERS),
        out_shape=out_shape,
        grid=(B,),
        in_specs=in_specs,
        out_specs=out_specs,
        compiler_params=pltpu.CompilerParams(dimension_semantics=("parallel",)),
    )(patches, base, mask_bias,
      p["stem_w"], p["stem_b"], p["ov_w"], p["ov_b"], p["vis_w"], p["vis_b"],
      p["emb_ln_g"], p["emb_ln_b"],
      p["qkv_w"], p["qkv_b"], p["ao_w"], p["ao_b"],
      p["ln1_g"], p["ln1_b"], p["ff1_w"], p["ff1_b"],
      p["ff2_w"], p["ff2_b"], p["ln2_g"], p["ln2_b"])
    return hidden, probs


# ---------------- parameters (deterministic synthetic init) ----------------
def _normal(key, shape, std=0.02):
    return std * jax.random.normal(key, shape, dtype=jnp.float32)


def init_params(key):
    keys = iter(jax.random.split(key, 16))
    zeros = lambda *s: jnp.zeros(s, jnp.float32)
    ones = lambda *s: jnp.ones(s, jnp.float32)
    bf16 = lambda t: t.astype(jnp.bfloat16)   # weights feeding the MXU kept in bf16
    L = NUM_LAYERS
    p = {
        # TODO(synk): ResNet-152 pretrained backbone (pre_resnet) replaced by a
        # single stride-2 conv stem with synthetic weights (no .pth load).
        "stem_w": bf16(_normal(next(keys), (PATCH_K, FEAT_DIM))),
        "stem_b": zeros(1, FEAT_DIM),
        # object_visual_embeddings = nn.Linear(2048, hidden)
        "ov_w": bf16(_normal(next(keys), (FEAT_DIM, HIDDEN))),
        "ov_b": zeros(1, HIDDEN),
        # VLBERT visual 1x1 projection of the visual half of object_vl_embeddings
        "vis_w": bf16(_normal(next(keys), (HIDDEN, HIDDEN))),
        "vis_b": zeros(1, HIDDEN),
        # object_linguistic_embeddings = nn.Embedding(1, hidden), normal(0, 0.02)
        "obj_ling": _normal(next(keys), (1, HIDDEN)),
        # VisualLinguisticBert embeddings
        "word_emb": _normal(next(keys), (VOCAB, HIDDEN)),
        "pos_emb": _normal(next(keys), (TOTAL_LEN, HIDDEN)),
        "tok_type_emb": _normal(next(keys), (2, HIDDEN)),
        "emb_ln_g": ones(1, HIDDEN),
        "emb_ln_b": zeros(1, HIDDEN),
        # encoder layer weights, stacked along a leading layer axis
        "qkv_w": bf16(_normal(next(keys), (L, HIDDEN, 3 * HIDDEN))),
        "qkv_b": zeros(L, 1, 3 * HIDDEN),
        "ao_w": bf16(_normal(next(keys), (L, HIDDEN, HIDDEN))),
        "ao_b": zeros(L, 1, HIDDEN),
        "ln1_g": ones(L, 1, HIDDEN), "ln1_b": zeros(L, 1, HIDDEN),
        "ff1_w": bf16(_normal(next(keys), (L, HIDDEN, INTERMEDIATE))),
        "ff1_b": zeros(L, 1, INTERMEDIATE),
        "ff2_w": bf16(_normal(next(keys), (L, INTERMEDIATE, HIDDEN))),
        "ff2_b": zeros(L, 1, HIDDEN),
        "ln2_g": ones(L, 1, HIDDEN), "ln2_b": zeros(L, 1, HIDDEN),
    }
    return p


# ---------------- forward pass ----------------
def _patchify(image):
    """NCHW image -> (B, num_boxes, C*kh*kw) patches (row-major spatial order,
    matching .view(B, C, 49).transpose(2, 1) of the conv output)."""
    B = image.shape[0]
    x = image.reshape(B, IMG_C, GRID_HW, PATCH, GRID_HW, PATCH)
    x = x.transpose(0, 2, 4, 1, 3, 5)                      # (B, oh, ow, C, kh, kw)
    return x.reshape(B, NUM_BOXES, PATCH_K)


def resnet_vlbert_forward(p, image, expression):
    batch_size = expression.shape[0]
    # pre_resnet backbone lowered to patchify; its matmuls run inside the kernel.
    patches = _patchify(image)                                            # (B, 49, 12)

    text_input_ids = expression
    text_token_type_ids = jnp.zeros_like(text_input_ids)
    text_mask = text_input_ids > 0
    box_mask = jnp.ones((batch_size, NUM_BOXES), dtype=bool)
    text_visual_embeddings = jnp.zeros((batch_size, SEQ, HIDDEN), jnp.float32)

    # --- non-visual part of the joint embedding (gathers stay in plain JAX) ---
    word = jnp.take(p["word_emb"], text_input_ids, axis=0)                # (B, S, H)
    tok_text = jnp.take(p["tok_type_emb"], text_token_type_ids, axis=0)   # (B, S, H)
    text_emb = word + text_visual_embeddings + p["pos_emb"][None, :SEQ, :] + tok_text
    obj_ling = jnp.broadcast_to(p["obj_ling"][0][None, None, :],
                                (batch_size, NUM_BOXES, HIDDEN))
    obj_base = (obj_ling + p["pos_emb"][None, SEQ:TOTAL_LEN, :]
                + p["tok_type_emb"][1][None, None, :])                    # (B, 49, H)
    base = jnp.concatenate([text_emb, obj_base], axis=1)                  # (B, 57, H)
    base = jnp.pad(base, ((0, 0), (0, PAD_LEN - TOTAL_LEN), (0, 0)))      # (B, 64, H)

    # --- attention mask bias (pad rows masked with -10000) ---
    full_mask = jnp.concatenate([text_mask, box_mask], axis=1)            # (B, 57)
    full_mask = jnp.pad(full_mask, ((0, 0), (0, PAD_LEN - TOTAL_LEN)))
    mask_bias = ((1.0 - full_mask.astype(jnp.float32)) * -10000.0)[:, None, :]

    hidden, probs = pallas_fused_forward(patches, base, mask_bias, p)

    attention_probs = probs[:, :, :TOTAL_LEN, :TOTAL_LEN]
    hidden_states_text = hidden[:, :SEQ, :]
    # output_all_encoded_layers=False, output_text_and_object_separately=True;
    # hidden_states_image = hidden[:, SEQ:TOTAL_LEN, :] is available but unused.
    # TODO(synk): BertTokenizer / relation / indexs_list are not used in the hot
    # path of the reference forward and are omitted.
    return hidden_states_text, attention_probs


# ---------------- main ----------------
if __name__ == "__main__":
    key = jax.random.PRNGKey(0)
    k_param, k_img, k_txt = jax.random.split(key, 3)
    params = init_params(k_param)
    image = jax.random.normal(k_img, (BATCH, IMG_C, IMG_H, IMG_W), dtype=jnp.float32)
    expression = jax.random.randint(k_txt, (BATCH, SEQ), 0, VOCAB, dtype=jnp.int32)

    fwd = jax.jit(resnet_vlbert_forward)
    hidden_states_text, attention_probs = fwd(params, image, expression)
    hidden_states_text = jax.block_until_ready(hidden_states_text)
    attention_probs = jax.block_until_ready(attention_probs)

    assert hidden_states_text.shape == (BATCH, SEQ, HIDDEN)
    assert attention_probs.shape == (BATCH, NUM_HEADS, TOTAL_LEN, TOTAL_LEN)
    assert bool(jnp.all(jnp.isfinite(hidden_states_text)))
    assert bool(jnp.all(jnp.isfinite(attention_probs)))
    print("KERNEL_OK")
</pallas_src>

<mosaic_0001>
module attributes {stable_mosaic.version = 11 : i64} {
  func.func @_fused_forward_kernel(%arg0: i32, %arg1: memref<1x49x12xf32, #tpu.memory_space<vmem>>, %arg2: memref<1x64x32xf32, #tpu.memory_space<vmem>>, %arg3: memref<1x1x64xf32, #tpu.memory_space<vmem>>, %arg4: memref<12x64xbf16, #tpu.memory_space<vmem>>, %arg5: memref<1x64xf32, #tpu.memory_space<vmem>>, %arg6: memref<64x32xbf16, #tpu.memory_space<vmem>>, %arg7: memref<1x32xf32, #tpu.memory_space<vmem>>, %arg8: memref<32x32xbf16, #tpu.memory_space<vmem>>, %arg9: memref<1x32xf32, #tpu.memory_space<vmem>>, %arg10: memref<1x32xf32, #tpu.memory_space<vmem>>, %arg11: memref<1x32xf32, #tpu.memory_space<vmem>>, %arg12: memref<2x32x96xbf16, #tpu.memory_space<vmem>>, %arg13: memref<2x1x96xf32, #tpu.memory_space<vmem>>, %arg14: memref<2x32x32xbf16, #tpu.memory_space<vmem>>, %arg15: memref<2x1x32xf32, #tpu.memory_space<vmem>>, %arg16: memref<2x1x32xf32, #tpu.memory_space<vmem>>, %arg17: memref<2x1x32xf32, #tpu.memory_space<vmem>>, %arg18: memref<2x32x64xbf16, #tpu.memory_space<vmem>>, %arg19: memref<2x1x64xf32, #tpu.memory_space<vmem>>, %arg20: memref<2x64x32xbf16, #tpu.memory_space<vmem>>, %arg21: memref<2x1x32xf32, #tpu.memory_space<vmem>>, %arg22: memref<2x1x32xf32, #tpu.memory_space<vmem>>, %arg23: memref<2x1x32xf32, #tpu.memory_space<vmem>>, %arg24: memref<1x64x32xf32, #tpu.memory_space<vmem>>, %arg25: memref<1x4x64x64xf32, #tpu.memory_space<vmem>>) attributes {dimension_semantics = [#tpu.dimension_semantics<parallel>], iteration_bounds = array<i64: 2>, scalar_prefetch = 0 : i64, scratch_operands = 0 : i64, tpu.core_type = #tpu.core_type<tc>, window_params = [{transform_indices = @transform_0, window_bounds = array<i64: 1, 49, 12>}, {transform_indices = @transform_1, window_bounds = array<i64: 1, 64, 32>}, {transform_indices = @transform_2, window_bounds = array<i64: 1, 1, 64>}, {pipeline_mode = #tpu.pipeline_mode<synchronous>, transform_indices = @transform_3, window_bounds = array<i64: 12, 64>}, {pipeline_mode = #tpu.pipeline_mode<synchronous>, transform_indices = @transform_4, window_bounds = array<i64: 1, 64>}, {pipeline_mode = #tpu.pipeline_mode<synchronous>, transform_indices = @transform_5, window_bounds = array<i64: 64, 32>}, {pipeline_mode = #tpu.pipeline_mode<synchronous>, transform_indices = @transform_6, window_bounds = array<i64: 1, 32>}, {pipeline_mode = #tpu.pipeline_mode<synchronous>, transform_indices = @transform_7, window_bounds = array<i64: 32, 32>}, {pipeline_mode = #tpu.pipeline_mode<synchronous>, transform_indices = @transform_8, window_bounds = array<i64: 1, 32>}, {pipeline_mode = #tpu.pipeline_mode<synchronous>, transform_indices = @transform_9, window_bounds = array<i64: 1, 32>}, {pipeline_mode = #tpu.pipeline_mode<synchronous>, transform_indices = @transform_10, window_bounds = array<i64: 1, 32>}, {pipeline_mode = #tpu.pipeline_mode<synchronous>, transform_indices = @transform_11, window_bounds = array<i64: 2, 32, 96>}, {pipeline_mode = #tpu.pipeline_mode<synchronous>, transform_indices = @transform_12, window_bounds = array<i64: 2, 1, 96>}, {pipeline_mode = #tpu.pipeline_mode<synchronous>, transform_indices = @transform_13, window_bounds = array<i64: 2, 32, 32>}, {pipeline_mode = #tpu.pipeline_mode<synchronous>, transform_indices = @transform_14, window_bounds = array<i64: 2, 1, 32>}, {pipeline_mode = #tpu.pipeline_mode<synchronous>, transform_indices = @transform_15, window_bounds = array<i64: 2, 1, 32>}, {pipeline_mode = #tpu.pipeline_mode<synchronous>, transform_indices = @transform_16, window_bounds = array<i64: 2, 1, 32>}, {pipeline_mode = #tpu.pipeline_mode<synchronous>, transform_indices = @transform_17, window_bounds = array<i64: 2, 32, 64>}, {pipeline_mode = #tpu.pipeline_mode<synchronous>, transform_indices = @transform_18, window_bounds = array<i64: 2, 1, 64>}, {pipeline_mode = #tpu.pipeline_mode<synchronous>, transform_indices = @transform_19, window_bounds = array<i64: 2, 64, 32>}, {pipeline_mode = #tpu.pipeline_mode<synchronous>, transform_indices = @transform_20, window_bounds = array<i64: 2, 1, 32>}, {pipeline_mode = #tpu.pipeline_mode<synchronous>, transform_indices = @transform_21, window_bounds = array<i64: 2, 1, 32>}, {pipeline_mode = #tpu.pipeline_mode<synchronous>, transform_indices = @transform_22, window_bounds = array<i64: 2, 1, 32>}, {transform_indices = @transform_23, window_bounds = array<i64: 1, 64, 32>}, {transform_indices = @transform_24, window_bounds = array<i64: 1, 4, 64, 64>}]} {
    %c0 = arith.constant 0 : index
    %c0_0 = arith.constant 0 : index
    %c0_1 = arith.constant 0 : index
    %0 = vector.load %arg1[%c0, %c0_0, %c0_1] : memref<1x49x12xf32, #tpu.memory_space<vmem>>, vector<1x49x12xf32>
    %1 = vector.shape_cast %0 : vector<1x49x12xf32> to vector<49x12xf32>
    %2 = arith.truncf %1 : vector<49x12xf32> to vector<49x12xbf16>
    %c0_2 = arith.constant 0 : index
    %c0_3 = arith.constant 0 : index
    %3 = vector.load %arg4[%c0_2, %c0_3] : memref<12x64xbf16, #tpu.memory_space<vmem>>, vector<12x64xbf16>
    %cst = arith.constant dense<0.000000e+00> : vector<49x64xf32>
    %4 = tpu.matmul %2, %3, %cst {dimension_numbers = #tpu.dot_dimension_numbers<[1], [0], [0], [1], [0, 0, 1, 1], [], []>} : vector<49x12xbf16>, vector<12x64xbf16>, vector<49x64xf32> -> vector<49x64xf32>
    %c0_4 = arith.constant 0 : index
    %c0_5 = arith.constant 0 : index
    %5 = vector.load %arg5[%c0_4, %c0_5] : memref<1x64xf32, #tpu.memory_space<vmem>>, vector<1x64xf32>
    %6 = vector.broadcast %5 : vector<1x64xf32> to vector<49x64xf32>
    %7 = arith.addf %4, %6 : vector<49x64xf32>
    %8 = arith.truncf %7 : vector<49x64xf32> to vector<49x64xbf16>
    %c0_6 = arith.constant 0 : index
    %c0_7 = arith.constant 0 : index
    %9 = vector.load %arg6[%c0_6, %c0_7] : memref<64x32xbf16, #tpu.memory_space<vmem>>, vector<64x32xbf16>
    %cst_8 = arith.constant dense<0.000000e+00> : vector<49x32xf32>
    %10 = tpu.matmul %8, %9, %cst_8 {dimension_numbers = #tpu.dot_dimension_numbers<[1], [0], [0], [1], [0, 0, 1, 1], [], []>} : vector<49x64xbf16>, vector<64x32xbf16>, vector<49x32xf32> -> vector<49x32xf32>
    %c0_9 = arith.constant 0 : index
    %c0_10 = arith.constant 0 : index
    %11 = vector.load %arg7[%c0_9, %c0_10] : memref<1x32xf32, #tpu.memory_space<vmem>>, vector<1x32xf32>
    %12 = vector.broadcast %11 : vector<1x32xf32> to vector<49x32xf32>
    %13 = arith.addf %10, %12 : vector<49x32xf32>
    %14 = arith.truncf %13 : vector<49x32xf32> to vector<49x32xbf16>
    %c0_11 = arith.constant 0 : index
    %c0_12 = arith.constant 0 : index
    %15 = vector.load %arg8[%c0_11, %c0_12] : memref<32x32xbf16, #tpu.memory_space<vmem>>, vector<32x32xbf16>
    %cst_13 = arith.constant dense<0.000000e+00> : vector<49x32xf32>
    %16 = tpu.matmul %14, %15, %cst_13 {dimension_numbers = #tpu.dot_dimension_numbers<[1], [0], [0], [1], [0, 0, 1, 1], [], []>} : vector<49x32xbf16>, vector<32x32xbf16>, vector<49x32xf32> -> vector<49x32xf32>
    %c0_14 = arith.constant 0 : index
    %c0_15 = arith.constant 0 : index
    %17 = vector.load %arg9[%c0_14, %c0_15] : memref<1x32xf32, #tpu.memory_space<vmem>>, vector<1x32xf32>
    %18 = vector.broadcast %17 : vector<1x32xf32> to vector<49x32xf32>
    %19 = arith.addf %16, %18 : vector<49x32xf32>
    %cst_16 = arith.constant 0.000000e+00 : f32
    %20 = vector.broadcast %cst_16 : f32 to vector<8x32xf32>
    %cst_17 = arith.constant 0.000000e+00 : f32
    %21 = vector.broadcast %cst_17 : f32 to vector<7x32xf32>
    %22 = tpu.concatenate %20, %19, %21 in 0 : vector<8x32xf32>, vector<49x32xf32>, vector<7x32xf32> -> vector<64x32xf32>
    %c0_18 = arith.constant 0 : index
    %c0_19 = arith.constant 0 : index
    %c0_20 = arith.constant 0 : index
    %23 = vector.load %arg2[%c0_18, %c0_19, %c0_20] : memref<1x64x32xf32, #tpu.memory_space<vmem>>, vector<1x64x32xf32>
    %24 = vector.shape_cast %23 : vector<1x64x32xf32> to vector<64x32xf32>
    %25 = arith.addf %24, %22 : vector<64x32xf32>
    %c0_21 = arith.constant 0 : index
    %c0_22 = arith.constant 0 : index
    %26 = vector.load %arg10[%c0_21, %c0_22] : memref<1x32xf32, #tpu.memory_space<vmem>>, vector<1x32xf32>
    %c0_23 = arith.constant 0 : index
    %c0_24 = arith.constant 0 : index
    %27 = vector.load %arg11[%c0_23, %c0_24] : memref<1x32xf32, #tpu.memory_space<vmem>>, vector<1x32xf32>
    %cst_25 = arith.constant dense<0.000000e+00> : vector<64xf32>
    %28 = vector.multi_reduction <add>, %25, %cst_25 [1] : vector<64x32xf32> to vector<64xf32>
    %29 = vector.shape_cast %28 : vector<64xf32> to vector<64x1xf32>
    %cst_26 = arith.constant 3.200000e+01 : f32
    %30 = vector.broadcast %cst_26 : f32 to vector<64x1xf32>
    %31 = arith.divf %29, %30 : vector<64x1xf32>
    %32 = vector.broadcast %31 : vector<64x1xf32> to vector<64x32xf32>
    %33 = arith.subf %25, %32 : vector<64x32xf32>
    %34 = arith.mulf %33, %33 : vector<64x32xf32>
    %cst_27 = arith.constant dense<0.000000e+00> : vector<64xf32>
    %35 = vector.multi_reduction <add>, %34, %cst_27 [1] : vector<64x32xf32> to vector<64xf32>
    %36 = vector.shape_cast %35 : vector<64xf32> to vector<64x1xf32>
    %cst_28 = arith.constant 3.200000e+01 : f32
    %37 = vector.broadcast %cst_28 : f32 to vector<64x1xf32>
    %38 = arith.divf %36, %37 : vector<64x1xf32>
    %cst_29 = arith.constant 9.99999996E-13 : f32
    %39 = vector.broadcast %cst_29 : f32 to vector<64x1xf32>
    %40 = arith.addf %38, %39 : vector<64x1xf32>
    %41 = math.rsqrt %40 : vector<64x1xf32>
    %42 = vector.broadcast %41 : vector<64x1xf32> to vector<64x32xf32>
    %43 = arith.mulf %33, %42 : vector<64x32xf32>
    %44 = vector.broadcast %26 : vector<1x32xf32> to vector<64x32xf32>
    %45 = arith.mulf %43, %44 : vector<64x32xf32>
    %46 = vector.broadcast %27 : vector<1x32xf32> to vector<64x32xf32>
    %47 = arith.addf %45, %46 : vector<64x32xf32>
    %c0_30 = arith.constant 0 : index
    %c0_31 = arith.constant 0 : index
    %c0_32 = arith.constant 0 : index
    %48 = vector.load %arg3[%c0_30, %c0_31, %c0_32] : memref<1x1x64xf32, #tpu.memory_space<vmem>>, vector<1x1x64xf32>
    %49 = vector.shape_cast %48 : vector<1x1x64xf32> to vector<1x64xf32>
    %50 = arith.truncf %47 : vector<64x32xf32> to vector<64x32xbf16>
    %c0_33 = arith.constant 0 : index
    %c0_34 = arith.constant 0 : index
    %c0_35 = arith.constant 0 : index
    %51 = vector.load %arg12[%c0_33, %c0_34, %c0_35] : memref<2x32x96xbf16, #tpu.memory_space<vmem>>, vector<1x32x96xbf16>
    %52 = vector.shape_cast %51 : vector<1x32x96xbf16> to vector<32x96xbf16>
    %cst_36 = arith.constant dense<0.000000e+00> : vector<64x96xf32>
    %53 = tpu.matmul %50, %52, %cst_36 {dimension_numbers = #tpu.dot_dimension_numbers<[1], [0], [0], [1], [0, 0, 1, 1], [], []>} : vector<64x32xbf16>, vector<32x96xbf16>, vector<64x96xf32> -> vector<64x96xf32>
    %c0_37 = arith.constant 0 : index
    %c0_38 = arith.constant 0 : index
    %c0_39 = arith.constant 0 : index
    %54 = vector.load %arg13[%c0_37, %c0_38, %c0_39] : memref<2x1x96xf32, #tpu.memory_space<vmem>>, vector<1x1x96xf32>
    %55 = vector.shape_cast %54 : vector<1x1x96xf32> to vector<1x96xf32>
    %56 = vector.broadcast %55 : vector<1x96xf32> to vector<64x96xf32>
    %57 = arith.addf %53, %56 : vector<64x96xf32>
    %58 = vector.extract_strided_slice %57 {offsets = [0, 0], sizes = [64, 8], strides = [1, 1]} : vector<64x96xf32> to vector<64x8xf32>
    %cst_40 = arith.constant 0.353553385 : f32
    %59 = vector.broadcast %cst_40 : f32 to vector<64x8xf32>
    %60 = arith.mulf %58, %59 : vector<64x8xf32>
    %61 = arith.truncf %60 : vector<64x8xf32> to vector<64x8xbf16>
    %62 = vector.extract_strided_slice %57 {offsets = [0, 32], sizes = [64, 8], strides = [1, 1]} : vector<64x96xf32> to vector<64x8xf32>
    %63 = arith.truncf %62 : vector<64x8xf32> to vector<64x8xbf16>
    %64 = vector.extract_strided_slice %57 {offsets = [0, 64], sizes = [64, 8], strides = [1, 1]} : vector<64x96xf32> to vector<64x8xf32>
    %65 = arith.truncf %64 : vector<64x8xf32> to vector<64x8xbf16>
    %cst_41 = arith.constant dense<0.000000e+00> : vector<64x64xf32>
    %66 = tpu.matmul %61, %63, %cst_41 {dimension_numbers = #tpu.dot_dimension_numbers<[1], [1], [0], [0], [0, 0, 1, 0], [], []>} : vector<64x8xbf16>, vector<64x8xbf16>, vector<64x64xf32> -> vector<64x64xf32>
    %67 = vector.broadcast %49 : vector<1x64xf32> to vector<64x64xf32>
    %68 = arith.addf %66, %67 : vector<64x64xf32>
    %cst_42 = arith.constant dense<0xFF800000> : vector<64xf32>
    %69 = vector.multi_reduction <maximumf>, %68, %cst_42 [1] : vector<64x64xf32> to vector<64xf32>
    %70 = vector.shape_cast %69 : vector<64xf32> to vector<64x1xf32>
    %71 = vector.broadcast %70 : vector<64x1xf32> to vector<64x64xf32>
    %72 = arith.subf %68, %71 : vector<64x64xf32>
    %73 = math.exp %72 : vector<64x64xf32>
    %cst_43 = arith.constant dense<0.000000e+00> : vector<64xf32>
    %74 = vector.multi_reduction <add>, %73, %cst_43 [1] : vector<64x64xf32> to vector<64xf32>
    %75 = vector.shape_cast %74 : vector<64xf32> to vector<64x1xf32>
    %76 = tpu.reciprocal %75 {approx = true} : vector<64x1xf32> -> vector<64x1xf32>
    %77 = vector.broadcast %76 : vector<64x1xf32> to vector<64x64xf32>
    %78 = arith.mulf %73, %77 : vector<64x64xf32>
    %79 = arith.truncf %78 : vector<64x64xf32> to vector<64x64xbf16>
    %cst_44 = arith.constant dense<0.000000e+00> : vector<64x8xf32>
    %80 = tpu.matmul %79, %65, %cst_44 {dimension_numbers = #tpu.dot_dimension_numbers<[1], [0], [0], [1], [0, 0, 1, 1], [], []>} : vector<64x64xbf16>, vector<64x8xbf16>, vector<64x8xf32> -> vector<64x8xf32>
    %81 = vector.extract_strided_slice %57 {offsets = [0, 8], sizes = [64, 8], strides = [1, 1]} : vector<64x96xf32> to vector<64x8xf32>
    %cst_45 = arith.constant 0.353553385 : f32
    %82 = vector.broadcast %cst_45 : f32 to vector<64x8xf32>
    %83 = arith.mulf %81, %82 : vector<64x8xf32>
    %84 = arith.truncf %83 : vector<64x8xf32> to vector<64x8xbf16>
    %85 = vector.extract_strided_slice %57 {offsets = [0, 40], sizes = [64, 8], strides = [1, 1]} : vector<64x96xf32> to vector<64x8xf32>
    %86 = arith.truncf %85 : vector<64x8xf32> to vector<64x8xbf16>
    %87 = vector.extract_strided_slice %57 {offsets = [0, 72], sizes = [64, 8], strides = [1, 1]} : vector<64x96xf32> to vector<64x8xf32>
    %88 = arith.truncf %87 : vector<64x8xf32> to vector<64x8xbf16>
    %cst_46 = arith.constant dense<0.000000e+00> : vector<64x64xf32>
    %89 = tpu.matmul %84, %86, %cst_46 {dimension_numbers = #tpu.dot_dimension_numbers<[1], [1], [0], [0], [0, 0, 1, 0], [], []>} : vector<64x8xbf16>, vector<64x8xbf16>, vector<64x64xf32> -> vector<64x64xf32>
    %90 = vector.broadcast %49 : vector<1x64xf32> to vector<64x64xf32>
    %91 = arith.addf %89, %90 : vector<64x64xf32>
    %cst_47 = arith.constant dense<0xFF800000> : vector<64xf32>
    %92 = vector.multi_reduction <maximumf>, %91, %cst_47 [1] : vector<64x64xf32> to vector<64xf32>
    %93 = vector.shape_cast %92 : vector<64xf32> to vector<64x1xf32>
    %94 = vector.broadcast %93 : vector<64x1xf32> to vector<64x64xf32>
    %95 = arith.subf %91, %94 : vector<64x64xf32>
    %96 = math.exp %95 : vector<64x64xf32>
    %cst_48 = arith.constant dense<0.000000e+00> : vector<64xf32>
    %97 = vector.multi_reduction <add>, %96, %cst_48 [1] : vector<64x64xf32> to vector<64xf32>
    %98 = vector.shape_cast %97 : vector<64xf32> to vector<64x1xf32>
    %99 = tpu.reciprocal %98 {approx = true} : vector<64x1xf32> -> vector<64x1xf32>
    %100 = vector.broadcast %99 : vector<64x1xf32> to vector<64x64xf32>
    %101 = arith.mulf %96, %100 : vector<64x64xf32>
    %102 = arith.truncf %101 : vector<64x64xf32> to vector<64x64xbf16>
    %cst_49 = arith.constant dense<0.000000e+00> : vector<64x8xf32>
    %103 = tpu.matmul %102, %88, %cst_49 {dimension_numbers = #tpu.dot_dimension_numbers<[1], [0], [0], [1], [0, 0, 1, 1], [], []>} : vector<64x64xbf16>, vector<64x8xbf16>, vector<64x8xf32> -> vector<64x8xf32>
    %104 = vector.extract_strided_slice %57 {offsets = [0, 16], sizes = [64, 8], strides = [1, 1]} : vector<64x96xf32> to vector<64x8xf32>
    %cst_50 = arith.constant 0.353553385 : f32
    %105 = vector.broadcast %cst_50 : f32 to vector<64x8xf32>
    %106 = arith.mulf %104, %105 : vector<64x8xf32>
    %107 = arith.truncf %106 : vector<64x8xf32> to vector<64x8xbf16>
    %108 = vector.extract_strided_slice %57 {offsets = [0, 48], sizes = [64, 8], strides = [1, 1]} : vector<64x96xf32> to vector<64x8xf32>
    %109 = arith.truncf %108 : vector<64x8xf32> to vector<64x8xbf16>
    %110 = vector.extract_strided_slice %57 {offsets = [0, 80], sizes = [64, 8], strides = [1, 1]} : vector<64x96xf32> to vector<64x8xf32>
    %111 = arith.truncf %110 : vector<64x8xf32> to vector<64x8xbf16>
    %cst_51 = arith.constant dense<0.000000e+00> : vector<64x64xf32>
    %112 = tpu.matmul %107, %109, %cst_51 {dimension_numbers = #tpu.dot_dimension_numbers<[1], [1], [0], [0], [0, 0, 1, 0], [], []>} : vector<64x8xbf16>, vector<64x8xbf16>, vector<64x64xf32> -> vector<64x64xf32>
    %113 = vector.broadcast %49 : vector<1x64xf32> to vector<64x64xf32>
    %114 = arith.addf %112, %113 : vector<64x64xf32>
    %cst_52 = arith.constant dense<0xFF800000> : vector<64xf32>
    %115 = vector.multi_reduction <maximumf>, %114, %cst_52 [1] : vector<64x64xf32> to vector<64xf32>
    %116 = vector.shape_cast %115 : vector<64xf32> to vector<64x1xf32>
    %117 = vector.broadcast %116 : vector<64x1xf32> to vector<64x64xf32>
    %118 = arith.subf %114, %117 : vector<64x64xf32>
    %119 = math.exp %118 : vector<64x64xf32>
    %cst_53 = arith.constant dense<0.000000e+00> : vector<64xf32>
    %120 = vector.multi_reduction <add>, %119, %cst_53 [1] : vector<64x64xf32> to vector<64xf32>
    %121 = vector.shape_cast %120 : vector<64xf32> to vector<64x1xf32>
    %122 = tpu.reciprocal %121 {approx = true} : vector<64x1xf32> -> vector<64x1xf32>
    %123 = vector.broadcast %122 : vector<64x1xf32> to vector<64x64xf32>
    %124 = arith.mulf %119, %123 : vector<64x64xf32>
    %125 = arith.truncf %124 : vector<64x64xf32> to vector<64x64xbf16>
    %cst_54 = arith.constant dense<0.000000e+00> : vector<64x8xf32>
    %126 = tpu.matmul %125, %111, %cst_54 {dimension_numbers = #tpu.dot_dimension_numbers<[1], [0], [0], [1], [0, 0, 1, 1], [], []>} : vector<64x64xbf16>, vector<64x8xbf16>, vector<64x8xf32> -> vector<64x8xf32>
    %127 = vector.extract_strided_slice %57 {offsets = [0, 24], sizes = [64, 8], strides = [1, 1]} : vector<64x96xf32> to vector<64x8xf32>
    %cst_55 = arith.constant 0.353553385 : f32
    %128 = vector.broadcast %cst_55 : f32 to vector<64x8xf32>
    %129 = arith.mulf %127, %128 : vector<64x8xf32>
    %130 = arith.truncf %129 : vector<64x8xf32> to vector<64x8xbf16>
    %131 = vector.extract_strided_slice %57 {offsets = [0, 56], sizes = [64, 8], strides = [1, 1]} : vector<64x96xf32> to vector<64x8xf32>
    %132 = arith.truncf %131 : vector<64x8xf32> to vector<64x8xbf16>
    %133 = vector.extract_strided_slice %57 {offsets = [0, 88], sizes = [64, 8], strides = [1, 1]} : vector<64x96xf32> to vector<64x8xf32>
    %134 = arith.truncf %133 : vector<64x8xf32> to vector<64x8xbf16>
    %cst_56 = arith.constant dense<0.000000e+00> : vector<64x64xf32>
    %135 = tpu.matmul %130, %132, %cst_56 {dimension_numbers = #tpu.dot_dimension_numbers<[1], [1], [0], [0], [0, 0, 1, 0], [], []>} : vector<64x8xbf16>, vector<64x8xbf16>, vector<64x64xf32> -> vector<64x64xf32>
    %136 = vector.broadcast %49 : vector<1x64xf32> to vector<64x64xf32>
    %137 = arith.addf %135, %136 : vector<64x64xf32>
    %cst_57 = arith.constant dense<0xFF800000> : vector<64xf32>
    %138 = vector.multi_reduction <maximumf>, %137, %cst_57 [1] : vector<64x64xf32> to vector<64xf32>
    %139 = vector.shape_cast %138 : vector<64xf32> to vector<64x1xf32>
    %140 = vector.broadcast %139 : vector<64x1xf32> to vector<64x64xf32>
    %141 = arith.subf %137, %140 : vector<64x64xf32>
    %142 = math.exp %141 : vector<64x64xf32>
    %cst_58 = arith.constant dense<0.000000e+00> : vector<64xf32>
    %143 = vector.multi_reduction <add>, %142, %cst_58 [1] : vector<64x64xf32> to vector<64xf32>
    %144 = vector.shape_cast %143 : vector<64xf32> to vector<64x1xf32>
    %145 = tpu.reciprocal %144 {approx = true} : vector<64x1xf32> -> vector<64x1xf32>
    %146 = vector.broadcast %145 : vector<64x1xf32> to vector<64x64xf32>
    %147 = arith.mulf %142, %146 : vector<64x64xf32>
    %148 = arith.truncf %147 : vector<64x64xf32> to vector<64x64xbf16>
    %cst_59 = arith.constant dense<0.000000e+00> : vector<64x8xf32>
    %149 = tpu.matmul %148, %134, %cst_59 {dimension_numbers = #tpu.dot_dimension_numbers<[1], [0], [0], [1], [0, 0, 1, 1], [], []>} : vector<64x64xbf16>, vector<64x8xbf16>, vector<64x8xf32> -> vector<64x8xf32>
    %150 = tpu.concatenate %80, %103, %126, %149 in 1 : vector<64x8xf32>, vector<64x8xf32>, vector<64x8xf32>, vector<64x8xf32> -> vector<64x32xf32>
    %151 = arith.truncf %150 : vector<64x32xf32> to vector<64x32xbf16>
    %c0_60 = arith.constant 0 : index
    %c0_61 = arith.constant 0 : index
    %c0_62 = arith.constant 0 : index
    %152 = vector.load %arg14[%c0_60, %c0_61, %c0_62] : memref<2x32x32xbf16, #tpu.memory_space<vmem>>, vector<1x32x32xbf16>
    %153 = vector.shape_cast %152 : vector<1x32x32xbf16> to vector<32x32xbf16>
    %cst_63 = arith.constant dense<0.000000e+00> : vector<64x32xf32>
    %154 = tpu.matmul %151, %153, %cst_63 {dimension_numbers = #tpu.dot_dimension_numbers<[1], [0], [0], [1], [0, 0, 1, 1], [], []>} : vector<64x32xbf16>, vector<32x32xbf16>, vector<64x32xf32> -> vector<64x32xf32>
    %c0_64 = arith.constant 0 : index
    %c0_65 = arith.constant 0 : index
    %c0_66 = arith.constant 0 : index
    %155 = vector.load %arg15[%c0_64, %c0_65, %c0_66] : memref<2x1x32xf32, #tpu.memory_space<vmem>>, vector<1x1x32xf32>
    %156 = vector.shape_cast %155 : vector<1x1x32xf32> to vector<1x32xf32>
    %157 = vector.broadcast %156 : vector<1x32xf32> to vector<64x32xf32>
    %158 = arith.addf %154, %157 : vector<64x32xf32>
    %159 = arith.addf %47, %158 : vector<64x32xf32>
    %c0_67 = arith.constant 0 : index
    %c0_68 = arith.constant 0 : index
    %c0_69 = arith.constant 0 : index
    %160 = vector.load %arg16[%c0_67, %c0_68, %c0_69] : memref<2x1x32xf32, #tpu.memory_space<vmem>>, vector<1x1x32xf32>
    %161 = vector.shape_cast %160 : vector<1x1x32xf32> to vector<1x32xf32>
    %c0_70 = arith.constant 0 : index
    %c0_71 = arith.constant 0 : index
    %c0_72 = arith.constant 0 : index
    %162 = vector.load %arg17[%c0_70, %c0_71, %c0_72] : memref<2x1x32xf32, #tpu.memory_space<vmem>>, vector<1x1x32xf32>
    %163 = vector.shape_cast %162 : vector<1x1x32xf32> to vector<1x32xf32>
    %cst_73 = arith.constant dense<0.000000e+00> : vector<64xf32>
    %164 = vector.multi_reduction <add>, %159, %cst_73 [1] : vector<64x32xf32> to vector<64xf32>
    %165 = vector.shape_cast %164 : vector<64xf32> to vector<64x1xf32>
    %cst_74 = arith.constant 3.200000e+01 : f32
    %166 = vector.broadcast %cst_74 : f32 to vector<64x1xf32>
    %167 = arith.divf %165, %166 : vector<64x1xf32>
    %168 = vector.broadcast %167 : vector<64x1xf32> to vector<64x32xf32>
    %169 = arith.subf %159, %168 : vector<64x32xf32>
    %170 = arith.mulf %169, %169 : vector<64x32xf32>
    %cst_75 = arith.constant dense<0.000000e+00> : vector<64xf32>
    %171 = vector.multi_reduction <add>, %170, %cst_75 [1] : vector<64x32xf32> to vector<64xf32>
    %172 = vector.shape_cast %171 : vector<64xf32> to vector<64x1xf32>
    %cst_76 = arith.constant 3.200000e+01 : f32
    %173 = vector.broadcast %cst_76 : f32 to vector<64x1xf32>
    %174 = arith.divf %172, %173 : vector<64x1xf32>
    %cst_77 = arith.constant 9.99999996E-13 : f32
    %175 = vector.broadcast %cst_77 : f32 to vector<64x1xf32>
    %176 = arith.addf %174, %175 : vector<64x1xf32>
    %177 = math.rsqrt %176 : vector<64x1xf32>
    %178 = vector.broadcast %177 : vector<64x1xf32> to vector<64x32xf32>
    %179 = arith.mulf %169, %178 : vector<64x32xf32>
    %180 = vector.broadcast %161 : vector<1x32xf32> to vector<64x32xf32>
    %181 = arith.mulf %179, %180 : vector<64x32xf32>
    %182 = vector.broadcast %163 : vector<1x32xf32> to vector<64x32xf32>
    %183 = arith.addf %181, %182 : vector<64x32xf32>
    %184 = arith.truncf %183 : vector<64x32xf32> to vector<64x32xbf16>
    %c0_78 = arith.constant 0 : index
    %c0_79 = arith.constant 0 : index
    %c0_80 = arith.constant 0 : index
    %185 = vector.load %arg18[%c0_78, %c0_79, %c0_80] : memref<2x32x64xbf16, #tpu.memory_space<vmem>>, vector<1x32x64xbf16>
    %186 = vector.shape_cast %185 : vector<1x32x64xbf16> to vector<32x64xbf16>
    %cst_81 = arith.constant dense<0.000000e+00> : vector<64x64xf32>
    %187 = tpu.matmul %184, %186, %cst_81 {dimension_numbers = #tpu.dot_dimension_numbers<[1], [0], [0], [1], [0, 0, 1, 1], [], []>} : vector<64x32xbf16>, vector<32x64xbf16>, vector<64x64xf32> -> vector<64x64xf32>
    %c0_82 = arith.constant 0 : index
    %c0_83 = arith.constant 0 : index
    %c0_84 = arith.constant 0 : index
    %188 = vector.load %arg19[%c0_82, %c0_83, %c0_84] : memref<2x1x64xf32, #tpu.memory_space<vmem>>, vector<1x1x64xf32>
    %189 = vector.shape_cast %188 : vector<1x1x64xf32> to vector<1x64xf32>
    %190 = vector.broadcast %189 : vector<1x64xf32> to vector<64x64xf32>
    %191 = arith.addf %187, %190 : vector<64x64xf32>
    %cst_85 = arith.constant 5.000000e-01 : f32
    %192 = vector.broadcast %cst_85 : f32 to vector<64x64xf32>
    %193 = arith.mulf %192, %191 : vector<64x64xf32>
    %cst_86 = arith.constant 4.471500e-02 : f32
    %194 = vector.broadcast %cst_86 : f32 to vector<64x64xf32>
    %195 = arith.mulf %194, %191 : vector<64x64xf32>
    %196 = arith.mulf %195, %191 : vector<64x64xf32>
    %197 = arith.mulf %196, %191 : vector<64x64xf32>
    %198 = arith.addf %191, %197 : vector<64x64xf32>
    %cst_87 = arith.constant 0.797884583 : f32
    %199 = vector.broadcast %cst_87 : f32 to vector<64x64xf32>
    %200 = arith.mulf %199, %198 : vector<64x64xf32>
    %201 = math.tanh %200 : vector<64x64xf32>
    %cst_88 = arith.constant 1.000000e+00 : f32
    %202 = vector.broadcast %cst_88 : f32 to vector<64x64xf32>
    %203 = arith.addf %202, %201 : vector<64x64xf32>
    %204 = arith.mulf %193, %203 : vector<64x64xf32>
    %205 = arith.truncf %204 : vector<64x64xf32> to vector<64x64xbf16>
    %c0_89 = arith.constant 0 : index
    %c0_90 = arith.constant 0 : index
    %c0_91 = arith.constant 0 : index
    %206 = vector.load %arg20[%c0_89, %c0_90, %c0_91] : memref<2x64x32xbf16, #tpu.memory_space<vmem>>, vector<1x64x32xbf16>
    %207 = vector.shape_cast %206 : vector<1x64x32xbf16> to vector<64x32xbf16>
    %cst_92 = arith.constant dense<0.000000e+00> : vector<64x32xf32>
    %208 = tpu.matmul %205, %207, %cst_92 {dimension_numbers = #tpu.dot_dimension_numbers<[1], [0], [0], [1], [0, 0, 1, 1], [], []>} : vector<64x64xbf16>, vector<64x32xbf16>, vector<64x32xf32> -> vector<64x32xf32>
    %c0_93 = arith.constant 0 : index
    %c0_94 = arith.constant 0 : index
    %c0_95 = arith.constant 0 : index
    %209 = vector.load %arg21[%c0_93, %c0_94, %c0_95] : memref<2x1x32xf32, #tpu.memory_space<vmem>>, vector<1x1x32xf32>
    %210 = vector.shape_cast %209 : vector<1x1x32xf32> to vector<1x32xf32>
    %211 = vector.broadcast %210 : vector<1x32xf32> to vector<64x32xf32>
    %212 = arith.addf %208, %211 : vector<64x32xf32>
    %213 = arith.addf %183, %212 : vector<64x32xf32>
    %c0_96 = arith.constant 0 : index
    %c0_97 = arith.constant 0 : index
    %c0_98 = arith.constant 0 : index
    %214 = vector.load %arg22[%c0_96, %c0_97, %c0_98] : memref<2x1x32xf32, #tpu.memory_space<vmem>>, vector<1x1x32xf32>
    %215 = vector.shape_cast %214 : vector<1x1x32xf32> to vector<1x32xf32>
    %c0_99 = arith.constant 0 : index
    %c0_100 = arith.constant 0 : index
    %c0_101 = arith.constant 0 : index
    %216 = vector.load %arg23[%c0_99, %c0_100, %c0_101] : memref<2x1x32xf32, #tpu.memory_space<vmem>>, vector<1x1x32xf32>
    %217 = vector.shape_cast %216 : vector<1x1x32xf32> to vector<1x32xf32>
    %cst_102 = arith.constant dense<0.000000e+00> : vector<64xf32>
    %218 = vector.multi_reduction <add>, %213, %cst_102 [1] : vector<64x32xf32> to vector<64xf32>
    %219 = vector.shape_cast %218 : vector<64xf32> to vector<64x1xf32>
    %cst_103 = arith.constant 3.200000e+01 : f32
    %220 = vector.broadcast %cst_103 : f32 to vector<64x1xf32>
    %221 = arith.divf %219, %220 : vector<64x1xf32>
    %222 = vector.broadcast %221 : vector<64x1xf32> to vector<64x32xf32>
    %223 = arith.subf %213, %222 : vector<64x32xf32>
    %224 = arith.mulf %223, %223 : vector<64x32xf32>
    %cst_104 = arith.constant dense<0.000000e+00> : vector<64xf32>
    %225 = vector.multi_reduction <add>, %224, %cst_104 [1] : vector<64x32xf32> to vector<64xf32>
    %226 = vector.shape_cast %225 : vector<64xf32> to vector<64x1xf32>
    %cst_105 = arith.constant 3.200000e+01 : f32
    %227 = vector.broadcast %cst_105 : f32 to vector<64x1xf32>
    %228 = arith.divf %226, %227 : vector<64x1xf32>
    %cst_106 = arith.constant 9.99999996E-13 : f32
    %229 = vector.broadcast %cst_106 : f32 to vector<64x1xf32>
    %230 = arith.addf %228, %229 : vector<64x1xf32>
    %231 = math.rsqrt %230 : vector<64x1xf32>
    %232 = vector.broadcast %231 : vector<64x1xf32> to vector<64x32xf32>
    %233 = arith.mulf %223, %232 : vector<64x32xf32>
    %234 = vector.broadcast %215 : vector<1x32xf32> to vector<64x32xf32>
    %235 = arith.mulf %233, %234 : vector<64x32xf32>
    %236 = vector.broadcast %217 : vector<1x32xf32> to vector<64x32xf32>
    %237 = arith.addf %235, %236 : vector<64x32xf32>
    %238 = arith.truncf %237 : vector<64x32xf32> to vector<64x32xbf16>
    %c1 = arith.constant 1 : index
    %c0_107 = arith.constant 0 : index
    %c0_108 = arith.constant 0 : index
    %239 = vector.load %arg12[%c1, %c0_107, %c0_108] : memref<2x32x96xbf16, #tpu.memory_space<vmem>>, vector<1x32x96xbf16>
    %240 = vector.shape_cast %239 : vector<1x32x96xbf16> to vector<32x96xbf16>
    %cst_109 = arith.constant dense<0.000000e+00> : vector<64x96xf32>
    %241 = tpu.matmul %238, %240, %cst_109 {dimension_numbers = #tpu.dot_dimension_numbers<[1], [0], [0], [1], [0, 0, 1, 1], [], []>} : vector<64x32xbf16>, vector<32x96xbf16>, vector<64x96xf32> -> vector<64x96xf32>
    %c1_110 = arith.constant 1 : index
    %c0_111 = arith.constant 0 : index
    %c0_112 = arith.constant 0 : index
    %242 = vector.load %arg13[%c1_110, %c0_111, %c0_112] : memref<2x1x96xf32, #tpu.memory_space<vmem>>, vector<1x1x96xf32>
    %243 = vector.shape_cast %242 : vector<1x1x96xf32> to vector<1x96xf32>
    %244 = vector.broadcast %243 : vector<1x96xf32> to vector<64x96xf32>
    %245 = arith.addf %241, %244 : vector<64x96xf32>
    %246 = vector.extract_strided_slice %245 {offsets = [0, 0], sizes = [64, 8], strides = [1, 1]} : vector<64x96xf32> to vector<64x8xf32>
    %cst_113 = arith.constant 0.353553385 : f32
    %247 = vector.broadcast %cst_113 : f32 to vector<64x8xf32>
    %248 = arith.mulf %246, %247 : vector<64x8xf32>
    %249 = arith.truncf %248 : vector<64x8xf32> to vector<64x8xbf16>
    %250 = vector.extract_strided_slice %245 {offsets = [0, 32], sizes = [64, 8], strides = [1, 1]} : vector<64x96xf32> to vector<64x8xf32>
    %251 = arith.truncf %250 : vector<64x8xf32> to vector<64x8xbf16>
    %252 = vector.extract_strided_slice %245 {offsets = [0, 64], sizes = [64, 8], strides = [1, 1]} : vector<64x96xf32> to vector<64x8xf32>
    %253 = arith.truncf %252 : vector<64x8xf32> to vector<64x8xbf16>
    %cst_114 = arith.constant dense<0.000000e+00> : vector<64x64xf32>
    %254 = tpu.matmul %249, %251, %cst_114 {dimension_numbers = #tpu.dot_dimension_numbers<[1], [1], [0], [0], [0, 0, 1, 0], [], []>} : vector<64x8xbf16>, vector<64x8xbf16>, vector<64x64xf32> -> vector<64x64xf32>
    %255 = vector.broadcast %49 : vector<1x64xf32> to vector<64x64xf32>
    %256 = arith.addf %254, %255 : vector<64x64xf32>
    %cst_115 = arith.constant dense<0xFF800000> : vector<64xf32>
    %257 = vector.multi_reduction <maximumf>, %256, %cst_115 [1] : vector<64x64xf32> to vector<64xf32>
    %258 = vector.shape_cast %257 : vector<64xf32> to vector<64x1xf32>
    %259 = vector.broadcast %258 : vector<64x1xf32> to vector<64x64xf32>
    %260 = arith.subf %256, %259 : vector<64x64xf32>
    %261 = math.exp %260 : vector<64x64xf32>
    %cst_116 = arith.constant dense<0.000000e+00> : vector<64xf32>
    %262 = vector.multi_reduction <add>, %261, %cst_116 [1] : vector<64x64xf32> to vector<64xf32>
    %263 = vector.shape_cast %262 : vector<64xf32> to vector<64x1xf32>
    %264 = tpu.reciprocal %263 {approx = true} : vector<64x1xf32> -> vector<64x1xf32>
    %265 = vector.broadcast %264 : vector<64x1xf32> to vector<64x64xf32>
    %266 = arith.mulf %261, %265 : vector<64x64xf32>
    %c0_117 = arith.constant 0 : index
    %c0_118 = arith.constant 0 : index
    %c0_119 = arith.constant 0 : index
    %c0_120 = arith.constant 0 : index
    %267 = vector.load %arg25[%c0_117, %c0_118, %c0_119, %c0_120] : memref<1x4x64x64xf32, #tpu.memory_space<vmem>>, vector<1x1x64x64xf32>
    %268 = vector.shape_cast %267 : vector<1x1x64x64xf32> to vector<64x64xf32>
    %269 = vector.shape_cast %266 : vector<64x64xf32> to vector<1x1x64x64xf32>
    tpu.vector_store %arg25[%c0_117, %c0_118, %c0_119, %c0_120], %269 {strides = array<i32>} : memref<1x4x64x64xf32, #tpu.memory_space<vmem>>, vector<1x1x64x64xf32>,
    %270 = arith.truncf %266 : vector<64x64xf32> to vector<64x64xbf16>
    %cst_121 = arith.constant dense<0.000000e+00> : vector<64x8xf32>
    %271 = tpu.matmul %270, %253, %cst_121 {dimension_numbers = #tpu.dot_dimension_numbers<[1], [0], [0], [1], [0, 0, 1, 1], [], []>} : vector<64x64xbf16>, vector<64x8xbf16>, vector<64x8xf32> -> vector<64x8xf32>
    %272 = vector.extract_strided_slice %245 {offsets = [0, 8], sizes = [64, 8], strides = [1, 1]} : vector<64x96xf32> to vector<64x8xf32>
    %cst_122 = arith.constant 0.353553385 : f32
    %273 = vector.broadcast %cst_122 : f32 to vector<64x8xf32>
    %274 = arith.mulf %272, %273 : vector<64x8xf32>
    %275 = arith.truncf %274 : vector<64x8xf32> to vector<64x8xbf16>
    %276 = vector.extract_strided_slice %245 {offsets = [0, 40], sizes = [64, 8], strides = [1, 1]} : vector<64x96xf32> to vector<64x8xf32>
    %277 = arith.truncf %276 : vector<64x8xf32> to vector<64x8xbf16>
    %278 = vector.extract_strided_slice %245 {offsets = [0, 72], sizes = [64, 8], strides = [1, 1]} : vector<64x96xf32> to vector<64x8xf32>
    %279 = arith.truncf %278 : vector<64x8xf32> to vector<64x8xbf16>
    %cst_123 = arith.constant dense<0.000000e+00> : vector<64x64xf32>
    %280 = tpu.matmul %275, %277, %cst_123 {dimension_numbers = #tpu.dot_dimension_numbers<[1], [1], [0], [0], [0, 0, 1, 0], [], []>} : vector<64x8xbf16>, vector<64x8xbf16>, vector<64x64xf32> -> vector<64x64xf32>
    %281 = vector.broadcast %49 : vector<1x64xf32> to vector<64x64xf32>
    %282 = arith.addf %280, %281 : vector<64x64xf32>
    %cst_124 = arith.constant dense<0xFF800000> : vector<64xf32>
    %283 = vector.multi_reduction <maximumf>, %282, %cst_124 [1] : vector<64x64xf32> to vector<64xf32>
    %284 = vector.shape_cast %283 : vector<64xf32> to vector<64x1xf32>
    %285 = vector.broadcast %284 : vector<64x1xf32> to vector<64x64xf32>
    %286 = arith.subf %282, %285 : vector<64x64xf32>
    %287 = math.exp %286 : vector<64x64xf32>
    %cst_125 = arith.constant dense<0.000000e+00> : vector<64xf32>
    %288 = vector.multi_reduction <add>, %287, %cst_125 [1] : vector<64x64xf32> to vector<64xf32>
    %289 = vector.shape_cast %288 : vector<64xf32> to vector<64x1xf32>
    %290 = tpu.reciprocal %289 {approx = true} : vector<64x1xf32> -> vector<64x1xf32>
    %291 = vector.broadcast %290 : vector<64x1xf32> to vector<64x64xf32>
    %292 = arith.mulf %287, %291 : vector<64x64xf32>
    %c0_126 = arith.constant 0 : index
    %c1_127 = arith.constant 1 : index
    %c0_128 = arith.constant 0 : index
    %c0_129 = arith.constant 0 : index
    %293 = vector.load %arg25[%c0_126, %c1_127, %c0_128, %c0_129] : memref<1x4x64x64xf32, #tpu.memory_space<vmem>>, vector<1x1x64x64xf32>
    %294 = vector.shape_cast %293 : vector<1x1x64x64xf32> to vector<64x64xf32>
    %295 = vector.shape_cast %292 : vector<64x64xf32> to vector<1x1x64x64xf32>
    tpu.vector_store %arg25[%c0_126, %c1_127, %c0_128, %c0_129], %295 {strides = array<i32>} : memref<1x4x64x64xf32, #tpu.memory_space<vmem>>, vector<1x1x64x64xf32>,
    %296 = arith.truncf %292 : vector<64x64xf32> to vector<64x64xbf16>
    %cst_130 = arith.constant dense<0.000000e+00> : vector<64x8xf32>
    %297 = tpu.matmul %296, %279, %cst_130 {dimension_numbers = #tpu.dot_dimension_numbers<[1], [0], [0], [1], [0, 0, 1, 1], [], []>} : vector<64x64xbf16>, vector<64x8xbf16>, vector<64x8xf32> -> vector<64x8xf32>
    %298 = vector.extract_strided_slice %245 {offsets = [0, 16], sizes = [64, 8], strides = [1, 1]} : vector<64x96xf32> to vector<64x8xf32>
    %cst_131 = arith.constant 0.353553385 : f32
    %299 = vector.broadcast %cst_131 : f32 to vector<64x8xf32>
    %300 = arith.mulf %298, %299 : vector<64x8xf32>
    %301 = arith.truncf %300 : vector<64x8xf32> to vector<64x8xbf16>
    %302 = vector.extract_strided_slice %245 {offsets = [0, 48], sizes = [64, 8], strides = [1, 1]} : vector<64x96xf32> to vector<64x8xf32>
    %303 = arith.truncf %302 : vector<64x8xf32> to vector<64x8xbf16>
    %304 = vector.extract_strided_slice %245 {offsets = [0, 80], sizes = [64, 8], strides = [1, 1]} : vector<64x96xf32> to vector<64x8xf32>
    %305 = arith.truncf %304 : vector<64x8xf32> to vector<64x8xbf16>
    %cst_132 = arith.constant dense<0.000000e+00> : vector<64x64xf32>
    %306 = tpu.matmul %301, %303, %cst_132 {dimension_numbers = #tpu.dot_dimension_numbers<[1], [1], [0], [0], [0, 0, 1, 0], [], []>} : vector<64x8xbf16>, vector<64x8xbf16>, vector<64x64xf32> -> vector<64x64xf32>
    %307 = vector.broadcast %49 : vector<1x64xf32> to vector<64x64xf32>
    %308 = arith.addf %306, %307 : vector<64x64xf32>
    %cst_133 = arith.constant dense<0xFF800000> : vector<64xf32>
    %309 = vector.multi_reduction <maximumf>, %308, %cst_133 [1] : vector<64x64xf32> to vector<64xf32>
    %310 = vector.shape_cast %309 : vector<64xf32> to vector<64x1xf32>
    %311 = vector.broadcast %310 : vector<64x1xf32> to vector<64x64xf32>
    %312 = arith.subf %308, %311 : vector<64x64xf32>
    %313 = math.exp %312 : vector<64x64xf32>
    %cst_134 = arith.constant dense<0.000000e+00> : vector<64xf32>
    %314 = vector.multi_reduction <add>, %313, %cst_134 [1] : vector<64x64xf32> to vector<64xf32>
    %315 = vector.shape_cast %314 : vector<64xf32> to vector<64x1xf32>
    %316 = tpu.reciprocal %315 {approx = true} : vector<64x1xf32> -> vector<64x1xf32>
    %317 = vector.broadcast %316 : vector<64x1xf32> to vector<64x64xf32>
    %318 = arith.mulf %313, %317 : vector<64x64xf32>
    %c0_135 = arith.constant 0 : index
    %c2 = arith.constant 2 : index
    %c0_136 = arith.constant 0 : index
    %c0_137 = arith.constant 0 : index
    %319 = vector.load %arg25[%c0_135, %c2, %c0_136, %c0_137] : memref<1x4x64x64xf32, #tpu.memory_space<vmem>>, vector<1x1x64x64xf32>
    %320 = vector.shape_cast %319 : vector<1x1x64x64xf32> to vector<64x64xf32>
    %321 = vector.shape_cast %318 : vector<64x64xf32> to vector<1x1x64x64xf32>
    tpu.vector_store %arg25[%c0_135, %c2, %c0_136, %c0_137], %321 {strides = array<i32>} : memref<1x4x64x64xf32, #tpu.memory_space<vmem>>, vector<1x1x64x64xf32>,
    %322 = arith.truncf %318 : vector<64x64xf32> to vector<64x64xbf16>
    %cst_138 = arith.constant dense<0.000000e+00> : vector<64x8xf32>
    %323 = tpu.matmul %322, %305, %cst_138 {dimension_numbers = #tpu.dot_dimension_numbers<[1], [0], [0], [1], [0, 0, 1, 1], [], []>} : vector<64x64xbf16>, vector<64x8xbf16>, vector<64x8xf32> -> vector<64x8xf32>
    %324 = vector.extract_strided_slice %245 {offsets = [0, 24], sizes = [64, 8], strides = [1, 1]} : vector<64x96xf32> to vector<64x8xf32>
    %cst_139 = arith.constant 0.353553385 : f32
    %325 = vector.broadcast %cst_139 : f32 to vector<64x8xf32>
    %326 = arith.mulf %324, %325 : vector<64x8xf32>
    %327 = arith.truncf %326 : vector<64x8xf32> to vector<64x8xbf16>
    %328 = vector.extract_strided_slice %245 {offsets = [0, 56], sizes = [64, 8], strides = [1, 1]} : vector<64x96xf32> to vector<64x8xf32>
    %329 = arith.truncf %328 : vector<64x8xf32> to vector<64x8xbf16>
    %330 = vector.extract_strided_slice %245 {offsets = [0, 88], sizes = [64, 8], strides = [1, 1]} : vector<64x96xf32> to vector<64x8xf32>
    %331 = arith.truncf %330 : vector<64x8xf32> to vector<64x8xbf16>
    %cst_140 = arith.constant dense<0.000000e+00> : vector<64x64xf32>
    %332 = tpu.matmul %327, %329, %cst_140 {dimension_numbers = #tpu.dot_dimension_numbers<[1], [1], [0], [0], [0, 0, 1, 0], [], []>} : vector<64x8xbf16>, vector<64x8xbf16>, vector<64x64xf32> -> vector<64x64xf32>
    %333 = vector.broadcast %49 : vector<1x64xf32> to vector<64x64xf32>
    %334 = arith.addf %332, %333 : vector<64x64xf32>
    %cst_141 = arith.constant dense<0xFF800000> : vector<64xf32>
    %335 = vector.multi_reduction <maximumf>, %334, %cst_141 [1] : vector<64x64xf32> to vector<64xf32>
    %336 = vector.shape_cast %335 : vector<64xf32> to vector<64x1xf32>
    %337 = vector.broadcast %336 : vector<64x1xf32> to vector<64x64xf32>
    %338 = arith.subf %334, %337 : vector<64x64xf32>
    %339 = math.exp %338 : vector<64x64xf32>
    %cst_142 = arith.constant dense<0.000000e+00> : vector<64xf32>
    %340 = vector.multi_reduction <add>, %339, %cst_142 [1] : vector<64x64xf32> to vector<64xf32>
    %341 = vector.shape_cast %340 : vector<64xf32> to vector<64x1xf32>
    %342 = tpu.reciprocal %341 {approx = true} : vector<64x1xf32> -> vector<64x1xf32>
    %343 = vector.broadcast %342 : vector<64x1xf32> to vector<64x64xf32>
    %344 = arith.mulf %339, %343 : vector<64x64xf32>
    %c0_143 = arith.constant 0 : index
    %c3 = arith.constant 3 : index
    %c0_144 = arith.constant 0 : index
    %c0_145 = arith.constant 0 : index
    %345 = vector.load %arg25[%c0_143, %c3, %c0_144, %c0_145] : memref<1x4x64x64xf32, #tpu.memory_space<vmem>>, vector<1x1x64x64xf32>
    %346 = vector.shape_cast %345 : vector<1x1x64x64xf32> to vector<64x64xf32>
    %347 = vector.shape_cast %344 : vector<64x64xf32> to vector<1x1x64x64xf32>
    tpu.vector_store %arg25[%c0_143, %c3, %c0_144, %c0_145], %347 {strides = array<i32>} : memref<1x4x64x64xf32, #tpu.memory_space<vmem>>, vector<1x1x64x64xf32>,
    %348 = arith.truncf %344 : vector<64x64xf32> to vector<64x64xbf16>
    %cst_146 = arith.constant dense<0.000000e+00> : vector<64x8xf32>
    %349 = tpu.matmul %348, %331, %cst_146 {dimension_numbers = #tpu.dot_dimension_numbers<[1], [0], [0], [1], [0, 0, 1, 1], [], []>} : vector<64x64xbf16>, vector<64x8xbf16>, vector<64x8xf32> -> vector<64x8xf32>
    %350 = tpu.concatenate %271, %297, %323, %349 in 1 : vector<64x8xf32>, vector<64x8xf32>, vector<64x8xf32>, vector<64x8xf32> -> vector<64x32xf32>
    %351 = arith.truncf %350 : vector<64x32xf32> to vector<64x32xbf16>
    %c1_147 = arith.constant 1 : index
    %c0_148 = arith.constant 0 : index
    %c0_149 = arith.constant 0 : index
    %352 = vector.load %arg14[%c1_147, %c0_148, %c0_149] : memref<2x32x32xbf16, #tpu.memory_space<vmem>>, vector<1x32x32xbf16>
    %353 = vector.shape_cast %352 : vector<1x32x32xbf16> to vector<32x32xbf16>
    %cst_150 = arith.constant dense<0.000000e+00> : vector<64x32xf32>
    %354 = tpu.matmul %351, %353, %cst_150 {dimension_numbers = #tpu.dot_dimension_numbers<[1], [0], [0], [1], [0, 0, 1, 1], [], []>} : vector<64x32xbf16>, vector<32x32xbf16>, vector<64x32xf32> -> vector<64x32xf32>
    %c1_151 = arith.constant 1 : index
    %c0_152 = arith.constant 0 : index
    %c0_153 = arith.constant 0 : index
    %355 = vector.load %arg15[%c1_151, %c0_152, %c0_153] : memref<2x1x32xf32, #tpu.memory_space<vmem>>, vector<1x1x32xf32>
    %356 = vector.shape_cast %355 : vector<1x1x32xf32> to vector<1x32xf32>
    %357 = vector.broadcast %356 : vector<1x32xf32> to vector<64x32xf32>
    %358 = arith.addf %354, %357 : vector<64x32xf32>
    %359 = arith.addf %237, %358 : vector<64x32xf32>
    %c1_154 = arith.constant 1 : index
    %c0_155 = arith.constant 0 : index
    %c0_156 = arith.constant 0 : index
    %360 = vector.load %arg16[%c1_154, %c0_155, %c0_156] : memref<2x1x32xf32, #tpu.memory_space<vmem>>, vector<1x1x32xf32>
    %361 = vector.shape_cast %360 : vector<1x1x32xf32> to vector<1x32xf32>
    %c1_157 = arith.constant 1 : index
    %c0_158 = arith.constant 0 : index
    %c0_159 = arith.constant 0 : index
    %362 = vector.load %arg17[%c1_157, %c0_158, %c0_159] : memref<2x1x32xf32, #tpu.memory_space<vmem>>, vector<1x1x32xf32>
    %363 = vector.shape_cast %362 : vector<1x1x32xf32> to vector<1x32xf32>
    %cst_160 = arith.constant dense<0.000000e+00> : vector<64xf32>
    %364 = vector.multi_reduction <add>, %359, %cst_160 [1] : vector<64x32xf32> to vector<64xf32>
    %365 = vector.shape_cast %364 : vector<64xf32> to vector<64x1xf32>
    %cst_161 = arith.constant 3.200000e+01 : f32
    %366 = vector.broadcast %cst_161 : f32 to vector<64x1xf32>
    %367 = arith.divf %365, %366 : vector<64x1xf32>
    %368 = vector.broadcast %367 : vector<64x1xf32> to vector<64x32xf32>
    %369 = arith.subf %359, %368 : vector<64x32xf32>
    %370 = arith.mulf %369, %369 : vector<64x32xf32>
    %cst_162 = arith.constant dense<0.000000e+00> : vector<64xf32>
    %371 = vector.multi_reduction <add>, %370, %cst_162 [1] : vector<64x32xf32> to vector<64xf32>
    %372 = vector.shape_cast %371 : vector<64xf32> to vector<64x1xf32>
    %cst_163 = arith.constant 3.200000e+01 : f32
    %373 = vector.broadcast %cst_163 : f32 to vector<64x1xf32>
    %374 = arith.divf %372, %373 : vector<64x1xf32>
    %cst_164 = arith.constant 9.99999996E-13 : f32
    %375 = vector.broadcast %cst_164 : f32 to vector<64x1xf32>
    %376 = arith.addf %374, %375 : vector<64x1xf32>
    %377 = math.rsqrt %376 : vector<64x1xf32>
    %378 = vector.broadcast %377 : vector<64x1xf32> to vector<64x32xf32>
    %379 = arith.mulf %369, %378 : vector<64x32xf32>
    %380 = vector.broadcast %361 : vector<1x32xf32> to vector<64x32xf32>
    %381 = arith.mulf %379, %380 : vector<64x32xf32>
    %382 = vector.broadcast %363 : vector<1x32xf32> to vector<64x32xf32>
    %383 = arith.addf %381, %382 : vector<64x32xf32>
    %384 = arith.truncf %383 : vector<64x32xf32> to vector<64x32xbf16>
    %c1_165 = arith.constant 1 : index
    %c0_166 = arith.constant 0 : index
    %c0_167 = arith.constant 0 : index
    %385 = vector.load %arg18[%c1_165, %c0_166, %c0_167] : memref<2x32x64xbf16, #tpu.memory_space<vmem>>, vector<1x32x64xbf16>
    %386 = vector.shape_cast %385 : vector<1x32x64xbf16> to vector<32x64xbf16>
    %cst_168 = arith.constant dense<0.000000e+00> : vector<64x64xf32>
    %387 = tpu.matmul %384, %386, %cst_168 {dimension_numbers = #tpu.dot_dimension_numbers<[1], [0], [0], [1], [0, 0, 1, 1], [], []>} : vector<64x32xbf16>, vector<32x64xbf16>, vector<64x64xf32> -> vector<64x64xf32>
    %c1_169 = arith.constant 1 : index
    %c0_170 = arith.constant 0 : index
    %c0_171 = arith.constant 0 : index
    %388 = vector.load %arg19[%c1_169, %c0_170, %c0_171] : memref<2x1x64xf32, #tpu.memory_space<vmem>>, vector<1x1x64xf32>
    %389 = vector.shape_cast %388 : vector<1x1x64xf32> to vector<1x64xf32>
    %390 = vector.broadcast %389 : vector<1x64xf32> to vector<64x64xf32>
    %391 = arith.addf %387, %390 : vector<64x64xf32>
    %cst_172 = arith.constant 5.000000e-01 : f32
    %392 = vector.broadcast %cst_172 : f32 to vector<64x64xf32>
    %393 = arith.mulf %392, %391 : vector<64x64xf32>
    %cst_173 = arith.constant 4.471500e-02 : f32
    %394 = vector.broadcast %cst_173 : f32 to vector<64x64xf32>
    %395 = arith.mulf %394, %391 : vector<64x64xf32>
    %396 = arith.mulf %395, %391 : vector<64x64xf32>
    %397 = arith.mulf %396, %391 : vector<64x64xf32>
    %398 = arith.addf %391, %397 : vector<64x64xf32>
    %cst_174 = arith.constant 0.797884583 : f32
    %399 = vector.broadcast %cst_174 : f32 to vector<64x64xf32>
    %400 = arith.mulf %399, %398 : vector<64x64xf32>
    %401 = math.tanh %400 : vector<64x64xf32>
    %cst_175 = arith.constant 1.000000e+00 : f32
    %402 = vector.broadcast %cst_175 : f32 to vector<64x64xf32>
    %403 = arith.addf %402, %401 : vector<64x64xf32>
    %404 = arith.mulf %393, %403 : vector<64x64xf32>
    %405 = arith.truncf %404 : vector<64x64xf32> to vector<64x64xbf16>
    %c1_176 = arith.constant 1 : index
    %c0_177 = arith.constant 0 : index
    %c0_178 = arith.constant 0 : index
    %406 = vector.load %arg20[%c1_176, %c0_177, %c0_178] : memref<2x64x32xbf16, #tpu.memory_space<vmem>>, vector<1x64x32xbf16>
    %407 = vector.shape_cast %406 : vector<1x64x32xbf16> to vector<64x32xbf16>
    %cst_179 = arith.constant dense<0.000000e+00> : vector<64x32xf32>
    %408 = tpu.matmul %405, %407, %cst_179 {dimension_numbers = #tpu.dot_dimension_numbers<[1], [0], [0], [1], [0, 0, 1, 1], [], []>} : vector<64x64xbf16>, vector<64x32xbf16>, vector<64x32xf32> -> vector<64x32xf32>
    %c1_180 = arith.constant 1 : index
    %c0_181 = arith.constant 0 : index
    %c0_182 = arith.constant 0 : index
    %409 = vector.load %arg21[%c1_180, %c0_181, %c0_182] : memref<2x1x32xf32, #tpu.memory_space<vmem>>, vector<1x1x32xf32>
    %410 = vector.shape_cast %409 : vector<1x1x32xf32> to vector<1x32xf32>
    %411 = vector.broadcast %410 : vector<1x32xf32> to vector<64x32xf32>
    %412 = arith.addf %408, %411 : vector<64x32xf32>
    %413 = arith.addf %383, %412 : vector<64x32xf32>
    %c1_183 = arith.constant 1 : index
    %c0_184 = arith.constant 0 : index
    %c0_185 = arith.constant 0 : index
    %414 = vector.load %arg22[%c1_183, %c0_184, %c0_185] : memref<2x1x32xf32, #tpu.memory_space<vmem>>, vector<1x1x32xf32>
    %415 = vector.shape_cast %414 : vector<1x1x32xf32> to vector<1x32xf32>
    %c1_186 = arith.constant 1 : index
    %c0_187 = arith.constant 0 : index
    %c0_188 = arith.constant 0 : index
    %416 = vector.load %arg23[%c1_186, %c0_187, %c0_188] : memref<2x1x32xf32, #tpu.memory_space<vmem>>, vector<1x1x32xf32>
    %417 = vector.shape_cast %416 : vector<1x1x32xf32> to vector<1x32xf32>
    %cst_189 = arith.constant dense<0.000000e+00> : vector<64xf32>
    %418 = vector.multi_reduction <add>, %413, %cst_189 [1] : vector<64x32xf32> to vector<64xf32>
    %419 = vector.shape_cast %418 : vector<64xf32> to vector<64x1xf32>
    %cst_190 = arith.constant 3.200000e+01 : f32
    %420 = vector.broadcast %cst_190 : f32 to vector<64x1xf32>
    %421 = arith.divf %419, %420 : vector<64x1xf32>
    %422 = vector.broadcast %421 : vector<64x1xf32> to vector<64x32xf32>
    %423 = arith.subf %413, %422 : vector<64x32xf32>
    %424 = arith.mulf %423, %423 : vector<64x32xf32>
    %cst_191 = arith.constant dense<0.000000e+00> : vector<64xf32>
    %425 = vector.multi_reduction <add>, %424, %cst_191 [1] : vector<64x32xf32> to vector<64xf32>
    %426 = vector.shape_cast %425 : vector<64xf32> to vector<64x1xf32>
    %cst_192 = arith.constant 3.200000e+01 : f32
    %427 = vector.broadcast %cst_192 : f32 to vector<64x1xf32>
    %428 = arith.divf %426, %427 : vector<64x1xf32>
    %cst_193 = arith.constant 9.99999996E-13 : f32
    %429 = vector.broadcast %cst_193 : f32 to vector<64x1xf32>
    %430 = arith.addf %428, %429 : vector<64x1xf32>
    %431 = math.rsqrt %430 : vector<64x1xf32>
    %432 = vector.broadcast %431 : vector<64x1xf32> to vector<64x32xf32>
    %433 = arith.mulf %423, %432 : vector<64x32xf32>
    %434 = vector.broadcast %415 : vector<1x32xf32> to vector<64x32xf32>
    %435 = arith.mulf %433, %434 : vector<64x32xf32>
    %436 = vector.broadcast %417 : vector<1x32xf32> to vector<64x32xf32>
    %437 = arith.addf %435, %436 : vector<64x32xf32>
    %c0_194 = arith.constant 0 : index
    %c0_195 = arith.constant 0 : index
    %c0_196 = arith.constant 0 : index
    %438 = vector.load %arg24[%c0_194, %c0_195, %c0_196] : memref<1x64x32xf32, #tpu.memory_space<vmem>>, vector<1x64x32xf32>
    %439 = vector.shape_cast %438 : vector<1x64x32xf32> to vector<64x32xf32>
    %440 = vector.shape_cast %437 : vector<64x32xf32> to vector<1x64x32xf32>
    tpu.vector_store %arg24[%c0_194, %c0_195, %c0_196], %440 {strides = array<i32>} : memref<1x64x32xf32, #tpu.memory_space<vmem>>, vector<1x64x32xf32>,
    return
  }
  func.func @transform_0(%arg0: i32) -> (i32, i32, i32) {
    %c0_i32 = arith.constant 0 : i32
    %c0_i32_0 = arith.constant 0 : i32
    %c0_i32_1 = arith.constant 0 : i32
    return %arg0, %c0_i32, %c0_i32_0 : i32, i32, i32
  }
  func.func @transform_1(%arg0: i32) -> (i32, i32, i32) {
    %c0_i32 = arith.constant 0 : i32
    %c0_i32_0 = arith.constant 0 : i32
    %c0_i32_1 = arith.constant 0 : i32
    return %arg0, %c0_i32, %c0_i32_0 : i32, i32, i32
  }
  func.func @transform_2(%arg0: i32) -> (i32, i32, i32) {
    %c0_i32 = arith.constant 0 : i32
    %c0_i32_0 = arith.constant 0 : i32
    %c0_i32_1 = arith.constant 0 : i32
    return %arg0, %c0_i32, %c0_i32_0 : i32, i32, i32
  }
  func.func @transform_3(%arg0: i32) -> (i32, i32) {
    %c0_i32 = arith.constant 0 : i32
    %c0_i32_0 = arith.constant 0 : i32
    %c0_i32_1 = arith.constant 0 : i32
    return %c0_i32, %c0_i32_0 : i32, i32
  }
  func.func @transform_4(%arg0: i32) -> (i32, i32) {
    %c0_i32 = arith.constant 0 : i32
    %c0_i32_0 = arith.constant 0 : i32
    %c0_i32_1 = arith.constant 0 : i32
    return %c0_i32, %c0_i32_0 : i32, i32
  }
  func.func @transform_5(%arg0: i32) -> (i32, i32) {
    %c0_i32 = arith.constant 0 : i32
    %c0_i32_0 = arith.constant 0 : i32
    %c0_i32_1 = arith.constant 0 : i32
    return %c0_i32, %c0_i32_0 : i32, i32
  }
  func.func @transform_6(%arg0: i32) -> (i32, i32) {
    %c0_i32 = arith.constant 0 : i32
    %c0_i32_0 = arith.constant 0 : i32
    %c0_i32_1 = arith.constant 0 : i32
    return %c0_i32, %c0_i32_0 : i32, i32
  }
  func.func @transform_7(%arg0: i32) -> (i32, i32) {
    %c0_i32 = arith.constant 0 : i32
    %c0_i32_0 = arith.constant 0 : i32
    %c0_i32_1 = arith.constant 0 : i32
    return %c0_i32, %c0_i32_0 : i32, i32
  }
  func.func @transform_8(%arg0: i32) -> (i32, i32) {
    %c0_i32 = arith.constant 0 : i32
    %c0_i32_0 = arith.constant 0 : i32
    %c0_i32_1 = arith.constant 0 : i32
    return %c0_i32, %c0_i32_0 : i32, i32
  }
  func.func @transform_9(%arg0: i32) -> (i32, i32) {
    %c0_i32 = arith.constant 0 : i32
    %c0_i32_0 = arith.constant 0 : i32
    %c0_i32_1 = arith.constant 0 : i32
    return %c0_i32, %c0_i32_0 : i32, i32
  }
  func.func @transform_10(%arg0: i32) -> (i32, i32) {
    %c0_i32 = arith.constant 0 : i32
    %c0_i32_0 = arith.constant 0 : i32
    %c0_i32_1 = arith.constant 0 : i32
    return %c0_i32, %c0_i32_0 : i32, i32
  }
  func.func @transform_11(%arg0: i32) -> (i32, i32, i32) {
    %c0_i32 = arith.constant 0 : i32
    %c0_i32_0 = arith.constant 0 : i32
    %c0_i32_1 = arith.constant 0 : i32
    %c0_i32_2 = arith.constant 0 : i32
    return %c0_i32, %c0_i32_0, %c0_i32_1 : i32, i32, i32
  }
  func.func @transform_12(%arg0: i32) -> (i32, i32, i32) {
    %c0_i32 = arith.constant 0 : i32
    %c0_i32_0 = arith.constant 0 : i32
    %c0_i32_1 = arith.constant 0 : i32
    %c0_i32_2 = arith.constant 0 : i32
    return %c0_i32, %c0_i32_0, %c0_i32_1 : i32, i32, i32
  }
  func.func @transform_13(%arg0: i32) -> (i32, i32, i32) {
    %c0_i32 = arith.constant 0 : i32
    %c0_i32_0 = arith.constant 0 : i32
    %c0_i32_1 = arith.constant 0 : i32
    %c0_i32_2 = arith.constant 0 : i32
    return %c0_i32, %c0_i32_0, %c0_i32_1 : i32, i32, i32
  }
  func.func @transform_14(%arg0: i32) -> (i32, i32, i32) {
    %c0_i32 = arith.constant 0 : i32
    %c0_i32_0 = arith.constant 0 : i32
    %c0_i32_1 = arith.constant 0 : i32
    %c0_i32_2 = arith.constant 0 : i32
    return %c0_i32, %c0_i32_0, %c0_i32_1 : i32, i32, i32
  }
  func.func @transform_15(%arg0: i32) -> (i32, i32, i32) {
    %c0_i32 = arith.constant 0 : i32
    %c0_i32_0 = arith.constant 0 : i32
    %c0_i32_1 = arith.constant 0 : i32
    %c0_i32_2 = arith.constant 0 : i32
    return %c0_i32, %c0_i32_0, %c0_i32_1 : i32, i32, i32
  }
  func.func @transform_16(%arg0: i32) -> (i32, i32, i32) {
    %c0_i32 = arith.constant 0 : i32
    %c0_i32_0 = arith.constant 0 : i32
    %c0_i32_1 = arith.constant 0 : i32
    %c0_i32_2 = arith.constant 0 : i32
    return %c0_i32, %c0_i32_0, %c0_i32_1 : i32, i32, i32
  }
  func.func @transform_17(%arg0: i32) -> (i32, i32, i32) {
    %c0_i32 = arith.constant 0 : i32
    %c0_i32_0 = arith.constant 0 : i32
    %c0_i32_1 = arith.constant 0 : i32
    %c0_i32_2 = arith.constant 0 : i32
    return %c0_i32, %c0_i32_0, %c0_i32_1 : i32, i32, i32
  }
  func.func @transform_18(%arg0: i32) -> (i32, i32, i32) {
    %c0_i32 = arith.constant 0 : i32
    %c0_i32_0 = arith.constant 0 : i32
    %c0_i32_1 = arith.constant 0 : i32
    %c0_i32_2 = arith.constant 0 : i32
    return %c0_i32, %c0_i32_0, %c0_i32_1 : i32, i32, i32
  }
  func.func @transform_19(%arg0: i32) -> (i32, i32, i32) {
    %c0_i32 = arith.constant 0 : i32
    %c0_i32_0 = arith.constant 0 : i32
    %c0_i32_1 = arith.constant 0 : i32
    %c0_i32_2 = arith.constant 0 : i32
    return %c0_i32, %c0_i32_0, %c0_i32_1 : i32, i32, i32
  }
  func.func @transform_20(%arg0: i32) -> (i32, i32, i32) {
    %c0_i32 = arith.constant 0 : i32
    %c0_i32_0 = arith.constant 0 : i32
    %c0_i32_1 = arith.constant 0 : i32
    %c0_i32_2 = arith.constant 0 : i32
    return %c0_i32, %c0_i32_0, %c0_i32_1 : i32, i32, i32
  }
  func.func @transform_21(%arg0: i32) -> (i32, i32, i32) {
    %c0_i32 = arith.constant 0 : i32
    %c0_i32_0 = arith.constant 0 : i32
    %c0_i32_1 = arith.constant 0 : i32
    %c0_i32_2 = arith.constant 0 : i32
    return %c0_i32, %c0_i32_0, %c0_i32_1 : i32, i32, i32
  }
  func.func @transform_22(%arg0: i32) -> (i32, i32, i32) {
    %c0_i32 = arith.constant 0 : i32
    %c0_i32_0 = arith.constant 0 : i32
    %c0_i32_1 = arith.constant 0 : i32
    %c0_i32_2 = arith.constant 0 : i32
    return %c0_i32, %c0_i32_0, %c0_i32_1 : i32, i32, i32
  }
  func.func @transform_23(%arg0: i32) -> (i32, i32, i32) {
    %c0_i32 = arith.constant 0 : i32
    %c0_i32_0 = arith.constant 0 : i32
    %c0_i32_1 = arith.constant 0 : i32
    return %arg0, %c0_i32, %c0_i32_0 : i32, i32, i32
  }
  func.func @transform_24(%arg0: i32) -> (i32, i32, i32, i32) {
    %c0_i32 = arith.constant 0 : i32
    %c0_i32_0 = arith.constant 0 : i32
    %c0_i32_1 = arith.constant 0 : i32
    %c0_i32_2 = arith.constant 0 : i32
    return %arg0, %c0_i32, %c0_i32_0, %c0_i32_1 : i32, i32, i32, i32
  }
}

</mosaic_0001>

<bundles_post_ra>
// kernel: resnet_vlbert_forward.1
= control target key start
LH: loop header
LB: loop body
LE: loop exit
PB: predicated region body
PF: predicated region fallthrough
CT: control target
= control target key end

     0   :  { %s8741_s0 = inlined_call_operand.vmem [shape: f32[2,49,12], index: 0, kind: input, shape index: {}]   ;;  %s8742_s1 = inlined_call_operand.vmem [shape: f32[2,64,32], index: 1, kind: input, shape index: {}]   ;;  %s8743_s2 = inlined_call_operand.vmem [shape: f32[2,1,64], index: 2, kind: input, shape index: {}]   ;;  %s8744_s3 = inlined_call_operand.vmem [shape: bf16[12,64], index: 3, kind: input, shape index: {}]   ;;  %s8745_s4 = inlined_call_operand.vmem [shape: f32[1,64], index: 4, kind: input, shape index: {}]   ;;  %s8746_s5 = inlined_call_operand.vmem [shape: bf16[64,32], index: 5, kind: input, shape index: {}]   ;;  %s8747_s6 = inlined_call_operand.vmem [shape: f32[1,32], index: 6, kind: input, shape index: {}]   ;;  %s8748_s7 = inlined_call_operand.vmem [shape: bf16[32,32], index: 7, kind: input, shape index: {}]   ;;  %s8749_s8 = inlined_call_operand.vmem [shape: f32[1,32], index: 8, kind: input, shape index: {}]   ;;  %s8750_s9 = inlined_call_operand.vmem [shape: f32[1,32], index: 9, kind: input, shape index: {}]   ;;  %s8751_s10 = inlined_call_operand.vmem [shape: f32[1,32], index: 10, kind: input, shape index: {}]   ;;  %s8752_s11 = inlined_call_operand.vmem [shape: bf16[2,32,96], index: 11, kind: input, shape index: {}]   ;;  %s8753_s12 = inlined_call_operand.vmem [shape: f32[2,1,96], index: 12, kind: input, shape index: {}]   ;;  %s8754_s13 = inlined_call_operand.vmem [shape: bf16[2,32,32], index: 13, kind: input, shape index: {}]   ;;  %s8755_s14 = inlined_call_operand.vmem [shape: f32[2,1,32], index: 14, kind: input, shape index: {}]   ;;  %s8756_s15 = inlined_call_operand.vmem [shape: f32[2,1,32], index: 15, kind: input, shape index: {}]   ;;  %s8757_s16 = inlined_call_operand.vmem [shape: f32[2,1,32], index: 16, kind: input, shape index: {}]   ;;  %s8758_s17 = inlined_call_operand.vmem [shape: bf16[2,32,64], index: 17, kind: input, shape index: {}]   ;;  %s8759_s18 = inlined_call_operand.vmem [shape: f32[2,1,64], index: 18, kind: input, shape index: {}]   ;;  %s8760_s19 = inlined_call_operand.vmem [shape: bf16[2,64,32], index: 19, kind: input, shape index: {}]   ;;  %s8761_s20 = inlined_call_operand.vmem [shape: f32[2,1,32], index: 20, kind: input, shape index: {}]   ;;  %s8762_s21 = inlined_call_operand.vmem [shape: f32[2,1,32], index: 21, kind: input, shape index: {}]   ;;  %s8763_s22 = inlined_call_operand.vmem [shape: f32[2,1,32], index: 22, kind: input, shape index: {}]   ;;  %s8764_s23 = inlined_call_operand.vmem [shape: f32[2,64,32], index: 23, kind: output, shape index: {0}]   ;;  %s8765_s24 = inlined_call_operand.vmem [shape: f32[2,4,64,64], index: 24, kind: output, shape index: {1}]  }
   0x1   :  { %8793 = sst [smem:[#allocation2_spill]] %s8741_s0 }
   0x2   :  { %8794 = sst [smem:[#allocation3_spill]] %s8742_s1 }
   0x3   :  { %8795 = sst [smem:[#allocation4_spill]] %s8743_s2 }
   0x4   :  { %8796 = sst [smem:[#allocation5_spill]] %s8744_s3 }
   0x5   :  { %8797 = sst [smem:[#allocation6_spill]] %s8745_s4 }
   0x6   :  { %8798 = sst [smem:[#allocation7_spill]] %s8746_s5  ;;  %s7123_s5 = smov 0  }
   0x7   :  { %8799 = sst [smem:[#allocation8_spill]] %s8747_s6 }
   0x8   :  { %8800 = sst [smem:[#allocation9_spill]] %s8748_s7 }
   0x9   :  { %8801 = sst [smem:[#allocation10_spill]] %s8749_s8 }
   0xa LB: > { %s5579_s26 = sadd.s32 4294967295, %s6982_s5   ;;  %p5583_p0 = scmp.ge.s32.totalorder %s6982_s5, 1  ;;  %s6982_s5 = sphi %s7123_s5, %s35_s5  }
   0xb   : > { %p683_p1 = scmp.lt.s32.totalorder %s6982_s5, 3 }
   0xd   : > { %p684_p2 = pnand %p5583_p0, %p683_p1 }
   0xe   : > { %s8802_s6 = sld [smem:[#allocation5_spill]] (!%p684_p2)  ;;  %p762_p3 = scmp.lt.s32.totalorder (!%p684_p2), %s5579_s26, 1 }
   0xf   : > { %687 = sbr.rel (%p684_p2) target bundleno = 9335 (0x2477), region = 112  ;;  %s8803_s0 = sld [smem:[#allocation7_spill]] (!%p684_p2) }
  0x10   : > { %s8804_s25 = sld [smem:[#allocation2_spill]] (!%p684_p2)  ;;  %s6984_s28 = smov (!%p684_p2), 96  }
  0x11   : > { %s8805_s30 = sld [smem:[#allocation9_spill]] (!%p684_p2)  ;;  %s6985_s3 = smov (!%p684_p2), 64  }
  0x12   : > { %s8807_s2 = sld [smem:[#allocation3_spill]] (!%p684_p2)  ;;  %s8783_s4 = smov (!%p684_p2), 56  }
  0x13   : > { %s8809_s1 = sld [smem:[#allocation10_spill]] (!%p684_p2) }
  0x14   : > { %v6578_v0 = vld [vmem:[%s8802_s6] sm:$0x3f]   ;;  %vm824_vm0 = vcmask 1045504   ;;  %s8835_s26 = smov (!%p762_p3, %s5579_s26), 1  ;;  %vm811_vm1 = vcmask 97280   ;;  %vm935_vm2 = vcmask 523264  }
  0x15   : > { %v6579_v1 = vld [vmem:[%s8803_s0 + $0x18] sm:$0xff]   ;;  %6402 = vmatprep.subr.msk.bf16.mxu0 %vm824_vm0, %v6578_v0  ;;  %v826_v2 = vsel %vm824_vm0, %v6578_v0, 0  ;;  %s6435_s7 = smul.u32 56, %s8835_s26  ;;  %v6580_v14 = vld [vmem:[%s8803_s0 + $0x10] sm:$0xff]   ;;  %v6581_v15 = vld [vmem:[%s8803_s0 + $0x8] sm:$0xff]   ;;  %s8768_s27 = sshll.u32 %s8835_s26, 6 }
  0x16   : > { %6005 = vmatpush3.bf16.msra.mxu0 %v826_v2  ;;  %6014 = vmatprep.subr.bf16.mxu1 %v6579_v1  ;;  %v6582_v16 = vld [vmem:[%s8803_s0] sm:$0xff]   ;;  %vm1039_vm3 = vcmask 261120   ;;  %vm1116_vm4 = vcmask 1040384   ;;  %vm1408_vm5 = vcmask 64512   ;;  %s8779_s6 = smov 112   ;;  %vm2645_vm6 = vcmask 130048  }
  0x17   : > { %6015 = vmatpush3.bf16.msra.mxu1 %v6579_v1  ;;  %s766_s8 = scalar_lea.vmem %s8804_s25, %s6435_s7  ;;  %v6583_v17 = vld [vmem:[%s8805_s30 + $0x8] sm:$0xff]   ;;  %v6584_v38 = vld [vmem:[%s8805_s30] sm:$0xff]   ;;  %s8808_s25 = sld [smem:[#allocation8_spill]]  ;;  %vm2654_vm7 = vcmask 195584  }
  0x18   : > { %v786_v3 = vld [vmem:[%s766_s8] sm:$0xff]  ;;  %v787_v4 = vld [vmem:[%s766_s8 + $0x8] sm:$0xff]  ;;  %v788_v5 = vld [vmem:[%s766_s8 + $0x10] sm:$0xff]  ;;  %6016 = vmatprep.subr.bf16.mxu1 %v6580_v14  ;;  %6030 = vmatprep.subr.bf16.mxu0 %v6583_v17  ;;  %s7171_s29 = scalar_lea.vmem %s8807_s2, %s8768_s27  ;;  %s8773_s2 = smov 48  }
  0x19   : > { %v793_v6 = vpack.c.bf16 %v787_v4, %v786_v3  ;;  %v789_v7 = vld [vmem:[%s766_s8 + $0x18] sm:$0xff]  ;;  %v790_v8 = vld [vmem:[%s766_s8 + $0x20] sm:$0xff]  ;;  %v791_v9 = vld [vmem:[%s766_s8 + $0x28] sm:$0xff]  ;;  %s8769_s27 = smov 104  }
  0x1a   : > { %v794_v10 = vpack.c.bf16 %v789_v7, %v788_v5  ;;  %v795_v11 = vpack.c.bf16 %v791_v9, %v790_v8  ;;  %v792_v12 = vld [vmem:[%s766_s8 + $0x30] sm:$0x1]  ;;  %s8806_s8 = sld [smem:[#allocation6_spill]]  ;;  %v7174_v39 = vld [vmem:[%s7171_s29] sm:$0xff]  ;;  %v1121_v63 = vld [vmem:[%s7171_s29 + $0x18] sm:$0xff] }
  0x1b   : > { %6006 = vmatprep.mubr.msk.bf16.mxu0 %vm811_vm1, %v793_v6  ;;  %v796_v13 = vpack.c.bf16 %v792_v12, %v792_v12  ;;  %6017 = vmatpush3.bf16.msra.mxu1 %v6580_v14  ;;  %v1136_v40 = vsel %vm1039_vm3, %v7174_v39, 0.0  ;;  %v5606_v61 = vld [vmem:[%s8809_s1] ss:$0 sm:$0xff]  ;;  %v1119_v2 = vld [vmem:[%s7171_s29 + $0x8] sm:$0xff]  ;;  %s8781_s1 = smov 80  }
  0x1c   : > { %6007 = vmatmul.mubr.msk.bf16.vlgmr.msra.gmra.mxu0 %vm811_vm1, %v794_v10  ;;  %6018 = vmatprep.subr.bf16.mxu1 %v6581_v15  ;;  %v1122_v6 = vld [vmem:[%s7171_s29 + $0x20] sm:$0xff] }
  0x1d   : > { %6010 = vmatprep.mubr.msk.bf16.mxu0 %vm811_vm1, %v795_v11  ;;  %6031 = vmatpush3.bf16.msra.mxu0 %v6583_v17  ;;  %v5597_v44 = vld [vmem:[%s8808_s25] ss:$0 sm:$0xff]  ;;  %v1120_v11 = vld [vmem:[%s7171_s29 + $0x10] sm:$0xff]  ;;  %s8791_s25 = smov 88  }
  0x1e   : > { %6032 = vmatprep.subr.bf16.mxu0 %v6584_v38  ;;  %1137 = vadd.xlane.f32.xlu0 %v1136_v40 }
  0x1f   : > { %6019 = vmatpush3.bf16.msra.mxu1 %v6581_v15 }
  0x20   : > { %6020 = vmatprep.subr.bf16.mxu1 %v6582_v16  ;;  %v5591_v21 = vld [vmem:[%s8806_s8] ss:$0 sm:$0xff]  ;;  %s8789_s8 = smov 120  }
  0x21   : > { %6033 = vmatpush3.bf16.msra.mxu0 %v6584_v38 }
  0x23   : > { %6021 = vmatpush3.bf16.msra.mxu1 %v6582_v16 }
  0x24   : > { %6011 = vmatmul.mubr.msk.bf16.gmra.mxu0 %vm811_vm1, %v796_v13 }
  0xa7   : > { %v1138_v12 = vpop.xlane.xlu0 %1137 }
  0xdc   : > { %v6008_v18 = vpop.f32.mrf.mxu0 }
  0xdd   : > { %v871_v26 = vadd.f32 %v6008_v18, %v5591_v21 }
  0xde   : > { %v862_v19 = vpop.f32.mrf.mxu0 }
  0xdf   : > { %v863_v24 = vadd.f32 %v5591_v21, %v862_v19  ;;  %v1161_v19 = vmul.f32 0.03125, %v1138_v12  ;;  %v6586_v12 = vld [vmem:[%s8752_s11] sm:$0xff]  }
  0xe0   : > { %v6009_v20 = vpop.f32.mrf.mxu0 }
  0xe1   : > { %v874_v22 = vadd.f32 %v6009_v20, %v5591_v21 }
  0xe2   : > { %v865_v23 = vpop.f32.mrf.mxu0 }
  0xe3   : > { %v866_v25 = vadd.f32 %v5591_v21, %v865_v23  ;;  %v893_v29 = vpack.c.bf16 %v874_v22, %v871_v26 }
  0xe4   : > { %v6012_v27 = vpop.f32.mrf.mxu0 }
  0xe5   : > { %v892_v28 = vpack.c.bf16 %v866_v25, %v863_v24  ;;  %v887_v32 = vadd.f32 %v6012_v27, %v5591_v21  ;;  %v1125_v27 = vld [vmem:[%s7171_s29 + $0x38] sm:$0xff] }
  0xe6   : > { %v878_v30 = vpop.f32.mrf.mxu0 }
  0xe7   : > { %6022 = vmatprep.mubr.msk.bf16.mxu1 %vm935_vm2, %v892_v28  ;;  %v879_v34 = vadd.f32 %v5591_v21, %v878_v30  ;;  %v895_v37 = vpack.c.bf16 %v887_v32, %v887_v32  ;;  %v7199_v28 = vsub.f32 %v7174_v39, %v1161_v19 }
  0xe8   : > { %v6013_v31 = vpop.f32.mrf.mxu0  ;;  %6023 = vmatmul.mubr.msk.bf16.vlgmr.msra.gmra.mxu1 %vm935_vm2, %v893_v29 }
  0xe9   : > { %v1124_v31 = vld [vmem:[%s7171_s29 + $0x30] sm:$0xff] }
  0xea   : > { %v881_v33 = vpop.f32.mrf.mxu0 }
  0xeb   : > { %v882_v35 = vadd.f32 %v5591_v21, %v881_v33  ;;  %v1123_v21 = vld [vmem:[%s7171_s29 + $0x28] sm:$0xff]  ;;  %s8810_s29 = sld [smem:[#allocation4_spill]] }
  0xed   : > { %v894_v36 = vpack.c.bf16 %v882_v35, %v879_v34 }
  0xef   : > { %6026 = vmatprep.mubr.msk.bf16.mxu1 %vm935_vm2, %v894_v36  ;;  %v1177_v36 = vmul.f32 %v7199_v28, %v7199_v28 }
  0xf0   : > { %6027 = vmatmul.mubr.msk.bf16.gmra.mxu1 %vm935_vm2, %v895_v37 }
  0xf1   : > { %v1185_v39 = vsel %vm1039_vm3, %v1177_v36, 0.0  ;;  %s7338_s7 = scalar_lea.vmem %s8810_s29, %s8835_s26  ;;  %s8771_s29 = smov 72  }
 0x1a8   : > { %v6024_v41 = vpop.f32.mrf.mxu1 }
 0x1a9   : > { %v991_v49 = vadd.f32 %v6024_v41, %v5597_v44 }
 0x1aa   : > { %v982_v42 = vpop.f32.mrf.mxu1 }
 0x1ab   : > { %v983_v47 = vadd.f32 %v5597_v44, %v982_v42 }
 0x1ac   : > { %v6025_v43 = vpop.f32.mrf.mxu1 }
 0x1ad   : > { %v994_v45 = vadd.f32 %v6025_v43, %v5597_v44 }
 0x1ae   : > { %v985_v46 = vpop.f32.mrf.mxu1 }
 0x1af   : > { %v986_v48 = vadd.f32 %v5597_v44, %v985_v46  ;;  %v1013_v52 = vpack.c.bf16 %v994_v45, %v991_v49 }
 0x1b0   : > { %v6028_v50 = vpop.f32.mrf.mxu1 }
 0x1b1   : > { %v1012_v51 = vpack.c.bf16 %v986_v48, %v983_v47  ;;  %v1007_v55 = vadd.f32 %v6028_v50, %v5597_v44 }
 0x1b2   : > { %v998_v53 = vpop.f32.mrf.mxu1 }
 0x1b3   : > { %6034 = vmatprep.mubr.msk.bf16.mxu0 %vm1039_vm3, %v1012_v51  ;;  %v999_v57 = vadd.f32 %v5597_v44, %v998_v53  ;;  %v1015_v60 = vpack.c.bf16 %v1007_v55, %v1007_v55 }
 0x1b4   : > { %v6029_v54 = vpop.f32.mrf.mxu1  ;;  %6035 = vmatmul.mubr.msk.bf16.vlgmr.msra.gmra.mxu0 %vm1039_vm3, %v1013_v52 }
 0x1b6   : > { %v1001_v56 = vpop.f32.mrf.mxu1 }
 0x1b7   : > { %v1002_v58 = vadd.f32 %v5597_v44, %v1001_v56 }
 0x1b9   : > { %v1014_v59 = vpack.c.bf16 %v1002_v58, %v999_v57 }
 0x1bb   : > { %6038 = vmatprep.mubr.msk.bf16.mxu0 %vm1039_vm3, %v1014_v59 }
 0x1bc   : > { %6039 = vmatmul.mubr.msk.bf16.gmra.mxu0 %vm1039_vm3, %v1015_v60 }
 0x274   : > { %v6036_v62 = vpop.f32.mrf.mxu0 }
 0x275   : > { %v1095_v0 = vadd.f32 %v6036_v62, %v5606_v61 }
 0x276   : > { %v1086_v1 = vpop.f32.mrf.mxu0 }
 0x277   : > { %v1087_v3 = vadd.f32 %v5606_v61, %v1086_v1  ;;  %v1129_v4 = vadd.f32 %v1121_v63, %v1095_v0 }
 0x278   : > { %v6037_v5 = vpop.f32.mrf.mxu0 }
 0x279   : > { %v1098_v7 = vadd.f32 %v6037_v5, %v5606_v61  ;;  %v1145_v8 = vsel %vm1039_vm3, %v1129_v4, 0.0  ;;  %v1127_v9 = vadd.f32 %v1119_v2, %v1087_v3 }
 0x27a   : > { %1146 = vadd.xlane.f32.xlu1 %v1145_v8  ;;  %v1089_v10 = vpop.f32.mrf.mxu0 }
 0x27b   : > { %v1090_v13 = vadd.f32 %v5606_v61, %v1089_v10  ;;  %v1139_v14 = vsel %vm1039_vm3, %v1127_v9, 0.0  ;;  %v1130_v15 = vadd.f32 %v1122_v6, %v1098_v7 }
 0x27c   : > { %v6040_v16 = vpop.f32.mrf.mxu0  ;;  %1140 = vadd.xlane.f32.xlu0 %v1139_v14 }
 0x27d   : > { %v1111_v17 = vadd.f32 %v6040_v16, %v5606_v61  ;;  %v1128_v18 = vadd.f32 %v1120_v11, %v1090_v13  ;;  %v1148_v24 = vsel %vm1039_vm3, %v1130_v15, 0.0  ;;  %v6585_v11 = vld [vmem:[%s8752_s11 + $0x8] sm:$0xff]  }
 0x27e   : > { %v1102_v20 = vpop.f32.mrf.mxu0  ;;  %6042 = vmatprep.subr.bf16.mxu1 %v6585_v11 }
 0x27f   : > { %v1103_v22 = vadd.f32 %v5606_v61, %v1102_v20  ;;  %v1142_v23 = vsel %vm1039_vm3, %v1128_v18, 0.0  ;;  %v1117_v25 = vsel %vm1116_vm4, %v1111_v17, 0.0  ;;  %6043 = vmatpush3.bf16.msra.mxu1 %v6585_v11 }
 0x280   : > { %v6041_v26 = vpop.f32.mrf.mxu0  ;;  %1143 = vadd.xlane.f32.xlu1 %v1142_v23  ;;  %1149 = vadd.xlane.f32.xlu0 %v1148_v24  ;;  %v1133_v34 = vadd.f32 %v1125_v27, %v1117_v25 }
 0x281   : > { %v1131_v29 = vadd.f32 %v1123_v21, %v1103_v22  ;;  %6044 = vmatprep.subr.bf16.mxu1 %v6586_v12 }
 0x282   : > { %v1105_v30 = vpop.f32.mrf.mxu0  ;;  %v1157_v37 = vsel %vm1039_vm3, %v1133_v34, 0.0 }
 0x283   : > { %v1106_v32 = vadd.f32 %v5606_v61, %v1105_v30  ;;  %v1151_v33 = vsel %vm1039_vm3, %v1131_v29, 0.0  ;;  %6045 = vmatpush3.bf16.msra.mxu1 %v6586_v12 }
 0x284   : > { %1152 = vadd.xlane.f32.xlu1 %v1151_v33 }
 0x285   : > { %v1132_v35 = vadd.f32 %v1124_v31, %v1106_v32 }
 0x287   : > { %v1154_v38 = vsel %vm1039_vm3, %v1132_v35, 0.0 }
 0x288   : > { %1158 = vadd.xlane.f32.xlu1 %v1157_v37  ;;  %1155 = vadd.xlane.f32.xlu0 %v1154_v38 }
 0x28c   : > { %1186 = vadd.xlane.f32.xlu0 %v1185_v39 }
 0x303   : > { %v1147_v40 = vpop.xlane.xlu1 %1146 }
 0x304   : > { %v1164_v41 = vmul.f32 0.03125, %v1147_v40  ;;  %v5613_v40 = vld [vmem:[%s8750_s9] ss:$0 sm:$0xff] }
 0x305   : > { %v1141_v42 = vpop.xlane.xlu0 %1140 }
 0x306   : > { %v1162_v43 = vmul.f32 0.03125, %v1141_v42  ;;  %v7208_v44 = vsub.f32 %v1129_v4, %v1164_v41 }
 0x308   : > { %v7210_v45 = vsub.f32 %v1127_v9, %v1162_v43  ;;  %v1180_v54 = vmul.f32 %v7208_v44, %v7208_v44 }
 0x309   : > { %v1144_v46 = vpop.xlane.xlu1 %1143  ;;  %v1150_v47 = vpop.xlane.xlu0 %1149 }
 0x30a   : > { %v1163_v48 = vmul.f32 0.03125, %v1144_v46  ;;  %v1165_v49 = vmul.f32 0.03125, %v1150_v47  ;;  %v1178_v50 = vmul.f32 %v7210_v45, %v7210_v45  ;;  %v1194_v60 = vsel %vm1039_vm3, %v1180_v54, 0.0  ;;  %v5614_v46 = vld [vmem:[%s8751_s10] ss:$0 sm:$0xff] }
 0x30c   : > { %v7214_v51 = vsub.f32 %v1128_v18, %v1163_v48  ;;  %v7216_v52 = vsub.f32 %v1130_v15, %v1165_v49  ;;  %v1188_v53 = vsel %vm1039_vm3, %v1178_v50, 0.0 }
 0x30d   : > { %v1153_v55 = vpop.xlane.xlu1 %1152  ;;  %1189 = vadd.xlane.f32.xlu1 %v1188_v53 }
 0x30e   : > { %v1166_v56 = vmul.f32 0.03125, %v1153_v55  ;;  %v1179_v57 = vmul.f32 %v7214_v51, %v7214_v51  ;;  %v1181_v61 = vmul.f32 %v7216_v52, %v7216_v52 }
 0x310   : > { %v7223_v58 = vsub.f32 %v1131_v29, %v1166_v56  ;;  %v1191_v59 = vsel %vm1039_vm3, %v1179_v57, 0.0  ;;  %v1197_v6 = vsel %vm1039_vm3, %v1181_v61, 0.0 }
 0x311   : > { %v1159_v62 = vpop.xlane.xlu1 %1158  ;;  %1192 = vadd.xlane.f32.xlu0 %v1191_v59  ;;  %1195 = vadd.xlane.f32.xlu1 %v1194_v60  ;;  %v1156_v63 = vpop.xlane.xlu0 %1155 }
 0x312   : > { %v1168_v0 = vmul.f32 0.03125, %v1159_v62  ;;  %v1167_v1 = vmul.f32 0.03125, %v1156_v63  ;;  %v1182_v2 = vmul.f32 %v7223_v58, %v7223_v58 }
 0x314   : > { %v7231_v3 = vsub.f32 %v1133_v34, %v1168_v0  ;;  %v7233_v4 = vsub.f32 %v1132_v35, %v1167_v1  ;;  %v1200_v5 = vsel %vm1039_vm3, %v1182_v2, 0.0 }
 0x315   : > { %1201 = vadd.xlane.f32.xlu1 %v1200_v5  ;;  %1198 = vadd.xlane.f32.xlu0 %v1197_v6  ;;  %v1187_v13 = vpop.xlane.xlu0 %1186 }
 0x316   : > { %v1184_v7 = vmul.f32 %v7231_v3, %v7231_v3  ;;  %v1183_v8 = vmul.f32 %v7233_v4, %v7233_v4  ;;  %v1209_v14 = vmul.f32 0.03125, %v1187_v13 }
 0x318   : > { %v1206_v9 = vsel %vm1039_vm3, %v1184_v7, 0.0  ;;  %v1203_v10 = vsel %vm1039_vm3, %v1183_v8, 0.0  ;;  %v1217_v15 = vadd.f32 1e-12, %v1209_v14 }
 0x319   : > { %1207 = vadd.xlane.f32.xlu1 %v1206_v9  ;;  %1204 = vadd.xlane.f32.xlu0 %v1203_v10 }
 0x31a   : > { %6605 = vrsqrt.f32 %v1217_v15 }
 0x327   : > { %v6606_v32 = vpop.eup %6605 }
 0x328   : > { %v1233_v39 = vmul.f32 %v6606_v32, %v7199_v28 }
 0x32a   : > { %v1247_v43 = vmul.f32 %v5613_v40, %v1233_v39 }
 0x32c   : > { %v7258_v28 = vadd.f32 %v5614_v46, %v1247_v43 }
 0x396   : > { %v1190_v16 = vpop.xlane.xlu1 %1189 }
 0x397   : > { %v1210_v17 = vmul.f32 0.03125, %v1190_v16 }
 0x399   : > { %v1218_v18 = vadd.f32 1e-12, %v1210_v17 }
 0x39a   : > { %v1196_v19 = vpop.xlane.xlu1 %1195  ;;  %v1193_v20 = vpop.xlane.xlu0 %1192 }
 0x39b   : > { %6607 = vrsqrt.f32 %v1218_v18  ;;  %v1212_v21 = vmul.f32 0.03125, %v1196_v19  ;;  %v1211_v22 = vmul.f32 0.03125, %v1193_v20 }
 0x39d   : > { %v1220_v23 = vadd.f32 1e-12, %v1212_v21  ;;  %v1219_v24 = vadd.f32 1e-12, %v1211_v22 }
 0x39e   : > { %v1202_v25 = vpop.xlane.xlu1 %1201  ;;  %v1199_v26 = vpop.xlane.xlu0 %1198 }
 0x39f   : > { %6609 = vrsqrt.f32 %v1220_v23  ;;  %v1214_v27 = vmul.f32 0.03125, %v1202_v25  ;;  %v1213_v29 = vmul.f32 0.03125, %v1199_v26 }
 0x3a0   : > { %6611 = vrsqrt.f32 %v1219_v24 }
 0x3a1   : > { %v1222_v30 = vadd.f32 1e-12, %v1214_v27  ;;  %v1221_v31 = vadd.f32 1e-12, %v1213_v29 }
 0x3a2   : > { %v1208_v33 = vpop.xlane.xlu1 %1207  ;;  %v1205_v34 = vpop.xlane.xlu0 %1204 }
 0x3a3   : > { %6613 = vrsqrt.f32 %v1222_v30  ;;  %v1216_v35 = vmul.f32 0.03125, %v1208_v33  ;;  %v1215_v36 = vmul.f32 0.03125, %v1205_v34 }
 0x3a4   : > { %6615 = vrsqrt.f32 %v1221_v31 }
 0x3a5   : > { %v1224_v37 = vadd.f32 1e-12, %v1216_v35  ;;  %v1223_v38 = vadd.f32 1e-12, %v1215_v36 }
 0x3a7   : > { %6617 = vrsqrt.f32 %v1224_v37 }
 0x3a8   : > { %v6608_v41 = vpop.eup %6607  ;;  %6619 = vrsqrt.f32 %v1223_v38 }
 0x3a9   : > { %v1234_v42 = vmul.f32 %v6608_v41, %v7210_v45 }
 0x3ab   : > { %v1248_v47 = vmul.f32 %v5613_v40, %v1234_v42 }
 0x3ac   : > { %v6610_v48 = vpop.eup %6609 }
 0x3ad   : > { %v6612_v49 = vpop.eup %6611  ;;  %v1236_v50 = vmul.f32 %v6610_v48, %v7208_v44  ;;  %v7260_v53 = vadd.f32 %v5614_v46, %v1248_v47 }
 0x3ae   : > { %v1235_v54 = vmul.f32 %v6612_v49, %v7214_v51 }
 0x3af   : > { %v1250_v55 = vmul.f32 %v5613_v40, %v1236_v50  ;;  %v1270_v45 = vpack.c.bf16 %v7260_v53, %v7258_v28 }
 0x3b0   : > { %v6614_v56 = vpop.eup %6613  ;;  %v1249_v57 = vmul.f32 %v5613_v40, %v1235_v54 }
 0x3b1   : > { %v6616_v59 = vpop.eup %6615  ;;  %6046 = vmatprep.mubr.msk.bf16.mxu1 %vm1039_vm3, %v1270_v45  ;;  %v7266_v60 = vadd.f32 %v5614_v46, %v1250_v55  ;;  %v1238_v61 = vmul.f32 %v6614_v56, %v7223_v58 }
 0x3b2   : > { %v7269_v44 = vadd.f32 %v5614_v46, %v1249_v57  ;;  %v1237_v62 = vmul.f32 %v6616_v59, %v7216_v52  ;;  %v7341_v59 = vld [vmem:[%s7338_s7] ss:$0 sm:$0xff] }
 0x3b3   : > { %v1252_v63 = vmul.f32 %v5613_v40, %v1238_v61 }
 0x3b4   : > { %v6618_v0 = vpop.eup %6617  ;;  %v1271_v51 = vpack.c.bf16 %v7266_v60, %v7269_v44  ;;  %v1251_v1 = vmul.f32 %v5613_v40, %v1237_v62 }
 0x3b5   : > { %v6620_v2 = vpop.eup %6619  ;;  %v7274_v5 = vadd.f32 %v5614_v46, %v1252_v63  ;;  %v1240_v6 = vmul.f32 %v6618_v0, %v7231_v3 }
 0x3b6   : > { %6047 = vmatmul.mubr.msk.bf16.vlgmr.msra.gmra.mxu1 %vm1039_vm3, %v1271_v51  ;;  %v7278_v7 = vadd.f32 %v5614_v46, %v1251_v1  ;;  %v1239_v58 = vmul.f32 %v6620_v2, %v7233_v4  ;;  %v5615_v4 = vld [vmem:[%s8753_s12] ss:$0 sm:$0xff] }
 0x3b7   : > { %v1254_v8 = vmul.f32 %v5613_v40, %v1240_v6 }
 0x3b8   : > { %v1272_v52 = vpack.c.bf16 %v7274_v5, %v7278_v7  ;;  %v1253_v9 = vmul.f32 %v5613_v40, %v1239_v58 }
 0x3b9   : > { %v7283_v10 = vadd.f32 %v5614_v46, %v1254_v8 }
 0x3ba   : > { %6050 = vmatprep.mubr.msk.bf16.mxu1 %vm1039_vm3, %v1272_v52  ;;  %v7286_v11 = vadd.f32 %v5614_v46, %v1253_v9 }
 0x3bc   : > { %v1273_v3 = vpack.c.bf16 %v7283_v10, %v7286_v11 }
 0x3be   : > { %6051 = vmatmul.mubr.msk.bf16.gmra.mxu1 %vm1039_vm3, %v1273_v3 }
 0x476   : > { %v6048_v12 = vpop.f32.mrf.mxu1 }
 0x477   : > { %v1352_v14 = vadd.f32 %v6048_v12, %v5615_v4 }
 0x478   : > { %v1343_v13 = vpop.f32.mrf.mxu1 }
 0x479   : > { %v1344_v16 = vadd.f32 %v5615_v4, %v1343_v13  ;;  %v1376_v19 = vmul.f32 0.35355338, %v1352_v14 }
 0x47a   : > { %v6049_v15 = vpop.f32.mrf.mxu1 }
 0x47b   : > { %v1355_v17 = vadd.f32 %v6049_v15, %v5615_v4  ;;  %v1374_v23 = vmul.f32 0.35355338, %v1344_v16 }
 0x47c   : > { %v1346_v18 = vpop.f32.mrf.mxu1 }
 0x47d   : > { %v1377_v20 = vmul.f32 0.35355338, %v1355_v17  ;;  %v1347_v21 = vadd.f32 %v5615_v4, %v1346_v18  ;;  %v7312_v43 = vpack.c.bf16 %v1355_v17, %v1352_v14 }
 0x47e   : > { %v6052_v22 = vpop.f32.mrf.mxu1 }
 0x47f   : > { %v7294_v24 = vpack.c.bf16 %v1377_v20, %v1376_v19  ;;  %v1375_v25 = vmul.f32 0.35355338, %v1347_v21  ;;  %v1368_v29 = vadd.f32 %v6052_v22, %v5615_v4  ;;  %v7316_v46 = vpack.c.bf16 %v1347_v21, %v1344_v16 }
 0x480   : > { %v1359_v26 = vpop.f32.mrf.mxu1 }
 0x481   : > { %v7296_v27 = vpack.c.bf16 %v1375_v25, %v1374_v23  ;;  %v1360_v31 = vadd.f32 %v5615_v4, %v1359_v26  ;;  %v1380_v34 = vmul.f32 0.35355338, %v1368_v29 }
 0x482   : > { %v6053_v30 = vpop.f32.mrf.mxu1 }
 0x483   : > { %v1371_v32 = vadd.f32 %v6053_v30, %v5615_v4  ;;  %6062 = vmatprep.mubr.msk.bf16.mxu0 %vm1408_vm5, %v7296_v27  ;;  %v1378_v38 = vmul.f32 0.35355338, %v1360_v31 }
 0x484   : > { %v1362_v33 = vpop.f32.mrf.mxu1 }
 0x485   : > { %v1381_v35 = vmul.f32 0.35355338, %v1371_v32  ;;  %v7300_v36 = vpack.c.bf16 %v1371_v32, %v1368_v29  ;;  %v1363_v37 = vadd.f32 %v5615_v4, %v1362_v33 }
 0x487   : > { %v7302_v39 = vpack.c.bf16 %v1381_v35, %v1380_v34  ;;  %v1379_v40 = vmul.f32 0.35355338, %v1363_v37  ;;  %v7304_v41 = vpack.c.bf16 %v1363_v37, %v1360_v31  ;;  %1406 = vrot.lane.b32.xlu0 %v7300_v36, %s6984_s28 }
 0x489   : > { %v7308_v42 = vpack.c.bf16 %v1379_v40, %v1378_v38  ;;  %1404 = vrot.lane.b32.xlu1 %v7304_v41, %s6984_s28 }
 0x48d   : > { %1402 = vrot.lane.b32.xlu1 %v7312_v43, %s6984_s28 }
 0x491   : > { %1400 = vrot.lane.b32.xlu1 %v7316_v46, %s6984_s28 }
 0x4f9   : > { %v1407_v47 = vpop.permute.xlu0 %1406 }
 0x4fa   : > { %6403 = vmatprep.subr.msk.bf16.mxu0 %vm1408_vm5, %v1407_v47  ;;  %v1431_v48 = vsel %vm1408_vm5, %v1407_v47, 0 }
 0x4fb   : > { %6055 = vmatpush3.bf16.xpose.msra.mxu0 %v1431_v48  ;;  %v1405_v49 = vpop.permute.xlu1 %1404 }
 0x4fc   : > { %6404 = vmatprep.subr.msk.bf16.mxu0 %vm1408_vm5, %v1405_v49  ;;  %v1428_v50 = vsel %vm1408_vm5, %v1405_v49, 0 }
 0x4ff   : > { %v1403_v54 = vpop.permute.xlu1 %1402 }
 0x500   : > { %v1425_v55 = vsel %vm1408_vm5, %v1403_v54, 0 }
 0x503   : > { %6057 = vmatpush3.bf16.xpose.msra.mxu0 %v1428_v50  ;;  %v1401_v45 = vpop.permute.xlu1 %1400 }
 0x504   : > { %6405 = vmatprep.subr.msk.bf16.mxu0 %vm1408_vm5, %v1403_v54  ;;  %v1422_v56 = vsel %vm1408_vm5, %v1401_v45, 0 }
 0x50b   : > { %6059 = vmatpush3.bf16.xpose.msra.mxu0 %v1425_v55 }
 0x50c   : > { %6406 = vmatprep.subr.msk.bf16.mxu0 %vm1408_vm5, %v1401_v45 }
 0x513   : > { %6061 = vmatpush3.bf16.xpose.msra.mxu0 %v1422_v56 }
 0x51a   : > { %6063 = vmatmul.mubr.msk.bf16.vlgmr.msra.gmra.mxu0 %vm1408_vm5, %v7294_v24 }
 0x51b   : > { %6066 = vmatprep.mubr.msk.bf16.mxu0 %vm1408_vm5, %v7308_v42 }
 0x522   : > { %6067 = vmatmul.mubr.msk.bf16.gmra.mxu0 %vm1408_vm5, %v7302_v39 }
 0x5da   : > { %v6064_v57 = vpop.f32.mrf.mxu0 }
 0x5db   : > { %v1476_v0 = vadd.f32 %v6064_v57, %v7341_v59 }
 0x5dc   : > { %v1467_v61 = vpop.f32.mrf.mxu0 }
 0x5dd   : > { %v1468_v62 = vadd.f32 %v7341_v59, %v1467_v61  ;;  %v1504_v52 = vsel %vm935_vm2, %v1476_v0, -inf }
 0x5de   : > { %v6065_v63 = vpop.f32.mrf.mxu0 }
 0x5df   : > { %v1498_v51 = vsel %vm935_vm2, %v1468_v62, -inf  ;;  %v1479_v58 = vadd.f32 %v6065_v63, %v7341_v59 }
 0x5e0   : > { %v1470_v1 = vpop.f32.mrf.mxu0  ;;  %1499 = vmax.xlane.f32.xlu0 %v1498_v51 }
 0x5e1   : > { %v1471_v2 = vadd.f32 %v7341_v59, %v1470_v1  ;;  %v1507_v13 = vsel %vm935_vm2, %v1479_v58, -inf }
 0x5e2   : > { %v6068_v6 = vpop.f32.mrf.mxu0 }
 0x5e3   : > { %v1501_v8 = vsel %vm935_vm2, %v1471_v2, -inf  ;;  %v1492_v12 = vadd.f32 %v6068_v6, %v7341_v59 }
 0x5e4   : > { %1502 = vmax.xlane.f32.xlu1 %v1501_v8  ;;  %1505 = vmax.xlane.f32.xlu0 %v1504_v52  ;;  %v1483_v9 = vpop.f32.mrf.mxu0 }
 0x5e5   : > { %v1484_v17 = vadd.f32 %v7341_v59, %v1483_v9  ;;  %v1516_v18 = vsel %vm935_vm2, %v1492_v12, -inf }
 0x5e6   : > { %v6069_v3 = vpop.f32.mrf.mxu0 }
 0x5e7   : > { %v1495_v4 = vadd.f32 %v6069_v3, %v7341_v59  ;;  %v1510_v20 = vsel %vm935_vm2, %v1484_v17, -inf }
 0x5e8   : > { %1508 = vmax.xlane.f32.xlu0 %v1507_v13  ;;  %v1486_v14 = vpop.f32.mrf.mxu0 }
 0x5e9   : > { %v1487_v15 = vadd.f32 %v7341_v59, %v1486_v14  ;;  %v1519_v16 = vsel %vm935_vm2, %v1495_v4, -inf }
 0x5ea   : > { %1520 = vmax.xlane.f32.xlu1 %v1519_v16 }
 0x5eb   : > { %v1513_v19 = vsel %vm935_vm2, %v1487_v15, -inf }
 0x5ec   : > { %1517 = vmax.xlane.f32.xlu0 %v1516_v18 }
 0x5ee   : > { %1514 = vmax.xlane.f32.xlu1 %v1513_v19 }
 0x5f0   : > { %1511 = vmax.xlane.f32.xlu0 %v1510_v20 }
 0x5ff   : > { %1594 = vrot.lane.b32.xlu1 %v7304_v41, %s6985_s3 }
 0x603   : > { %1592 = vrot.lane.b32.xlu1 %v7312_v43, %s6985_s3 }
 0x606   : > { %1596 = vrot.lane.b32.xlu0 %v7300_v36, %s6985_s3 }
 0x607   : > { %1590 = vrot.lane.b32.xlu1 %v7316_v46, %s6985_s3 }
 0x669   : > { %v1500_v21 = vpop.xlane.xlu0 %1499 }
 0x66a   : > { %v1522_v22 = vsub.f32 %v1468_v62, %v1500_v21 }
 0x66c   : > { %v1530_v31 = vmul.f32 1.442695, %v1522_v22 }
 0x66d   : > { %v1503_v23 = vpop.xlane.xlu1 %1502  ;;  %v1506_v25 = vpop.xlane.xlu0 %1505 }
 0x66e   : > { %v1524_v26 = vsub.f32 %v1476_v0, %v1506_v25  ;;  %v1523_v29 = vsub.f32 %v1471_v2, %v1503_v23 }
 0x670   : > { %v1534_v30 = vmul.f32 1.442695, %v1524_v26  ;;  %v1532_v35 = vmul.f32 1.442695, %v1523_v29 }
 0x671   : > { %v1509_v32 = vpop.xlane.xlu0 %1508 }
 0x672   : > { %v1525_v33 = vsub.f32 %v1479_v58, %v1509_v32  ;;  %6621 = vpow2.f32 %v1534_v30 }
 0x673   : > { %v1521_v34 = vpop.xlane.xlu1 %1520  ;;  %6623 = vpow2.f32 %v1530_v31 }
 0x674   : > { %v1536_v37 = vmul.f32 1.442695, %v1525_v33  ;;  %v1529_v38 = vsub.f32 %v1495_v4, %v1521_v34 }
 0x675   : > { %v1518_v40 = vpop.xlane.xlu0 %1517 }
 0x676   : > { %6625 = vpow2.f32 %v1536_v37  ;;  %v1528_v47 = vsub.f32 %v1492_v12, %v1518_v40  ;;  %v1544_v50 = vmul.f32 1.442695, %v1529_v38 }
 0x677   : > { %v1515_v48 = vpop.xlane.xlu1 %1514  ;;  %6627 = vpow2.f32 %v1532_v35 }
 0x678   : > { %v1542_v49 = vmul.f32 1.442695, %v1528_v47  ;;  %v1527_v54 = vsub.f32 %v1487_v15, %v1515_v48 }
 0x679   : > { %v1512_v55 = vpop.xlane.xlu0 %1511 }
 0x67a   : > { %6629 = vpow2.f32 %v1542_v49  ;;  %v1526_v45 = vsub.f32 %v1484_v17, %v1512_v55  ;;  %v1540_v61 = vmul.f32 1.442695, %v1527_v54 }
 0x67b   : > { %v1595_v56 = vpop.permute.xlu1 %1594  ;;  %6631 = vpow2.f32 %v1544_v50 }
 0x67c   : > { %v1538_v57 = vmul.f32 1.442695, %v1526_v45 }
 0x67d   : > { %v1597_v62 = vpop.permute.xlu0 %1596 }
 0x67e   : > { %6633 = vpow2.f32 %v1538_v57  ;;  %6070 = vmatprep.subr.bf16.mxu1 %v1597_v62 }
 0x67f   : > { %6071 = vmatpush3.bf16.msra.mxu1 %v1597_v62  ;;  %v7367_v63 = vpop.eup %6621  ;;  %6635 = vpow2.f32 %v1540_v61  ;;  %v1593_v0 = vpop.permute.xlu1 %1592 }
 0x680   : > { %6072 = vmatprep.subr.bf16.mxu1 %v1595_v56  ;;  %v1552_v51 = vsel %vm935_vm2, %v7367_v63, 0.0  ;;  %v6624_v1 = vpop.eup %6623 }
 0x681   : > { %1553 = vadd.xlane.f32.xlu0 %v1552_v51  ;;  %v1546_v8 = vsel %vm935_vm2, %v6624_v1, 0.0 }
 0x683   : > { %v6626_v2 = vpop.eup %6625  ;;  %6073 = vmatpush3.bf16.msra.mxu1 %v1595_v56  ;;  %v1591_v9 = vpop.permute.xlu1 %1590 }
 0x684   : > { %6074 = vmatprep.subr.bf16.mxu1 %v1593_v0  ;;  %v1555_v6 = vsel %vm935_vm2, %v6626_v2, 0.0  ;;  %v6628_v58 = vpop.eup %6627 }
 0x685   : > { %1556 = vadd.xlane.f32.xlu1 %v1555_v6  ;;  %1547 = vadd.xlane.f32.xlu0 %v1546_v8  ;;  %v1549_v3 = vsel %vm935_vm2, %v6628_v58, 0.0 }
 0x687   : > { %v7373_v52 = vpop.eup %6629  ;;  %6075 = vmatpush3.bf16.msra.mxu1 %v1593_v0 }
 0x688   : > { %6076 = vmatprep.subr.bf16.mxu1 %v1591_v9  ;;  %v1564_v12 = vsel %vm935_vm2, %v7373_v52, 0.0  ;;  %v6632_v4 = vpop.eup %6631 }
 0x689   : > { %1550 = vadd.xlane.f32.xlu1 %v1549_v3  ;;  %1565 = vadd.xlane.f32.xlu0 %v1564_v12  ;;  %v1567_v15 = vsel %vm935_vm2, %v6632_v4, 0.0 }
 0x68b   : > { %v6634_v13 = vpop.eup %6633  ;;  %6077 = vmatpush3.bf16.msra.mxu1 %v1591_v9 }
 0x68c   : > { %v1558_v14 = vsel %vm935_vm2, %v6634_v13, 0.0  ;;  %v6636_v16 = vpop.eup %6635 }
 0x68d   : > { %1559 = vadd.xlane.f32.xlu1 %v1558_v14  ;;  %1568 = vadd.xlane.f32.xlu0 %v1567_v15  ;;  %v1561_v17 = vsel %vm935_vm2, %v6636_v16, 0.0 }
 0x691   : > { %1562 = vadd.xlane.f32.xlu0 %v1561_v17 }
 0x69e   : > { %1695 = vrot.lane.b32.xlu1 %v7304_v41, %s8791_s25 }
 0x6a2   : > { %1693 = vrot.lane.b32.xlu1 %v7312_v43, %s8791_s25 }
 0x6a6   : > { %1691 = vrot.lane.b32.xlu1 %v7316_v46, %s8791_s25 }
 0x6a7   : > { %1697 = vrot.lane.b32.xlu0 %v7300_v36, %s8791_s25  ;;  %s8818_s25 = smov 56  }
 0x6aa   : > { %1685 = vrot.lane.b32.xlu1 %v7294_v24, %s8789_s8 }
 0x6ab   : > { %1683 = vrot.lane.b32.xlu0 %v7296_v27, %s8789_s8 }
 0x6ae   : > { %1689 = vrot.lane.b32.xlu1 %v7302_v39, %s8789_s8 }
 0x6af   : > { %1687 = vrot.lane.b32.xlu0 %v7308_v42, %s8789_s8  ;;  %s8819_s8 = smov 80  }
 0x70a   : > { %v1554_v18 = vpop.xlane.xlu0 %1553 }
 0x70e   : > { %v1557_v19 = vpop.xlane.xlu1 %1556  ;;  %v1548_v20 = vpop.xlane.xlu0 %1547 }
 0x70f   : > { %6637 = vrcp.f32 %v1557_v19 }
 0x710   : > { %6639 = vrcp.f32 %v1548_v20 }
 0x711   : > { %6641 = vrcp.f32 %v1554_v18 }
 0x712   : > { %v1551_v21 = vpop.xlane.xlu1 %1550  ;;  %v1566_v22 = vpop.xlane.xlu0 %1565 }
 0x713   : > { %6643 = vrcp.f32 %v1551_v21 }
 0x716   : > { %v1560_v23 = vpop.xlane.xlu1 %1559  ;;  %v1569_v25 = vpop.xlane.xlu0 %1568 }
 0x717   : > { %6645 = vrcp.f32 %v1569_v25 }
 0x718   : > { %6647 = vrcp.f32 %v1560_v23 }
 0x719   : > { %6649 = vrcp.f32 %v1566_v22 }
 0x71a   : > { %v1563_v26 = vpop.xlane.xlu0 %1562  ;;  %v1696_v54 = vpop.permute.xlu1 %1695 }
 0x71b   : > { %6651 = vrcp.f32 %v1563_v26 }
 0x71c   : > { %v6638_v29 = vpop.eup %6637 }
 0x71d   : > { %v6640_v30 = vpop.eup %6639  ;;  %v1581_v34 = vmul.f32 %v6638_v29, %v6626_v2 }
 0x71e   : > { %v6642_v31 = vpop.eup %6641  ;;  %v1698_v32 = vpop.permute.xlu0 %1697  ;;  %v1578_v35 = vmul.f32 %v6640_v30, %v6624_v1  ;;  %v1718_v1 = vsel %vm1408_vm5, %v1696_v54, 0 }
 0x71f   : > { %6407 = vmatprep.subr.msk.bf16.mxu1 %vm1408_vm5, %v1698_v32  ;;  %v1580_v38 = vmul.f32 %v6642_v31, %v7367_v63  ;;  %v1721_v49 = vsel %vm1408_vm5, %v1698_v32, 0  ;;  %v1694_v2 = vpop.permute.xlu1 %1693 }
 0x720   : > { %v6644_v33 = vpop.eup %6643  ;;  %v1715_v6 = vsel %vm1408_vm5, %v1694_v2, 0 }
 0x721   : > { %v1579_v37 = vmul.f32 %v6644_v33, %v6628_v58  ;;  %v1587_v47 = vpack.c.bf16 %v1581_v34, %v1580_v38 }
 0x722   : > { %v1684_v51 = vpop.permute.xlu0 %1683 }
 0x723   : > { %v1586_v40 = vpack.c.bf16 %v1579_v37, %v1578_v35  ;;  %v1692_v58 = vpop.permute.xlu1 %1691 }
 0x724   : > { %v6646_v48 = vpop.eup %6645  ;;  %v1712_v8 = vsel %vm1408_vm5, %v1692_v58, 0 }
 0x725   : > { %6078 = vmatprep.mubr.msk.bf16.mxu1 %vm935_vm2, %v1586_v40  ;;  %v6648_v50 = vpop.eup %6647  ;;  %v1585_v56 = vmul.f32 %v6646_v48, %v6632_v4 }
 0x726   : > { %6079 = vmatmul.mubr.msk.bf16.vlgmr.msra.gmra.mxu1 %vm935_vm2, %v1587_v47  ;;  %v6650_v55 = vpop.eup %6649  ;;  %v1582_v57 = vmul.f32 %v6648_v50, %v6634_v13  ;;  %v1688_v9 = vpop.permute.xlu0 %1687 }
 0x727   : > { %6087 = vmatpush3.bf16.xpose.msra.mxu1 %v1721_v49  ;;  %v1584_v62 = vmul.f32 %v6650_v55, %v7373_v52  ;;  %v1686_v52 = vpop.permute.xlu1 %1685 }
 0x728   : > { %6408 = vmatprep.subr.msk.bf16.mxu1 %vm1408_vm5, %v1696_v54  ;;  %v6652_v45 = vpop.eup %6651 }
 0x729   : > { %v1583_v61 = vmul.f32 %v6652_v45, %v6636_v16  ;;  %v1589_v0 = vpack.c.bf16 %v1585_v56, %v1584_v62 }
 0x72b   : > { %v1588_v63 = vpack.c.bf16 %v1583_v61, %v1582_v57  ;;  %v1690_v3 = vpop.permute.xlu1 %1689 }
 0x72d   : > { %6082 = vmatprep.mubr.msk.bf16.mxu1 %vm935_vm2, %v1588_v63 }
 0x72e   : > { %6083 = vmatmul.mubr.msk.bf16.gmra.mxu1 %vm935_vm2, %v1589_v0 }
 0x72f   : > { %6089 = vmatpush3.bf16.xpose.msra.mxu1 %v1718_v1  ;;  %6094 = vmatprep.mubr.msk.bf16.mxu1 %vm1408_vm5, %v1684_v51 }
 0x730   : > { %6409 = vmatprep.subr.msk.bf16.mxu1 %vm1408_vm5, %v1694_v2 }
 0x737   : > { %6091 = vmatpush3.bf16.xpose.msra.mxu1 %v1715_v6 }
 0x738   : > { %6410 = vmatprep.subr.msk.bf16.mxu1 %vm1408_vm5, %v1692_v58 }
 0x73f   : > { %6093 = vmatpush3.bf16.xpose.msra.mxu1 %v1712_v8 }
 0x746   : > { %6095 = vmatmul.mubr.msk.bf16.vlgmr.msra.gmra.mxu1 %vm1408_vm5, %v1686_v52 }
 0x747   : > { %6098 = vmatprep.mubr.msk.bf16.mxu1 %vm1408_vm5, %v1688_v9 }
 0x74e   : > { %6099 = vmatmul.mubr.msk.bf16.gmra.mxu1 %vm1408_vm5, %v1690_v3 }
 0x7e6   : > { %v7415_v12 = vpop.f32.mrf.mxu1 }
 0x7e8   : > { %v7417_v4 = vpop.f32.mrf.mxu1 }
 0x7ea   : > { %v7419_v13 = vpop.f32.mrf.mxu1 }
 0x7ec   : > { %v7421_v14 = vpop.f32.mrf.mxu1 }
 0x7ee   : > { %v7423_v15 = vpop.f32.mrf.mxu1 }
 0x7f0   : > { %v7425_v16 = vpop.f32.mrf.mxu1 }
 0x7f2   : > { %v7427_v17 = vpop.f32.mrf.mxu1 }
 0x7f4   : > { %v7429_v18 = vpop.f32.mrf.mxu1 }
 0x806   : > { %v6096_v19 = vpop.f32.mrf.mxu1 }
 0x807   : > { %v1766_v23 = vadd.f32 %v6096_v19, %v7341_v59 }
 0x808   : > { %v1757_v20 = vpop.f32.mrf.mxu1 }
 0x809   : > { %v1758_v21 = vadd.f32 %v7341_v59, %v1757_v20  ;;  %v1794_v33 = vsel %vm935_vm2, %v1766_v23, -inf }
 0x80a   : > { %v6097_v22 = vpop.f32.mrf.mxu1 }
 0x80b   : > { %v1788_v25 = vsel %vm935_vm2, %v1758_v21, -inf  ;;  %v1769_v31 = vadd.f32 %v6097_v22, %v7341_v59 }
 0x80c   : > { %v1760_v26 = vpop.f32.mrf.mxu1  ;;  %1789 = vmax.xlane.f32.xlu0 %v1788_v25 }
 0x80d   : > { %v1761_v29 = vadd.f32 %v7341_v59, %v1760_v26  ;;  %v1797_v40 = vsel %vm935_vm2, %v1769_v31, -inf }
 0x80e   : > { %v6100_v30 = vpop.f32.mrf.mxu1 }
 0x80f   : > { %v1791_v32 = vsel %vm935_vm2, %v1761_v29, -inf  ;;  %v1782_v37 = vadd.f32 %v6100_v30, %v7341_v59 }
 0x810   : > { %1792 = vmax.xlane.f32.xlu1 %v1791_v32  ;;  %1795 = vmax.xlane.f32.xlu0 %v1794_v33  ;;  %v1773_v34 = vpop.f32.mrf.mxu1 }
 0x811   : > { %v1774_v50 = vadd.f32 %v7341_v59, %v1773_v34  ;;  %v1806_v54 = vsel %vm935_vm2, %v1782_v37, -inf }
 0x812   : > { %v6101_v35 = vpop.f32.mrf.mxu1 }
 0x813   : > { %v1785_v38 = vadd.f32 %v6101_v35, %v7341_v59  ;;  %v1800_v45 = vsel %vm935_vm2, %v1774_v50, -inf }
 0x814   : > { %1798 = vmax.xlane.f32.xlu0 %v1797_v40  ;;  %v1776_v47 = vpop.f32.mrf.mxu1 }
 0x815   : > { %v1777_v48 = vadd.f32 %v7341_v59, %v1776_v47  ;;  %v1809_v49 = vsel %vm935_vm2, %v1785_v38, -inf }
 0x816   : > { %1810 = vmax.xlane.f32.xlu1 %v1809_v49 }
 0x817   : > { %v1803_v55 = vsel %vm935_vm2, %v1777_v48, -inf }
 0x818   : > { %1807 = vmax.xlane.f32.xlu0 %v1806_v54 }
 0x81a   : > { %1804 = vmax.xlane.f32.xlu1 %v1803_v55 }
 0x81c   : > { %1801 = vmax.xlane.f32.xlu0 %v1800_v45 }
 0x82b   : > { %1884 = vrot.lane.b32.xlu1 %v7304_v41, %s8783_s4 }
 0x82f   : > { %1882 = vrot.lane.b32.xlu1 %v7312_v43, %s8783_s4 }
 0x832   : > { %1886 = vrot.lane.b32.xlu0 %v7300_v36, %s8783_s4 }
 0x833   : > { %1880 = vrot.lane.b32.xlu1 %v7316_v46, %s8783_s4  ;;  %s8785_s4 = smov 24  }
 0x895   : > { %v1790_v56 = vpop.xlane.xlu0 %1789 }
 0x896   : > { %v1812_v57 = vsub.f32 %v1758_v21, %v1790_v56 }
 0x898   : > { %v1820_v1 = vmul.f32 1.442695, %v1812_v57 }
 0x899   : > { %v1793_v61 = vpop.xlane.xlu1 %1792  ;;  %v1796_v62 = vpop.xlane.xlu0 %1795 }
 0x89a   : > { %v1814_v63 = vsub.f32 %v1766_v23, %v1796_v62  ;;  %v1813_v0 = vsub.f32 %v1761_v29, %v1793_v61 }
 0x89c   : > { %v1824_v51 = vmul.f32 1.442695, %v1814_v63  ;;  %v1822_v8 = vmul.f32 1.442695, %v1813_v0 }
 0x89d   : > { %v1799_v2 = vpop.xlane.xlu0 %1798 }
 0x89e   : > { %v1815_v6 = vsub.f32 %v1769_v31, %v1799_v2  ;;  %6653 = vpow2.f32 %v1824_v51 }
 0x89f   : > { %v1811_v58 = vpop.xlane.xlu1 %1810  ;;  %6655 = vpow2.f32 %v1820_v1 }
 0x8a0   : > { %v1826_v52 = vmul.f32 1.442695, %v1815_v6  ;;  %v1819_v9 = vsub.f32 %v1785_v38, %v1811_v58 }
 0x8a1   : > { %v1808_v3 = vpop.xlane.xlu0 %1807 }
 0x8a2   : > { %6657 = vpow2.f32 %v1826_v52  ;;  %v1818_v19 = vsub.f32 %v1782_v37, %v1808_v3  ;;  %v1834_v22 = vmul.f32 1.442695, %v1819_v9 }
 0x8a3   : > { %v1805_v20 = vpop.xlane.xlu1 %1804  ;;  %6659 = vpow2.f32 %v1822_v8 }
 0x8a4   : > { %v1832_v21 = vmul.f32 1.442695, %v1818_v19  ;;  %v1817_v25 = vsub.f32 %v1777_v48, %v1805_v20 }
 0x8a5   : > { %v1802_v23 = vpop.xlane.xlu0 %1801 }
 0x8a6   : > { %6661 = vpow2.f32 %v1832_v21  ;;  %v1816_v26 = vsub.f32 %v1774_v50, %v1802_v23  ;;  %v1830_v31 = vmul.f32 1.442695, %v1817_v25 }
 0x8a7   : > { %v1885_v29 = vpop.permute.xlu1 %1884  ;;  %6663 = vpow2.f32 %v1834_v22 }
 0x8a8   : > { %v1828_v30 = vmul.f32 1.442695, %v1816_v26 }
 0x8a9   : > { %v1887_v32 = vpop.permute.xlu0 %1886 }
 0x8aa   : > { %6665 = vpow2.f32 %v1828_v30  ;;  %6102 = vmatprep.subr.bf16.mxu0 %v1887_v32 }
 0x8ab   : > { %6103 = vmatpush3.bf16.msra.mxu0 %v1887_v32  ;;  %v7455_v33 = vpop.eup %6653  ;;  %6667 = vpow2.f32 %v1830_v31  ;;  %v1883_v34 = vpop.permute.xlu1 %1882 }
 0x8ac   : > { %6104 = vmatprep.subr.bf16.mxu0 %v1885_v29  ;;  %v1842_v35 = vsel %vm935_vm2, %v7455_v33, 0.0  ;;  %v6656_v37 = vpop.eup %6655 }
 0x8ad   : > { %1843 = vadd.xlane.f32.xlu0 %v1842_v35  ;;  %v1836_v48 = vsel %vm935_vm2, %v6656_v37, 0.0 }
 0x8af   : > { %v6658_v38 = vpop.eup %6657  ;;  %6105 = vmatpush3.bf16.msra.mxu0 %v1885_v29  ;;  %v1881_v50 = vpop.permute.xlu1 %1880 }
 0x8b0   : > { %6106 = vmatprep.subr.bf16.mxu0 %v1883_v34  ;;  %v1845_v40 = vsel %vm935_vm2, %v6658_v38, 0.0  ;;  %v6660_v47 = vpop.eup %6659 }
 0x8b1   : > { %1846 = vadd.xlane.f32.xlu1 %v1845_v40  ;;  %1837 = vadd.xlane.f32.xlu0 %v1836_v48  ;;  %v1839_v54 = vsel %vm935_vm2, %v6660_v47, 0.0 }
 0x8b3   : > { %v7461_v49 = vpop.eup %6661  ;;  %6107 = vmatpush3.bf16.msra.mxu0 %v1883_v34 }
 0x8b4   : > { %6108 = vmatprep.subr.bf16.mxu0 %v1881_v50  ;;  %v1854_v55 = vsel %vm935_vm2, %v7461_v49, 0.0  ;;  %v6664_v45 = vpop.eup %6663 }
 0x8b5   : > { %1840 = vadd.xlane.f32.xlu1 %v1839_v54  ;;  %1855 = vadd.xlane.f32.xlu0 %v1854_v55  ;;  %v1857_v61 = vsel %vm935_vm2, %v6664_v45, 0.0 }
 0x8b7   : > { %v6666_v56 = vpop.eup %6665  ;;  %6109 = vmatpush3.bf16.msra.mxu0 %v1881_v50 }
 0x8b8   : > { %v1848_v57 = vsel %vm935_vm2, %v6666_v56, 0.0  ;;  %v6668_v62 = vpop.eup %6667 }
 0x8b9   : > { %1849 = vadd.xlane.f32.xlu1 %v1848_v57  ;;  %1858 = vadd.xlane.f32.xlu0 %v1857_v61  ;;  %v1851_v63 = vsel %vm935_vm2, %v6668_v62, 0.0 }
 0x8bd   : > { %1852 = vadd.xlane.f32.xlu0 %v1851_v63 }
 0x8ca   : > { %1981 = vrot.lane.b32.xlu1 %v7304_v41, %s8781_s1 }
 0x8ce   : > { %1979 = vrot.lane.b32.xlu1 %v7312_v43, %s8781_s1 }
 0x8d2   : > { %1977 = vrot.lane.b32.xlu1 %v7316_v46, %s8781_s1 }
 0x8d3   : > { %1983 = vrot.lane.b32.xlu0 %v7300_v36, %s8781_s1  ;;  %s8826_s1 = smov 16  }
 0x8d6   : > { %1971 = vrot.lane.b32.xlu1 %v7294_v24, %s8779_s6 }
 0x8d7   : > { %1969 = vrot.lane.b32.xlu0 %v7296_v27, %s8779_s6 }
 0x8da   : > { %1975 = vrot.lane.b32.xlu1 %v7302_v39, %s8779_s6 }
 0x8db   : > { %1973 = vrot.lane.b32.xlu0 %v7308_v42, %s8779_s6 }
 0x936   : > { %v1844_v0 = vpop.xlane.xlu0 %1843 }
 0x93a   : > { %v1847_v51 = vpop.xlane.xlu1 %1846  ;;  %v1838_v1 = vpop.xlane.xlu0 %1837 }
 0x93b   : > { %6669 = vrcp.f32 %v1847_v51 }
 0x93c   : > { %6671 = vrcp.f32 %v1838_v1 }
 0x93d   : > { %6673 = vrcp.f32 %v1844_v0 }
 0x93e   : > { %v1841_v2 = vpop.xlane.xlu1 %1840  ;;  %v1856_v6 = vpop.xlane.xlu0 %1855 }
 0x93f   : > { %6675 = vrcp.f32 %v1841_v2 }
 0x942   : > { %v1850_v58 = vpop.xlane.xlu1 %1849  ;;  %v1859_v8 = vpop.xlane.xlu0 %1858 }
 0x943   : > { %6677 = vrcp.f32 %v1859_v8 }
 0x944   : > { %6679 = vrcp.f32 %v1850_v58 }
 0x945   : > { %6681 = vrcp.f32 %v1856_v6 }
 0x946   : > { %v1853_v52 = vpop.xlane.xlu0 %1852  ;;  %v1982_v35 = vpop.permute.xlu1 %1981 }
 0x947   : > { %6683 = vrcp.f32 %v1853_v52  ;;  %v2004_v57 = vsel %vm1408_vm5, %v1982_v35, 0 }
 0x948   : > { %v6670_v9 = vpop.eup %6669 }
 0x949   : > { %v6672_v3 = vpop.eup %6671  ;;  %v1871_v22 = vmul.f32 %v6670_v9, %v6658_v38 }
 0x94a   : > { %v6674_v19 = vpop.eup %6673  ;;  %v1984_v20 = vpop.permute.xlu0 %1983  ;;  %v1868_v25 = vmul.f32 %v6672_v3, %v6656_v37 }
 0x94b   : > { %6411 = vmatprep.subr.msk.bf16.mxu0 %vm1408_vm5, %v1984_v20  ;;  %v1870_v26 = vmul.f32 %v6674_v19, %v7455_v33  ;;  %v2007_v32 = vsel %vm1408_vm5, %v1984_v20, 0  ;;  %v1980_v61 = vpop.permute.xlu1 %1979 }
 0x94c   : > { %v6676_v21 = vpop.eup %6675 }
 0x94d   : > { %v1869_v23 = vmul.f32 %v6676_v21, %v6660_v47  ;;  %v1877_v30 = vpack.c.bf16 %v1871_v22, %v1870_v26 }
 0x94e   : > { %v1970_v55 = vpop.permute.xlu0 %1969 }
 0x94f   : > { %v1876_v29 = vpack.c.bf16 %v1869_v23, %v1868_v25 }
 0x950   : > { %v6678_v31 = vpop.eup %6677 }
 0x951   : > { %6110 = vmatprep.mubr.msk.bf16.mxu0 %vm935_vm2, %v1876_v29  ;;  %v6680_v34 = vpop.eup %6679  ;;  %v1875_v37 = vmul.f32 %v6678_v31, %v6664_v45  ;;  %v2001_v45 = vsel %vm1408_vm5, %v1980_v61, 0 }
 0x952   : > { %6111 = vmatmul.mubr.msk.bf16.vlgmr.msra.gmra.mxu0 %vm935_vm2, %v1877_v30  ;;  %v6682_v40 = vpop.eup %6681  ;;  %v1872_v47 = vmul.f32 %v6680_v34, %v6666_v56  ;;  %v1978_v56 = vpop.permute.xlu1 %1977 }
 0x953   : > { %6119 = vmatpush3.bf16.xpose.msra.mxu0 %v2007_v32  ;;  %v1874_v33 = vmul.f32 %v6682_v40, %v7461_v49  ;;  %v1998_v49 = vsel %vm1408_vm5, %v1978_v56, 0  ;;  %v1974_v63 = vpop.permute.xlu0 %1973 }
 0x954   : > { %6412 = vmatprep.subr.msk.bf16.mxu0 %vm1408_vm5, %v1982_v35  ;;  %v6684_v38 = vpop.eup %6683 }
 0x955   : > { %v1873_v48 = vmul.f32 %v6684_v38, %v6668_v62  ;;  %v1879_v54 = vpack.c.bf16 %v1875_v37, %v1874_v33 }
 0x956   : > { %v1972_v62 = vpop.permute.xlu1 %1971 }
 0x957   : > { %v1878_v50 = vpack.c.bf16 %v1873_v48, %v1872_v47 }
 0x959   : > { %6114 = vmatprep.mubr.msk.bf16.mxu0 %vm935_vm2, %v1878_v50 }
 0x95a   : > { %6115 = vmatmul.mubr.msk.bf16.gmra.mxu0 %vm935_vm2, %v1879_v54  ;;  %v1976_v0 = vpop.permute.xlu1 %1975 }
 0x95b   : > { %6121 = vmatpush3.bf16.xpose.msra.mxu0 %v2004_v57  ;;  %6126 = vmatprep.mubr.msk.bf16.mxu0 %vm1408_vm5, %v1970_v55 }
 0x95c   : > { %6413 = vmatprep.subr.msk.bf16.mxu0 %vm1408_vm5, %v1980_v61 }
 0x963   : > { %6123 = vmatpush3.bf16.xpose.msra.mxu0 %v2001_v45 }
 0x964   : > { %6414 = vmatprep.subr.msk.bf16.mxu0 %vm1408_vm5, %v1978_v56 }
 0x96b   : > { %6125 = vmatpush3.bf16.xpose.msra.mxu0 %v1998_v49 }
 0x972   : > { %6127 = vmatmul.mubr.msk.bf16.vlgmr.msra.gmra.mxu0 %vm1408_vm5, %v1972_v62 }
 0x973   : > { %6130 = vmatprep.mubr.msk.bf16.mxu0 %vm1408_vm5, %v1974_v63 }
 0x97a   : > { %6131 = vmatmul.mubr.msk.bf16.gmra.mxu0 %vm1408_vm5, %v1976_v0 }
 0xa12   : > { %v7503_v51 = vpop.f32.mrf.mxu0 }
 0xa14   : > { %v7505_v1 = vpop.f32.mrf.mxu0 }
 0xa16   : > { %v7507_v2 = vpop.f32.mrf.mxu0 }
 0xa18   : > { %v7511_v58 = vpop.f32.mrf.mxu0 }
 0xa19   : > { %v6458_v8 = vpack.i.bf16 %v7511_v58, %v7505_v1 }
 0xa1a   : > { %v7515_v52 = vpop.f32.mrf.mxu0 }
 0xa1c   : > { %v7517_v9 = vpop.f32.mrf.mxu0 }
 0xa1e   : > { %v7519_v3 = vpop.f32.mrf.mxu0 }
 0xa20   : > { %v7523_v20 = vpop.f32.mrf.mxu0 }
 0xa21   : > { %v6478_v21 = vpack.i.bf16 %v7523_v20, %v7517_v9  ;;  %v8813_v20 = vpack.i.bf16 %v7519_v3, %v7515_v52 }
 0xa32   : > { %v6128_v22 = vpop.f32.mrf.mxu0 }
 0xa33   : > { %v2052_v29 = vadd.f32 %v6128_v22, %v7341_v59 }
 0xa34   : > { %v2043_v25 = vpop.f32.mrf.mxu0 }
 0xa35   : > { %v2044_v23 = vadd.f32 %v7341_v59, %v2043_v25  ;;  %v2080_v38 = vsel %vm935_vm2, %v2052_v29, -inf }
 0xa36   : > { %v6129_v26 = vpop.f32.mrf.mxu0 }
 0xa37   : > { %v2074_v30 = vsel %vm935_vm2, %v2044_v23, -inf  ;;  %v2055_v35 = vadd.f32 %v6129_v26, %v7341_v59 }
 0xa38   : > { %v2046_v31 = vpop.f32.mrf.mxu0  ;;  %2075 = vmax.xlane.f32.xlu0 %v2074_v30 }
 0xa39   : > { %v2047_v32 = vadd.f32 %v7341_v59, %v2046_v31  ;;  %v2083_v50 = vsel %vm935_vm2, %v2055_v35, -inf }
 0xa3a   : > { %v6132_v34 = vpop.f32.mrf.mxu0 }
 0xa3b   : > { %v2077_v40 = vsel %vm935_vm2, %v2047_v32, -inf  ;;  %v2068_v48 = vadd.f32 %v6132_v34, %v7341_v59 }
 0xa3c   : > { %2078 = vmax.xlane.f32.xlu1 %v2077_v40  ;;  %2081 = vmax.xlane.f32.xlu0 %v2080_v38  ;;  %v2059_v37 = vpop.f32.mrf.mxu0 }
 0xa3d   : > { %v2060_v61 = vadd.f32 %v7341_v59, %v2059_v37  ;;  %v2092_v45 = vsel %vm935_vm2, %v2068_v48, -inf }
 0xa3e   : > { %v6133_v47 = vpop.f32.mrf.mxu0 }
 0xa3f   : > { %v2071_v33 = vadd.f32 %v6133_v47, %v7341_v59  ;;  %v2086_v49 = vsel %vm935_vm2, %v2060_v61, -inf }
 0xa40   : > { %2084 = vmax.xlane.f32.xlu0 %v2083_v50  ;;  %v2062_v54 = vpop.f32.mrf.mxu0 }
 0xa41   : > { %v2063_v55 = vadd.f32 %v7341_v59, %v2062_v54  ;;  %v2095_v57 = vsel %vm935_vm2, %v2071_v33, -inf }
 0xa42   : > { %2096 = vmax.xlane.f32.xlu1 %v2095_v57 }
 0xa43   : > { %v2089_v56 = vsel %vm935_vm2, %v2063_v55, -inf }
 0xa44   : > { %2093 = vmax.xlane.f32.xlu0 %v2092_v45 }
 0xa46   : > { %2090 = vmax.xlane.f32.xlu1 %v2089_v56 }
 0xa48   : > { %2087 = vmax.xlane.f32.xlu0 %v2086_v49 }
 0xa57   : > { %2170 = vrot.lane.b32.xlu1 %v7304_v41, %s8773_s2 }
 0xa5b   : > { %2168 = vrot.lane.b32.xlu1 %v7312_v43, %s8773_s2 }
 0xa5e   : > { %2172 = vrot.lane.b32.xlu0 %v7300_v36, %s8773_s2 }
 0xa5f   : > { %2166 = vrot.lane.b32.xlu1 %v7316_v46, %s8773_s2  ;;  %s8787_s2 = smov 16  }
 0xac1   : > { %v2076_v59 = vpop.xlane.xlu0 %2075 }
 0xac2   : > { %v2098_v62 = vsub.f32 %v2044_v23, %v2076_v59 }
 0xac4   : > { %v2106_v30 = vmul.f32 1.442695, %v2098_v62 }
 0xac5   : > { %v2079_v63 = vpop.xlane.xlu1 %2078  ;;  %v2082_v0 = vpop.xlane.xlu0 %2081 }
 0xac6   : > { %v2100_v22 = vsub.f32 %v2052_v29, %v2082_v0  ;;  %v2099_v25 = vsub.f32 %v2047_v32, %v2079_v63 }
 0xac8   : > { %v2110_v26 = vmul.f32 1.442695, %v2100_v22  ;;  %v2108_v38 = vmul.f32 1.442695, %v2099_v25 }
 0xac9   : > { %v2085_v31 = vpop.xlane.xlu0 %2084 }
 0xaca   : > { %v2101_v34 = vsub.f32 %v2055_v35, %v2085_v31  ;;  %6685 = vpow2.f32 %v2110_v26 }
 0xacb   : > { %v2097_v40 = vpop.xlane.xlu1 %2096  ;;  %6687 = vpow2.f32 %v2106_v30 }
 0xacc   : > { %v2112_v37 = vmul.f32 1.442695, %v2101_v34  ;;  %v2105_v47 = vsub.f32 %v2071_v33, %v2097_v40 }
 0xacd   : > { %v2094_v50 = vpop.xlane.xlu0 %2093 }
 0xace   : > { %6689 = vpow2.f32 %v2112_v37  ;;  %v2104_v54 = vsub.f32 %v2068_v48, %v2094_v50  ;;  %v2120_v45 = vmul.f32 1.442695, %v2105_v47 }
 0xacf   : > { %v2091_v57 = vpop.xlane.xlu1 %2090  ;;  %6691 = vpow2.f32 %v2108_v38 }
 0xad0   : > { %v2118_v23 = vmul.f32 1.442695, %v2104_v54  ;;  %v2103_v56 = vsub.f32 %v2063_v55, %v2091_v57 }
 0xad1   : > { %v2088_v29 = vpop.xlane.xlu0 %2087 }
 0xad2   : > { %6693 = vpow2.f32 %v2118_v23  ;;  %v2102_v32 = vsub.f32 %v2060_v61, %v2088_v29  ;;  %v2116_v35 = vmul.f32 1.442695, %v2103_v56 }
 0xad3   : > { %v2171_v49 = vpop.permute.xlu1 %2170  ;;  %6695 = vpow2.f32 %v2120_v45 }
 0xad4   : > { %v2114_v59 = vmul.f32 1.442695, %v2102_v32 }
 0xad5   : > { %v2173_v62 = vpop.permute.xlu0 %2172 }
 0xad6   : > { %6697 = vpow2.f32 %v2114_v59  ;;  %6134 = vmatprep.subr.bf16.mxu1 %v2173_v62 }
 0xad7   : > { %6135 = vmatpush3.bf16.msra.mxu1 %v2173_v62  ;;  %v7551_v33 = vpop.eup %6685  ;;  %6699 = vpow2.f32 %v2116_v35  ;;  %v2169_v48 = vpop.permute.xlu1 %2168 }
 0xad8   : > { %6136 = vmatprep.subr.bf16.mxu1 %v2171_v49  ;;  %v2128_v63 = vsel %vm935_vm2, %v7551_v33, 0.0  ;;  %v6688_v55 = vpop.eup %6687 }
 0xad9   : > { %2129 = vadd.xlane.f32.xlu0 %v2128_v63  ;;  %v2122_v25 = vsel %vm935_vm2, %v6688_v55, 0.0 }
 0xadb   : > { %v6690_v0 = vpop.eup %6689  ;;  %6137 = vmatpush3.bf16.msra.mxu1 %v2171_v49  ;;  %v2167_v30 = vpop.permute.xlu1 %2166 }
 0xadc   : > { %6138 = vmatprep.subr.bf16.mxu1 %v2169_v48  ;;  %v2131_v61 = vsel %vm935_vm2, %v6690_v0, 0.0  ;;  %v6692_v22 = vpop.eup %6691 }
 0xadd   : > { %2132 = vadd.xlane.f32.xlu1 %v2131_v61  ;;  %2123 = vadd.xlane.f32.xlu0 %v2122_v25  ;;  %v2125_v31 = vsel %vm935_vm2, %v6692_v22, 0.0 }
 0xadf   : > { %v7557_v26 = vpop.eup %6693  ;;  %6139 = vmatpush3.bf16.msra.mxu1 %v2169_v48 }
 0xae0   : > { %6140 = vmatprep.subr.bf16.mxu1 %v2167_v30  ;;  %v2140_v34 = vsel %vm935_vm2, %v7557_v26, 0.0  ;;  %v6696_v40 = vpop.eup %6695 }
 0xae1   : > { %2126 = vadd.xlane.f32.xlu1 %v2125_v31  ;;  %2141 = vadd.xlane.f32.xlu0 %v2140_v34  ;;  %v2143_v47 = vsel %vm935_vm2, %v6696_v40, 0.0 }
 0xae3   : > { %v6698_v38 = vpop.eup %6697  ;;  %6141 = vmatpush3.bf16.msra.mxu1 %v2167_v30 }
 0xae4   : > { %v2134_v37 = vsel %vm935_vm2, %v6698_v38, 0.0  ;;  %v6700_v50 = vpop.eup %6699 }
 0xae5   : > { %2135 = vadd.xlane.f32.xlu1 %v2134_v37  ;;  %2144 = vadd.xlane.f32.xlu0 %v2143_v47  ;;  %v2137_v54 = vsel %vm935_vm2, %v6700_v50, 0.0 }
 0xae9   : > { %2138 = vadd.xlane.f32.xlu0 %v2137_v54 }
 0xaf6   : > { %2267 = vrot.lane.b32.xlu1 %v7304_v41, %s8771_s29 }
 0xafa   : > { %2265 = vrot.lane.b32.xlu1 %v7312_v43, %s8771_s29 }
 0xafe   : > { %2263 = vrot.lane.b32.xlu1 %v7316_v46, %s8771_s29 }
 0xaff   : > { %2269 = vrot.lane.b32.xlu0 %v7300_v36, %s8771_s29  ;;  %s8775_s29 = smov 8  }
 0xb02   : > { %2257 = vrot.lane.b32.xlu1 %v7294_v24, %s8769_s27 }
 0xb03   : > { %2255 = vrot.lane.b32.xlu0 %v7296_v27, %s8769_s27 }
 0xb06   : > { %2261 = vrot.lane.b32.xlu1 %v7302_v39, %s8769_s27 }
 0xb07   : > { %2259 = vrot.lane.b32.xlu0 %v7308_v42, %s8769_s27  ;;  %s8777_s27 = smov 40  }
 0xb62   : > { %v2130_v57 = vpop.xlane.xlu0 %2129 }
 0xb66   : > { %v2133_v23 = vpop.xlane.xlu1 %2132  ;;  %v2124_v45 = vpop.xlane.xlu0 %2123 }
 0xb67   : > { %6701 = vrcp.f32 %v2133_v23 }
 0xb68   : > { %6703 = vrcp.f32 %v2124_v45 }
 0xb69   : > { %6705 = vrcp.f32 %v2130_v57 }
 0xb6a   : > { %v2127_v56 = vpop.xlane.xlu1 %2126  ;;  %v2142_v29 = vpop.xlane.xlu0 %2141 }
 0xb6b   : > { %6707 = vrcp.f32 %v2127_v56 }
 0xb6e   : > { %v2136_v32 = vpop.xlane.xlu1 %2135  ;;  %v2145_v24 = vpop.xlane.xlu0 %2144 }
 0xb6f   : > { %6709 = vrcp.f32 %v2145_v24 }
 0xb70   : > { %6711 = vrcp.f32 %v2136_v32 }
 0xb71   : > { %6713 = vrcp.f32 %v2142_v29 }
 0xb72   : > { %v2139_v27 = vpop.xlane.xlu0 %2138  ;;  %v2268_v47 = vpop.permute.xlu1 %2267 }
 0xb73   : > { %6715 = vrcp.f32 %v2139_v27  ;;  %v2290_v29 = vsel %vm1408_vm5, %v2268_v47, 0 }
 0xb74   : > { %v6702_v39 = vpop.eup %6701 }
 0xb75   : > { %v6704_v49 = vpop.eup %6703  ;;  %v2157_v62 = vmul.f32 %v6702_v39, %v6690_v0 }
 0xb76   : > { %v6706_v59 = vpop.eup %6705  ;;  %v2270_v42 = vpop.permute.xlu0 %2269  ;;  %v2154_v48 = vmul.f32 %v6704_v49, %v6688_v55 }
 0xb77   : > { %6415 = vmatprep.subr.msk.bf16.mxu1 %vm1408_vm5, %v2270_v42  ;;  %v2156_v61 = vmul.f32 %v6706_v59, %v7551_v33  ;;  %v2293_v34 = vsel %vm1408_vm5, %v2270_v42, 0  ;;  %v2266_v32 = vpop.permute.xlu1 %2265 }
 0xb78   : > { %v6708_v35 = vpop.eup %6707 }
 0xb79   : > { %v2155_v63 = vmul.f32 %v6708_v35, %v6692_v22  ;;  %v2163_v30 = vpack.c.bf16 %v2157_v62, %v2156_v61 }
 0xb7a   : > { %v2256_v56 = vpop.permute.xlu0 %2255 }
 0xb7b   : > { %v2162_v25 = vpack.c.bf16 %v2155_v63, %v2154_v48 }
 0xb7c   : > { %v6710_v31 = vpop.eup %6709 }
 0xb7d   : > { %6142 = vmatprep.mubr.msk.bf16.mxu1 %vm935_vm2, %v2162_v25  ;;  %v6712_v37 = vpop.eup %6711  ;;  %v2161_v55 = vmul.f32 %v6710_v31, %v6696_v40  ;;  %v2287_v40 = vsel %vm1408_vm5, %v2266_v32, 0 }
 0xb7e   : > { %6143 = vmatmul.mubr.msk.bf16.vlgmr.msra.gmra.mxu1 %vm935_vm2, %v2163_v30  ;;  %v6714_v54 = vpop.eup %6713  ;;  %v2158_v22 = vmul.f32 %v6712_v37, %v6698_v38  ;;  %v2264_v38 = vpop.permute.xlu1 %2263 }
 0xb7f   : > { %6151 = vmatpush3.bf16.xpose.msra.mxu1 %v2293_v34  ;;  %v2160_v33 = vmul.f32 %v6714_v54, %v7557_v26  ;;  %v2284_v26 = vsel %vm1408_vm5, %v2264_v38, 0  ;;  %v2260_v24 = vpop.permute.xlu0 %2259 }
 0xb80   : > { %6416 = vmatprep.subr.msk.bf16.mxu1 %vm1408_vm5, %v2268_v47  ;;  %v6716_v0 = vpop.eup %6715  ;;  %v6973_v47 = vld [vmem:[%s7338_s7] ss:$0 sm:$0xff] }
 0xb81   : > { %v2159_v57 = vmul.f32 %v6716_v0, %v6700_v50  ;;  %v2165_v45 = vpack.c.bf16 %v2161_v55, %v2160_v33 }
 0xb82   : > { %v2258_v50 = vpop.permute.xlu1 %2257 }
 0xb83   : > { %v2164_v23 = vpack.c.bf16 %v2159_v57, %v2158_v22 }
 0xb85   : > { %6146 = vmatprep.mubr.msk.bf16.mxu1 %vm935_vm2, %v2164_v23 }
 0xb86   : > { %6147 = vmatmul.mubr.msk.bf16.gmra.mxu1 %vm935_vm2, %v2165_v45  ;;  %v2262_v27 = vpop.permute.xlu1 %2261 }
 0xb87   : > { %6153 = vmatpush3.bf16.xpose.msra.mxu1 %v2290_v29  ;;  %6158 = vmatprep.mubr.msk.bf16.mxu1 %vm1408_vm5, %v2256_v56 }
 0xb88   : > { %6417 = vmatprep.subr.msk.bf16.mxu1 %vm1408_vm5, %v2266_v32 }
 0xb8f   : > { %6155 = vmatpush3.bf16.xpose.msra.mxu1 %v2287_v40 }
 0xb90   : > { %6418 = vmatprep.subr.msk.bf16.mxu1 %vm1408_vm5, %v2264_v38 }
 0xb97   : > { %6157 = vmatpush3.bf16.xpose.msra.mxu1 %v2284_v26 }
 0xb9e   : > { %6159 = vmatmul.mubr.msk.bf16.vlgmr.msra.gmra.mxu1 %vm1408_vm5, %v2258_v50 }
 0xb9f   : > { %6162 = vmatprep.mubr.msk.bf16.mxu1 %vm1408_vm5, %v2260_v24 }
 0xba6   : > { %6163 = vmatmul.mubr.msk.bf16.gmra.mxu1 %vm1408_vm5, %v2262_v27 }
 0xc3e   : > { %v7599_v39 = vpop.f32.mrf.mxu1 }
 0xc40   : > { %v7601_v49 = vpop.f32.mrf.mxu1 }
 0xc42   : > { %v7603_v59 = vpop.f32.mrf.mxu1 }
 0xc43   : > { %v8812_v9 = vpack.i.bf16 %v7603_v59, %v7599_v39 }
 0xc44   : > { %v7607_v35 = vpop.f32.mrf.mxu1 }
 0xc45   : > { %v6468_v62 = vpack.i.bf16 %v7607_v35, %v7601_v49 }
 0xc46   : > { %v7611_v48 = vpop.f32.mrf.mxu1 }
 0xc48   : > { %v7613_v63 = vpop.f32.mrf.mxu1 }
 0xc4a   : > { %v7615_v61 = vpop.f32.mrf.mxu1 }
 0xc4c   : > { %v7619_v30 = vpop.f32.mrf.mxu1 }
 0xc5e   : > { %v6160_v34 = vpop.f32.mrf.mxu1 }
 0xc5f   : > { %v2338_v55 = vadd.f32 %v6973_v47, %v6160_v34 }
 0xc60   : > { %v2329_v37 = vpop.f32.mrf.mxu1 }
 0xc61   : > { %v2330_v54 = vadd.f32 %v6973_v47, %v2329_v37  ;;  %v2366_v29 = vsel %vm935_vm2, %v2338_v55, -inf }
 0xc62   : > { %v6161_v0 = vpop.f32.mrf.mxu1 }
 0xc63   : > { %v2360_v22 = vsel %vm935_vm2, %v2330_v54, -inf  ;;  %v2341_v45 = vadd.f32 %v6973_v47, %v6161_v0 }
 0xc64   : > { %v2332_v57 = vpop.f32.mrf.mxu1  ;;  %2361 = vmax.xlane.f32.xlu0 %v2360_v22 }
 0xc65   : > { %v2333_v33 = vadd.f32 %v6973_v47, %v2332_v57  ;;  %v2369_v26 = vsel %vm935_vm2, %v2341_v45, -inf }
 0xc66   : > { %v6164_v23 = vpop.f32.mrf.mxu1 }
 0xc67   : > { %v2363_v56 = vsel %vm935_vm2, %v2333_v33, -inf  ;;  %v2354_v27 = vadd.f32 %v6973_v47, %v6164_v23 }
 0xc68   : > { %2364 = vmax.xlane.f32.xlu1 %v2363_v56  ;;  %2367 = vmax.xlane.f32.xlu0 %v2366_v29  ;;  %v2345_v32 = vpop.f32.mrf.mxu1 }
 0xc69   : > { %v2346_v38 = vadd.f32 %v6973_v47, %v2345_v32  ;;  %v2378_v57 = vsel %vm935_vm2, %v2354_v27, -inf }
 0xc6a   : > { %v6165_v40 = vpop.f32.mrf.mxu1 }
 0xc6b   : > { %v2357_v34 = vadd.f32 %v6973_v47, %v6165_v40  ;;  %v2372_v0 = vsel %vm935_vm2, %v2346_v38, -inf }
 0xc6c   : > { %2370 = vmax.xlane.f32.xlu0 %v2369_v26  ;;  %v2348_v50 = vpop.f32.mrf.mxu1 }
 0xc6d   : > { %v7628_v24 = vadd.f32 %v6973_v47, %v2348_v50  ;;  %v2381_v22 = vsel %vm935_vm2, %v2357_v34, -inf }
 0xc6f   : > { %v2375_v37 = vsel %vm935_vm2, %v7628_v24, -inf }
 0xc70   : > { %2376 = vmax.xlane.f32.xlu1 %v2375_v37  ;;  %2373 = vmax.xlane.f32.xlu0 %v2372_v0 }
 0xc74   : > { %2382 = vmax.xlane.f32.xlu1 %v2381_v22  ;;  %2379 = vmax.xlane.f32.xlu0 %v2378_v57 }
 0xced   : > { %v2362_v56 = vpop.xlane.xlu0 %2361 }
 0xcee   : > { %v2384_v29 = vsub.f32 %v2330_v54, %v2362_v56 }
 0xcf0   : > { %v2392_v40 = vmul.f32 1.442695, %v2384_v29 }
 0xcf1   : > { %v2365_v32 = vpop.xlane.xlu1 %2364  ;;  %v2368_v26 = vpop.xlane.xlu0 %2367 }
 0xcf2   : > { %v2386_v50 = vsub.f32 %v2338_v55, %v2368_v26  ;;  %v2385_v23 = vsub.f32 %v2333_v33, %v2365_v32 }
 0xcf4   : > { %v2396_v47 = vmul.f32 1.442695, %v2386_v50  ;;  %v2394_v19 = vmul.f32 1.442695, %v2385_v23 }
 0xcf5   : > { %v2371_v31 = vpop.xlane.xlu0 %2370 }
 0xcf6   : > { %v2387_v25 = vsub.f32 %v2341_v45, %v2371_v31  ;;  %6717 = vpow2.f32 %v2396_v47 }
 0xcf7   : > { %6719 = vpow2.f32 %v2392_v40 }
 0xcf8   : > { %v2398_v37 = vmul.f32 1.442695, %v2387_v25 }
 0xcf9   : > { %v2374_v0 = vpop.xlane.xlu0 %2373  ;;  %v2377_v32 = vpop.xlane.xlu1 %2376 }
 0xcfa   : > { %6721 = vpow2.f32 %v2398_v37  ;;  %v2388_v42 = vsub.f32 %v2346_v38, %v2374_v0  ;;  %v2389_v23 = vsub.f32 %v7628_v24, %v2377_v32 }
 0xcfb   : > { %6723 = vpow2.f32 %v2394_v19 }
 0xcfc   : > { %v2400_v54 = vmul.f32 1.442695, %v2388_v42 }
 0xcfd   : > { %v2380_v22 = vpop.xlane.xlu0 %2379  ;;  %v2383_v26 = vpop.xlane.xlu1 %2382 }
 0xcfe   : > { %v2390_v57 = vsub.f32 %v2354_v27, %v2380_v22  ;;  %v2391_v50 = vsub.f32 %v2357_v34, %v2383_v26 }
 0xd00   : > { %v2404_v6 = vmul.f32 1.442695, %v2390_v57  ;;  %v2406_v47 = vmul.f32 1.442695, %v2391_v50 }
 0xd02   : > { %6725 = vpow2.f32 %v2404_v6 }
 0xd03   : > { %v7635_v56 = vpop.eup %6717  ;;  %6727 = vpow2.f32 %v2400_v54 }
 0xd04   : > { %v2414_v55 = vsel %vm935_vm2, %v7635_v56, 0.0  ;;  %v6720_v31 = vpop.eup %6719  ;;  %6729 = vpow2.f32 %v2406_v47  ;;  %v6588_v47 = vld [vmem:[%s8754_s13] sm:$0xff]  }
 0xd05   : > { %2415 = vadd.xlane.f32.xlu0 %v2414_v55  ;;  %v2408_v45 = vsel %vm935_vm2, %v6720_v31, 0.0 }
 0xd07   : > { %v7639_v33 = vpop.eup %6721 }
 0xd08   : > { %v2417_v25 = vsel %vm935_vm2, %v7639_v33, 0.0  ;;  %v6724_v19 = vpop.eup %6723 }
 0xd09   : > { %2418 = vadd.xlane.f32.xlu1 %v2417_v25  ;;  %2409 = vadd.xlane.f32.xlu0 %v2408_v45  ;;  %v2411_v6 = vsel %vm935_vm2, %v6724_v19, 0.0 }
 0xd0d   : > { %2412 = vadd.xlane.f32.xlu1 %v2411_v6 }
 0xd0f   : > { %v7645_v42 = vpop.eup %6725 }
 0xd10   : > { %v2426_v38 = vsel %vm935_vm2, %v7645_v42, 0.0  ;;  %v7649_v27 = vpop.eup %6727 }
 0xd11   : > { %2427 = vadd.xlane.f32.xlu0 %v2426_v38  ;;  %v2420_v29 = vsel %vm935_vm2, %v7649_v27, 0.0 }
 0xd15   : > { %2421 = vadd.xlane.f32.xlu0 %v2420_v29 }
 0xd1e   : > { %2456 = vrot.lane.b32.xlu1 %v7304_v41, %s8777_s27  ;;  %v2402_v41 = vmul.f32 1.442695, %v2389_v23 }
 0xd20   : > { %6731 = vpow2.f32 %v2402_v41 }
 0xd22   : > { %2454 = vrot.lane.b32.xlu1 %v7312_v43, %s8777_s27 }
 0xd2b   : > { %2458 = vrot.lane.b32.xlu0 %v7300_v36, %s8777_s27  ;;  %v6730_v36 = vpop.eup %6729 }
 0xd2c   : > { %v2429_v43 = vsel %vm935_vm2, %v6730_v36, 0.0 }
 0xd2d   : > { %v6732_v1 = vpop.eup %6731 }
 0xd2e   : > { %v2423_v58 = vsel %vm935_vm2, %v6732_v1, 0.0 }
 0xd2f   : > { %6459 = vrot.lane.b32.xlu0 %v6458_v8, %s8775_s29  ;;  %v8811_v8 = vpack.i.bf16 %v7507_v2, %v7503_v51 }
 0xd33   : > { %6469 = vrot.lane.b32.xlu0 %v6468_v62, %s8787_s2 }
 0xd37   : > { %6479 = vrot.lane.b32.xlu0 %v6478_v21, %s8775_s29 }
 0xd46   : > { %2430 = vadd.xlane.f32.xlu1 %v2429_v43 }
 0xd4a   : > { %2424 = vadd.xlane.f32.xlu1 %v2423_v58  ;;  %v8814_v58 = vpack.i.bf16 %v7615_v61, %v7611_v48 }
 0xd5b   : > { %2452 = vrot.lane.b32.xlu1 %v7316_v46, %s8777_s27  ;;  %s5804_s27 = sshll.u32 %s8835_s26, 8 }
 0xd5f   : > { %6464 = vrot.lane.b32.xlu1 %v8811_v8, %s8775_s29 }
 0xd63   : > { %6474 = vrot.lane.b32.xlu1 %v8812_v9, %s8787_s2  ;;  %v8815_v9 = vpack.i.bf16 %v7619_v30, %v7613_v63 }
 0xd67   : > { %6484 = vrot.lane.b32.xlu1 %v8813_v20, %s8775_s29  ;;  %s8102_s29 = scalar_lea.vmem %s8765_s24, %s5804_s27  ;;  %s8825_s27 = smov 8  }
 0xd8e   : > { %v2416_v21 = vpop.xlane.xlu0 %2415 }
 0xd92   : > { %v2419_v49 = vpop.xlane.xlu1 %2418  ;;  %v2410_v35 = vpop.xlane.xlu0 %2409 }
 0xd93   : > { %6733 = vrcp.f32 %v2410_v35 }
 0xd96   : > { %v2413_v46 = vpop.xlane.xlu1 %2412 }
 0xd97   : > { %6735 = vrcp.f32 %v2413_v46 }
 0xd98   : > { %6737 = vrcp.f32 %v2419_v49 }
 0xd99   : > { %6739 = vrcp.f32 %v2416_v21 }
 0xd9a   : > { %v2428_v62 = vpop.xlane.xlu0 %2427  ;;  %v2457_v2 = vpop.permute.xlu1 %2456 }
 0xd9e   : > { %v2422_v24 = vpop.xlane.xlu0 %2421  ;;  %v2455_v52 = vpop.permute.xlu1 %2454 }
 0xda0   : > { %v6734_v51 = vpop.eup %6733 }
 0xda1   : > { %v2440_v39 = vmul.f32 %v6734_v51, %v6720_v31 }
 0xda2   : > { %v2459_v34 = vpop.permute.xlu0 %2458 }
 0xda3   : > { %6166 = vmatprep.subr.bf16.mxu0 %v2459_v34 }
 0xda4   : > { %v6736_v40 = vpop.eup %6735  ;;  %6167 = vmatpush3.bf16.msra.mxu0 %v2459_v34 }
 0xda5   : > { %v2441_v59 = vmul.f32 %v6736_v40, %v6724_v19  ;;  %6168 = vmatprep.subr.bf16.mxu0 %v2457_v2  ;;  %v6738_v0 = vpop.eup %6737 }
 0xda6   : > { %v6740_v57 = vpop.eup %6739  ;;  %v2443_v54 = vmul.f32 %v6738_v0, %v7639_v33 }
 0xda7   : > { %v2448_v37 = vpack.c.bf16 %v2441_v59, %v2440_v39  ;;  %v2442_v31 = vmul.f32 %v6740_v57, %v7635_v56  ;;  %v6587_v56 = vld [vmem:[%s8754_s13 + $0x8] sm:$0xff]  }
 0xda8   : > { %6169 = vmatpush3.bf16.msra.mxu0 %v2457_v2 }
 0xda9   : > { %6174 = vmatprep.mubr.msk.bf16.mxu0 %vm935_vm2, %v2448_v37  ;;  %6170 = vmatprep.subr.bf16.mxu0 %v2455_v52  ;;  %v2449_v25 = vpack.c.bf16 %v2443_v54, %v2442_v31 }
 0xdac   : > { %6171 = vmatpush3.bf16.msra.mxu0 %v2455_v52 }
 0xdcf   : > { %v2431_v3 = vpop.xlane.xlu1 %2430 }
 0xdd0   : > { %6741 = vrcp.f32 %v2431_v3 }
 0xdd1   : > { %6743 = vrcp.f32 %v2422_v24  ;;  %v6460_v24 = vpop.permute.xlu0 %6459 }
 0xdd2   : > { %6745 = vrcp.f32 %v2428_v62  ;;  %v6462_v2 = vunpack.i.h.bf16 %v6460_v24  ;;  %v6461_v34 = vunpack.i.l.bf16 %v6460_v24 }
 0xdd3   : > { %v2425_v22 = vpop.xlane.xlu1 %2424 }
 0xdd4   : > { %6747 = vrcp.f32 %v2425_v22  ;;  %v2638_v57 = vsel %vm1408_vm5, %v7421_v14, %v6462_v2  ;;  %v2637_v54 = vsel %vm1408_vm5, %v7417_v4, %v6461_v34 }
 0xdd5   : > { %v6470_v48 = vpop.permute.xlu0 %6469 }
 0xdd6   : > { %v6472_v37 = vunpack.i.h.bf16 %v6470_v48  ;;  %v6471_v52 = vunpack.i.l.bf16 %v6470_v48 }
 0xdd7   : > { %v2453_v55 = vpop.permute.xlu1 %2452 }
 0xdd8   : > { %6172 = vmatprep.subr.bf16.mxu0 %v2453_v55  ;;  %v2647_v14 = vsel %vm2645_vm6, %v2638_v57, %v6472_v37 }
 0xdd9   : > { %6173 = vmatpush3.bf16.msra.mxu0 %v2453_v55  ;;  %v6480_v40 = vpop.permute.xlu0 %6479 }
 0xdda   : > { %6182 = vmatprep.subr.bf16.mxu0 %v6587_v56 }
 0xddb   : > { %v6465_v62 = vpop.permute.xlu1 %6464 }
 0xddc   : > { %6175 = vmatmul.mubr.msk.bf16.vlgmr.msra.gmra.mxu0 %vm935_vm2, %v2449_v25  ;;  %v6467_v39 = vunpack.i.h.bf16 %v6465_v62  ;;  %v6466_v63 = vunpack.i.l.bf16 %v6465_v62 }
 0xddd   : > { %v6742_v19 = vpop.eup %6741  ;;  %6183 = vmatpush3.bf16.msra.mxu0 %v6587_v56  ;;  %v6482_v56 = vunpack.i.h.bf16 %v6480_v40 }
 0xdde   : > { %v6744_v45 = vpop.eup %6743  ;;  %v2447_v29 = vmul.f32 %v6742_v19, %v6730_v36  ;;  %6184 = vmatprep.subr.bf16.mxu0 %v6588_v47  ;;  %v2640_v55 = vsel %vm1408_vm5, %v7419_v13, %v6467_v39  ;;  %v2639_v31 = vsel %vm1408_vm5, %v7415_v12, %v6466_v63  ;;  %v5655_v63 = vld [vmem:[%s8755_s14] ss:$0 sm:$0xff] }
 0xddf   : > { %v6746_v6 = vpop.eup %6745  ;;  %v2444_v32 = vmul.f32 %v6744_v45, %v7649_v27  ;;  %v6475_v51 = vpop.permute.xlu1 %6474 }
 0xde0   : > { %v2446_v50 = vmul.f32 %v6746_v6, %v7645_v42  ;;  %v6477_v30 = vunpack.i.h.bf16 %v6475_v51  ;;  %v6476_v59 = vunpack.i.l.bf16 %v6475_v51 }
 0xde1   : > { %v6748_v38 = vpop.eup %6747  ;;  %6185 = vmatpush3.bf16.msra.mxu0 %v6588_v47  ;;  %v6481_v47 = vunpack.i.l.bf16 %v6480_v40 }
 0xde2   : > { %v2445_v26 = vmul.f32 %v6748_v38, %v6732_v1  ;;  %v2451_v33 = vpack.c.bf16 %v2447_v29, %v2446_v50  ;;  %v2648_v19 = vsel %vm2645_vm6, %v2639_v31, %v6476_v59  ;;  %v2649_v45 = vsel %vm2645_vm6, %v2640_v55, %v6477_v30 }
 0xde3   : > { %v6485_v61 = vpop.permute.xlu1 %6484  ;;  %v2646_v29 = vsel %vm2645_vm6, %v2637_v54, %v6471_v52 }
 0xde4   : > { %v2450_v23 = vpack.c.bf16 %v2445_v26, %v2444_v32 }
 0xde6   : > { %6178 = vmatprep.mubr.msk.bf16.mxu0 %vm935_vm2, %v2450_v23 }
 0xde7   : > { %6179 = vmatmul.mubr.msk.bf16.gmra.mxu0 %vm935_vm2, %v2451_v33 }
 0xe9c   : > { %v6176_v27 = vpop.f32.mrf.mxu0 }
 0xe9e   : > { %v2510_v42 = vpop.f32.mrf.mxu0 }
 0xea0   : > { %v6177_v41 = vpop.f32.mrf.mxu0 }
 0xea1   : > { %v6488_v36 = vpack.i.bf16 %v6177_v41, %v6176_v27  ;;  %v6487_v27 = vunpack.i.h.bf16 %v6485_v61 }
 0xea2   : > { %v2513_v43 = vpop.f32.mrf.mxu0 }
 0xea3   : > { %v6493_v1 = vpack.i.bf16 %v2513_v43, %v2510_v42  ;;  %6489 = vrot.lane.b32.xlu1 %v6488_v36, %s8785_s4  ;;  %v6486_v42 = vunpack.i.l.bf16 %v6485_v61 }
 0xea5   : > { %6494 = vrot.lane.b32.xlu0 %v6493_v1, %s8785_s4 }
 0xea7   : > { %6504 = vrot.lane.b32.xlu1 %v8814_v58, %s8787_s2  ;;  %v6180_v8 = vpop.f32.mrf.mxu0 }
 0xea9   : > { %6499 = vrot.lane.b32.xlu0 %v8815_v9, %s8787_s2  ;;  %v2526_v20 = vpop.f32.mrf.mxu0  ;;  %s8821_s2 = smov 48  }
 0xeab   : > { %v6181_v21 = vpop.f32.mrf.mxu0 }
 0xeac   : > { %v6513_v49 = vpack.i.bf16 %v6181_v21, %v6180_v8  ;;  %v2641_v21 = vsel %vm1408_vm5, %v7425_v16, %v6481_v47 }
 0xead   : > { %v2529_v35 = vpop.f32.mrf.mxu0 }
 0xeae   : > { %v6508_v46 = vpack.i.bf16 %v2529_v35, %v2526_v20  ;;  %6514 = vrot.lane.b32.xlu1 %v6513_v49, %s8785_s4  ;;  %v2642_v20 = vsel %vm1408_vm5, %v7429_v18, %v6482_v56  ;;  %v2644_v49 = vsel %vm1408_vm5, %v7427_v17, %v6487_v27  ;;  %v2643_v35 = vsel %vm1408_vm5, %v7423_v15, %v6486_v42 }
 0xeb0   : > { %6509 = vrot.lane.b32.xlu0 %v6508_v46, %s8785_s4  ;;  %s8820_s4 = smov 112  }
 0xf15   : > { %v6490_v3 = vpop.permute.xlu1 %6489 }
 0xf16   : > { %v6492_v0 = vunpack.i.h.bf16 %v6490_v3  ;;  %v6491_v22 = vunpack.i.l.bf16 %v6490_v3 }
 0xf17   : > { %v6495_v25 = vpop.permute.xlu0 %6494 }
 0xf18   : > { %v6497_v6 = vunpack.i.h.bf16 %v6495_v25  ;;  %v6496_v38 = vunpack.i.l.bf16 %v6495_v25  ;;  %v2658_v32 = vsel %vm2654_vm7, %v2649_v45, %v6492_v0  ;;  %v2657_v4 = vsel %vm2654_vm7, %v2648_v19, %v6491_v22 }
 0xf19   : > { %v2664_v50 = vpack.c.bf16 %v2658_v32, %v2657_v4  ;;  %v6505_v23 = vpop.permute.xlu1 %6504 }
 0xf1a   : > { %v2655_v13 = vsel %vm2654_vm7, %v2646_v29, %v6496_v38  ;;  %v2656_v26 = vsel %vm2654_vm7, %v2647_v14, %v6497_v6  ;;  %v6507_v41 = vunpack.i.h.bf16 %v6505_v23  ;;  %v6506_v36 = vunpack.i.l.bf16 %v6505_v23 }
 0xf1b   : > { %v2663_v12 = vpack.c.bf16 %v2656_v26, %v2655_v13  ;;  %v6500_v33 = vpop.permute.xlu0 %6499 }
 0xf1c   : > { %v6502_v43 = vunpack.i.h.bf16 %v6500_v33  ;;  %v6501_v1 = vunpack.i.l.bf16 %v6500_v33  ;;  %v2653_v62 = vsel %vm2645_vm6, %v2644_v49, %v6507_v41  ;;  %v2652_v24 = vsel %vm2645_vm6, %v2643_v35, %v6506_v36 }
 0xf1d   : > { %6186 = vmatprep.mubr.msk.bf16.mxu0 %vm1039_vm3, %v2663_v12 }
 0xf1e   : > { %6187 = vmatmul.mubr.msk.bf16.vlgmr.msra.gmra.mxu0 %vm1039_vm3, %v2664_v50  ;;  %v2650_v61 = vsel %vm2645_vm6, %v2641_v21, %v6501_v1  ;;  %v2651_v18 = vsel %vm2645_vm6, %v2642_v20, %v6502_v43 }
 0xf20   : > { %v6515_v58 = vpop.permute.xlu1 %6514 }
 0xf21   : > { %v6517_v8 = vunpack.i.h.bf16 %v6515_v58  ;;  %v6516_v9 = vunpack.i.l.bf16 %v6515_v58 }
 0xf22   : > { %v6510_v46 = vpop.permute.xlu0 %6509 }
 0xf23   : > { %v6512_v51 = vunpack.i.h.bf16 %v6510_v46  ;;  %v6511_v48 = vunpack.i.l.bf16 %v6510_v46  ;;  %v2662_v2 = vsel %vm2654_vm7, %v2653_v62, %v6517_v8  ;;  %v2661_v16 = vsel %vm2654_vm7, %v2652_v24, %v6516_v9 }
 0xf24   : > { %v2666_v40 = vpack.c.bf16 %v2662_v2, %v2661_v16 }
 0xf25   : > { %v2659_v17 = vsel %vm2654_vm7, %v2650_v61, %v6511_v48  ;;  %v2660_v34 = vsel %vm2654_vm7, %v2651_v18, %v6512_v51 }
 0xf26   : > { %v2665_v15 = vpack.c.bf16 %v2660_v34, %v2659_v17 }
 0xf28   : > { %6190 = vmatprep.mubr.msk.bf16.mxu0 %vm1039_vm3, %v2665_v15 }
 0xf29   : > { %6191 = vmatmul.mubr.msk.bf16.gmra.mxu0 %vm1039_vm3, %v2666_v40 }
 0xfde   : > { %v6188_v39 = vpop.f32.mrf.mxu0 }
 0xfdf   : > { %v2745_v59 = vadd.f32 %v6188_v39, %v5655_v63 }
 0xfe0   : > { %v2736_v30 = vpop.f32.mrf.mxu0 }
 0xfe1   : > { %v2737_v37 = vadd.f32 %v5655_v63, %v2736_v30  ;;  %v2769_v22 = vadd.f32 %v2745_v59, %v7269_v44 }
 0xfe2   : > { %v6189_v52 = vpop.f32.mrf.mxu0 }
 0xfe3   : > { %v2767_v3 = vadd.f32 %v2737_v37, %v7258_v28  ;;  %v2748_v57 = vadd.f32 %v6189_v52, %v5655_v63  ;;  %v2783_v6 = vsel %vm1039_vm3, %v2769_v22, 0.0 }
 0xfe4   : > { %v2739_v0 = vpop.f32.mrf.mxu0 }
 0xfe5   : > { %v2740_v54 = vadd.f32 %v5655_v63, %v2739_v0  ;;  %v2777_v55 = vsel %vm1039_vm3, %v2767_v3, 0.0  ;;  %v2770_v25 = vadd.f32 %v2748_v57, %v7266_v60  ;;  %v6589_v57 = vld [vmem:[%s8758_s17 + $0x8] sm:$0xff]  }
 0xfe6   : > { %2778 = vadd.xlane.f32.xlu0 %v2777_v55  ;;  %6194 = vmatprep.subr.bf16.mxu1 %v6589_v57 }
 0xfe7   : > { %v2768_v31 = vadd.f32 %v2740_v54, %v7260_v53  ;;  %v2786_v14 = vsel %vm1039_vm3, %v2770_v25, 0.0  ;;  %6195 = vmatpush3.bf16.msra.mxu1 %v6589_v57  ;;  %v6590_v54 = vld [vmem:[%s8758_s17] sm:$0xff]  }
 0xfe8   : > { %6196 = vmatprep.subr.bf16.mxu1 %v6590_v54 }
 0xfe9   : > { %v6192_v19 = vpop.f32.mrf.mxu0  ;;  %v2780_v45 = vsel %vm1039_vm3, %v2768_v31, 0.0 }
 0xfea   : > { %2781 = vadd.xlane.f32.xlu1 %v2780_v45  ;;  %2784 = vadd.xlane.f32.xlu0 %v2783_v6  ;;  %v2761_v29 = vadd.f32 %v6192_v19, %v5655_v63 }
 0xfeb   : > { %v2752_v28 = vpop.f32.mrf.mxu0  ;;  %6197 = vmatpush3.bf16.msra.mxu1 %v6590_v54  ;;  %v6592_v54 = vld [vmem:[%s8760_s19 + $0x10] sm:$0xff]  }
 0xfec   : > { %v2753_v38 = vadd.f32 %v5655_v63, %v2752_v28  ;;  %v2773_v26 = vadd.f32 %v2761_v29, %v7286_v11 }
 0xfed   : > { %v6193_v44 = vpop.f32.mrf.mxu0 }
 0xfee   : > { %v2771_v32 = vadd.f32 %v2753_v38, %v7278_v7  ;;  %2787 = vadd.xlane.f32.xlu0 %v2786_v14  ;;  %v2764_v53 = vadd.f32 %v6193_v44, %v5655_v63  ;;  %v2795_v33 = vsel %vm1039_vm3, %v2773_v26, 0.0 }
 0xfef   : > { %v2755_v4 = vpop.f32.mrf.mxu0 }
 0xff0   : > { %v2756_v13 = vadd.f32 %v5655_v63, %v2755_v4  ;;  %v2789_v60 = vsel %vm1039_vm3, %v2771_v32, 0.0  ;;  %v2774_v50 = vadd.f32 %v2764_v53, %v7283_v10 }
 0xff2   : > { %v2772_v12 = vadd.f32 %v2756_v13, %v7274_v5  ;;  %2790 = vadd.xlane.f32.xlu0 %v2789_v60  ;;  %v2798_v7 = vsel %vm1039_vm3, %v2774_v50, 0.0 }
 0xff4   : > { %v2792_v23 = vsel %vm1039_vm3, %v2772_v12, 0.0 }
 0xff5   : > { %2793 = vadd.xlane.f32.xlu1 %v2792_v23 }
 0xff6   : > { %2796 = vadd.xlane.f32.xlu0 %v2795_v33 }
 0xff9   : > { %2799 = vadd.xlane.f32.xlu1 %v2798_v7 }
0x106f   : > { %v2779_v56 = vpop.xlane.xlu0 %2778 }
0x1070   : > { %v2801_v47 = vmul.f32 0.03125, %v2779_v56 }
0x1072   : > { %v7769_v27 = vsub.f32 %v2767_v3, %v2801_v47 }
0x1073   : > { %v2782_v42 = vpop.xlane.xlu1 %2781  ;;  %v2785_v11 = vpop.xlane.xlu0 %2784 }
0x1074   : > { %v2802_v41 = vmul.f32 0.03125, %v2782_v42  ;;  %v2803_v5 = vmul.f32 0.03125, %v2785_v11  ;;  %v2817_v10 = vmul.f32 %v7769_v27, %v7769_v27  ;;  %v5662_v42 = vld [vmem:[%s8756_s15] ss:$0 sm:$0xff] }
0x1076   : > { %v7773_v36 = vsub.f32 %v2768_v31, %v2802_v41  ;;  %v7775_v43 = vsub.f32 %v2769_v22, %v2803_v5  ;;  %v2825_v1 = vsel %vm1039_vm3, %v2817_v10, 0.0 }
0x1077   : > { %2826 = vadd.xlane.f32.xlu0 %v2825_v1  ;;  %v2788_v58 = vpop.xlane.xlu0 %2787 }
0x1078   : > { %v2804_v8 = vmul.f32 0.03125, %v2788_v58  ;;  %v2818_v9 = vmul.f32 %v7773_v36, %v7773_v36  ;;  %v2819_v20 = vmul.f32 %v7775_v43, %v7775_v43 }
0x107a   : > { %v7782_v21 = vsub.f32 %v2770_v25, %v2804_v8  ;;  %v2828_v49 = vsel %vm1039_vm3, %v2818_v9, 0.0  ;;  %v2831_v35 = vsel %vm1039_vm3, %v2819_v20, 0.0 }
0x107b   : > { %2829 = vadd.xlane.f32.xlu1 %v2828_v49  ;;  %2832 = vadd.xlane.f32.xlu0 %v2831_v35  ;;  %v2791_v46 = vpop.xlane.xlu0 %2790 }
0x107c   : > { %v2805_v62 = vmul.f32 0.03125, %v2791_v46  ;;  %v2820_v24 = vmul.f32 %v7782_v21, %v7782_v21 }
0x107e   : > { %v7788_v51 = vsub.f32 %v2771_v32, %v2805_v62  ;;  %v2794_v48 = vpop.xlane.xlu1 %2793  ;;  %v2834_v61 = vsel %vm1039_vm3, %v2820_v24, 0.0 }
0x107f   : > { %v2806_v18 = vmul.f32 0.03125, %v2794_v48  ;;  %2835 = vadd.xlane.f32.xlu1 %v2834_v61  ;;  %v2797_v2 = vpop.xlane.xlu0 %2796 }
0x1080   : > { %v2807_v16 = vmul.f32 0.03125, %v2797_v2  ;;  %v2821_v17 = vmul.f32 %v7788_v51, %v7788_v51 }
0x1081   : > { %v7793_v34 = vsub.f32 %v2772_v12, %v2806_v18 }
0x1082   : > { %v7795_v15 = vsub.f32 %v2773_v26, %v2807_v16  ;;  %v2800_v40 = vpop.xlane.xlu1 %2799  ;;  %v2837_v39 = vsel %vm1039_vm3, %v2821_v17, 0.0 }
0x1083   : > { %v2808_v63 = vmul.f32 0.03125, %v2800_v40  ;;  %2838 = vadd.xlane.f32.xlu0 %v2837_v39  ;;  %v2822_v30 = vmul.f32 %v7793_v34, %v7793_v34 }
0x1084   : > { %v2823_v59 = vmul.f32 %v7795_v15, %v7795_v15 }
0x1085   : > { %v7802_v37 = vsub.f32 %v2774_v50, %v2808_v63  ;;  %v2840_v52 = vsel %vm1039_vm3, %v2822_v30, 0.0 }
0x1086   : > { %2841 = vadd.xlane.f32.xlu1 %v2840_v52  ;;  %v2843_v3 = vsel %vm1039_vm3, %v2823_v59, 0.0 }
0x1087   : > { %2844 = vadd.xlane.f32.xlu0 %v2843_v3  ;;  %v2824_v0 = vmul.f32 %v7802_v37, %v7802_v37 }
0x1089   : > { %v2846_v22 = vsel %vm1039_vm3, %v2824_v0, 0.0 }
0x108a   : > { %2847 = vadd.xlane.f32.xlu1 %v2846_v22 }
0x1100   : > { %v2827_v55 = vpop.xlane.xlu0 %2826 }
0x1101   : > { %v2849_v31 = vmul.f32 0.03125, %v2827_v55  ;;  %v6593_v55 = vld [vmem:[%s8760_s19 + $0x8] sm:$0xff]  }
0x1103   : > { %v2857_v25 = vadd.f32 1e-12, %v2849_v31  ;;  %v6594_v31 = vld [vmem:[%s8760_s19] sm:$0xff]  }
0x1104   : > { %v2830_v19 = vpop.xlane.xlu1 %2829  ;;  %v2833_v45 = vpop.xlane.xlu0 %2832 }
0x1105   : > { %6749 = vrsqrt.f32 %v2857_v25  ;;  %v2850_v6 = vmul.f32 0.03125, %v2830_v19  ;;  %v2851_v28 = vmul.f32 0.03125, %v2833_v45  ;;  %v5664_v25 = vld [vmem:[%s8759_s18] ss:$0 sm:$0xff] }
0x1107   : > { %v2858_v38 = vadd.f32 1e-12, %v2850_v6  ;;  %v2859_v29 = vadd.f32 1e-12, %v2851_v28 }
0x1108   : > { %v2836_v44 = vpop.xlane.xlu1 %2835 }
0x1109   : > { %6751 = vrsqrt.f32 %v2858_v38  ;;  %v2852_v14 = vmul.f32 0.03125, %v2836_v44 }
0x110a   : > { %6753 = vrsqrt.f32 %v2859_v29 }
0x110b   : > { %v2860_v32 = vadd.f32 1e-12, %v2852_v14 }
0x110c   : > { %v2839_v4 = vpop.xlane.xlu0 %2838 }
0x110d   : > { %6755 = vrsqrt.f32 %v2860_v32  ;;  %v2853_v53 = vmul.f32 0.03125, %v2839_v4 }
0x110f   : > { %v2861_v13 = vadd.f32 1e-12, %v2853_v53  ;;  %v2842_v60 = vpop.xlane.xlu1 %2841 }
0x1110   : > { %v2854_v26 = vmul.f32 0.03125, %v2842_v60  ;;  %v2845_v12 = vpop.xlane.xlu0 %2844 }
0x1111   : > { %6757 = vrsqrt.f32 %v2861_v13  ;;  %v2855_v50 = vmul.f32 0.03125, %v2845_v12 }
0x1112   : > { %v6750_v23 = vpop.eup %6749  ;;  %v2862_v33 = vadd.f32 1e-12, %v2854_v26 }
0x1113   : > { %v2863_v7 = vadd.f32 1e-12, %v2855_v50  ;;  %v2848_v56 = vpop.xlane.xlu1 %2847  ;;  %v2873_v47 = vmul.f32 %v6750_v23, %v7769_v27  ;;  %v5663_v27 = vld [vmem:[%s8757_s16] ss:$0 sm:$0xff] }
0x1114   : > { %6759 = vrsqrt.f32 %v2862_v33  ;;  %v2856_v11 = vmul.f32 0.03125, %v2848_v56 }
0x1115   : > { %6761 = vrsqrt.f32 %v2863_v7  ;;  %v2887_v58 = vmul.f32 %v5662_v42, %v2873_v47 }
0x1116   : > { %v6752_v41 = vpop.eup %6751  ;;  %v2864_v5 = vadd.f32 1e-12, %v2856_v11 }
0x1117   : > { %v6754_v10 = vpop.eup %6753  ;;  %v2874_v1 = vmul.f32 %v6752_v41, %v7773_v36  ;;  %v7825_v46 = vadd.f32 %v5663_v27, %v2887_v58 }
0x1118   : > { %v2875_v8 = vmul.f32 %v6754_v10, %v7775_v43  ;;  %6763 = vrsqrt.f32 %v2864_v5 }
0x1119   : > { %v2888_v9 = vmul.f32 %v5662_v42, %v2874_v1 }
0x111a   : > { %v6756_v20 = vpop.eup %6755  ;;  %v2889_v49 = vmul.f32 %v5662_v42, %v2875_v8 }
0x111b   : > { %v2876_v35 = vmul.f32 %v6756_v20, %v7782_v21  ;;  %v7827_v62 = vadd.f32 %v5663_v27, %v2888_v9 }
0x111c   : > { %v7832_v43 = vadd.f32 %v5663_v27, %v2889_v49 }
0x111d   : > { %v2890_v24 = vmul.f32 %v5662_v42, %v2876_v35  ;;  %v2909_v36 = vpack.c.bf16 %v7827_v62, %v7825_v46 }
0x111e   : > { %v6758_v48 = vpop.eup %6757 }
0x111f   : > { %6198 = vmatprep.mubr.msk.bf16.mxu1 %vm1039_vm3, %v2909_v36  ;;  %v7834_v61 = vadd.f32 %v5663_v27, %v2890_v24  ;;  %v2877_v18 = vmul.f32 %v6758_v48, %v7788_v51 }
0x1121   : > { %v6760_v2 = vpop.eup %6759  ;;  %v2910_v21 = vpack.c.bf16 %v7834_v61, %v7832_v43  ;;  %v2891_v40 = vmul.f32 %v5662_v42, %v2877_v18 }
0x1122   : > { %v6762_v16 = vpop.eup %6761  ;;  %v2878_v17 = vmul.f32 %v6760_v2, %v7793_v34 }
0x1123   : > { %6199 = vmatmul.mubr.msk.bf16.vlgmr.msra.gmra.mxu1 %vm1039_vm3, %v2910_v21  ;;  %v2879_v39 = vmul.f32 %v6762_v16, %v7795_v15  ;;  %v7842_v59 = vadd.f32 %v5663_v27, %v2891_v40 }
0x1124   : > { %v2892_v63 = vmul.f32 %v5662_v42, %v2878_v17 }
0x1125   : > { %v6764_v30 = vpop.eup %6763  ;;  %v2893_v3 = vmul.f32 %v5662_v42, %v2879_v39 }
0x1126   : > { %v7844_v52 = vadd.f32 %v5663_v27, %v2892_v63  ;;  %v2880_v51 = vmul.f32 %v6764_v30, %v7802_v37  ;;  %v6591_v37 = vld [vmem:[%s8760_s19 + $0x18] sm:$0xff]  }
0x1127   : > { %v7850_v34 = vadd.f32 %v5663_v27, %v2893_v3  ;;  %6206 = vmatprep.subr.bf16.mxu0 %v6591_v37 }
0x1128   : > { %v2911_v0 = vpack.c.bf16 %v7844_v52, %v7842_v59  ;;  %v2894_v22 = vmul.f32 %v5662_v42, %v2880_v51  ;;  %6207 = vmatpush3.bf16.msra.mxu0 %v6591_v37 }
0x1129   : > { %6208 = vmatprep.subr.bf16.mxu0 %v6592_v54 }
0x112a   : > { %6202 = vmatprep.mubr.msk.bf16.mxu1 %vm1039_vm3, %v2911_v0  ;;  %v7852_v57 = vadd.f32 %v5663_v27, %v2894_v22 }
0x112c   : > { %v2912_v15 = vpack.c.bf16 %v7852_v57, %v7850_v34  ;;  %6209 = vmatpush3.bf16.msra.mxu0 %v6592_v54 }
0x112d   : > { %6210 = vmatprep.subr.bf16.mxu0 %v6593_v55 }
0x112e   : > { %6203 = vmatmul.mubr.msk.bf16.gmra.mxu1 %vm1039_vm3, %v2912_v15 }
0x1130   : > { %6211 = vmatpush3.bf16.msra.mxu0 %v6593_v55 }
0x1131   : > { %6212 = vmatprep.subr.bf16.mxu0 %v6594_v31 }
0x1134   : > { %6213 = vmatpush3.bf16.msra.mxu0 %v6594_v31 }
0x11e3   : > { %v6200_v19 = vpop.f32.mrf.mxu1 }
0x11e4   : > { %v7872_v45 = vadd.f32 %v6200_v19, %v5664_v25 }
0x11e5   : > { %v2982_v6 = vpop.f32.mrf.mxu1 }
0x11e6   : > { %v3023_v28 = vmul.f32 0.044715, %v7872_v45  ;;  %v7875_v38 = vadd.f32 %v5664_v25, %v2982_v6 }
0x11e7   : > { %v6201_v29 = vpop.f32.mrf.mxu1 }
0x11e8   : > { %v3031_v44 = vmul.f32 %v3023_v28, %v7872_v45  ;;  %v3021_v14 = vmul.f32 0.044715, %v7875_v38  ;;  %v2994_v32 = vadd.f32 %v6201_v29, %v5664_v25 }
0x11e9   : > { %v2985_v4 = vpop.f32.mrf.mxu1 }
0x11ea   : > { %v3039_v53 = vmul.f32 %v3031_v44, %v7872_v45  ;;  %v3029_v13 = vmul.f32 %v3021_v14, %v7875_v38  ;;  %v3024_v60 = vmul.f32 0.044715, %v2994_v32  ;;  %v2986_v26 = vadd.f32 %v5664_v25, %v2985_v4 }
0x11ec   : > { %v3047_v12 = vadd.f32 %v3039_v53, %v7872_v45  ;;  %v3037_v50 = vmul.f32 %v3029_v13, %v7875_v38  ;;  %v3032_v23 = vmul.f32 %v3024_v60, %v2994_v32  ;;  %v3022_v33 = vmul.f32 0.044715, %v2986_v26 }
0x11ed   : > { %v3016_v53 = vmul.f32 0.5, %v2994_v32  ;;  %v3013_v13 = vmul.f32 0.5, %v7875_v38  ;;  %v3014_v60 = vmul.f32 0.5, %v2986_v26 }
0x11ee   : > { %v3055_v7 = vmul.f32 0.7978846, %v3047_v12  ;;  %v3045_v56 = vadd.f32 %v3037_v50, %v7875_v38  ;;  %v3040_v47 = vmul.f32 %v3032_v23, %v2994_v32  ;;  %v6204_v42 = vpop.f32.mrf.mxu1  ;;  %v3030_v11 = vmul.f32 %v3022_v33, %v2986_v26 }
0x11ef   : > { %v7884_v41 = vadd.f32 %v6204_v42, %v5664_v25  ;;  %v3015_v50 = vmul.f32 0.5, %v7872_v45 }
0x11f0   : > { %v3053_v5 = vmul.f32 0.7978846, %v3045_v56  ;;  %v3048_v10 = vadd.f32 %v3040_v47, %v2994_v32  ;;  %v2998_v1 = vpop.f32.mrf.mxu1  ;;  %6765 = vtanh.f32 %v3055_v7  ;;  %v3038_v58 = vmul.f32 %v3030_v11, %v2986_v26 }
0x11f1   : > { %v3027_v8 = vmul.f32 0.044715, %v7884_v41  ;;  %v2999_v27 = vadd.f32 %v5664_v25, %v2998_v1 }
0x11f2   : > { %6767 = vtanh.f32 %v3053_v5  ;;  %v3056_v9 = vmul.f32 0.7978846, %v3048_v10  ;;  %v6205_v20 = vpop.f32.mrf.mxu1  ;;  %v3046_v49 = vadd.f32 %v3038_v58, %v2986_v26 }
0x11f3   : > { %v3035_v35 = vmul.f32 %v3027_v8, %v7884_v41  ;;  %v3025_v24 = vmul.f32 0.044715, %v2999_v27  ;;  %v3010_v36 = vadd.f32 %v6205_v20, %v5664_v25  ;;  %v3017_v8 = vmul.f32 0.5, %v2999_v27 }
0x11f4   : > { %6769 = vtanh.f32 %v3056_v9  ;;  %v3001_v48 = vpop.f32.mrf.mxu1  ;;  %v3054_v18 = vmul.f32 0.7978846, %v3046_v49  ;;  %v3019_v20 = vmul.f32 0.5, %v7884_v41 }
0x11f5   : > { %v3043_v2 = vmul.f32 %v3035_v35, %v7884_v41  ;;  %v3033_v21 = vmul.f32 %v3025_v24, %v2999_v27  ;;  %v3028_v16 = vmul.f32 0.044715, %v3010_v36  ;;  %v3002_v17 = vadd.f32 %v5664_v25, %v3001_v48 }
0x11f6   : > { %6771 = vtanh.f32 %v3054_v18  ;;  %v3020_v26 = vmul.f32 0.5, %v3010_v36 }
0x11f7   : > { %v3051_v40 = vadd.f32 %v3043_v2, %v7884_v41  ;;  %v3041_v39 = vmul.f32 %v3033_v21, %v2999_v27  ;;  %v3036_v63 = vmul.f32 %v3028_v16, %v3010_v36  ;;  %v3026_v30 = vmul.f32 0.044715, %v3002_v17 }
0x11f8   : > { %v3018_v45 = vmul.f32 0.5, %v3002_v17 }
0x11f9   : > { %v3059_v51 = vmul.f32 0.7978846, %v3051_v40  ;;  %v3049_v3 = vadd.f32 %v3041_v39, %v2999_v27  ;;  %v3044_v0 = vmul.f32 %v3036_v63, %v3010_v36  ;;  %v3034_v22 = vmul.f32 %v3026_v30, %v3002_v17 }
0x11fb   : > { %v3057_v15 = vmul.f32 0.7978846, %v3049_v3  ;;  %v3052_v37 = vadd.f32 %v3044_v0, %v3010_v36  ;;  %v3042_v54 = vmul.f32 %v3034_v22, %v3002_v17  ;;  %6773 = vtanh.f32 %v3059_v51  ;;  %v5671_v36 = vld [vmem:[%s8761_s20] ss:$0 sm:$0xff] }
0x11fd   : > { %v3060_v55 = vmul.f32 0.7978846, %v3052_v37  ;;  %v6766_v31 = vpop.eup %6765  ;;  %6775 = vtanh.f32 %v3057_v15  ;;  %v3050_v19 = vadd.f32 %v3042_v54, %v3002_v17 }
0x11fe   : > { %v3071_v4 = vadd.f32 1.0, %v6766_v31 }
0x11ff   : > { %v6768_v6 = vpop.eup %6767  ;;  %6777 = vtanh.f32 %v3060_v55  ;;  %v3058_v25 = vmul.f32 0.7978846, %v3050_v19 }
0x1200   : > { %v3069_v44 = vadd.f32 1.0, %v6768_v6  ;;  %v3079_v56 = vmul.f32 %v3071_v4, %v3015_v50 }
0x1201   : > { %v6770_v28 = vpop.eup %6769  ;;  %6779 = vtanh.f32 %v3058_v25 }
0x1202   : > { %v3072_v29 = vadd.f32 1.0, %v6770_v28  ;;  %v3077_v33 = vmul.f32 %v3069_v44, %v3013_v13 }
0x1203   : > { %v6772_v14 = vpop.eup %6771 }
0x1204   : > { %v3070_v12 = vadd.f32 1.0, %v6772_v14  ;;  %v3080_v23 = vmul.f32 %v3072_v29, %v3016_v53 }
0x1206   : > { %v3078_v7 = vmul.f32 %v3070_v12, %v3014_v60  ;;  %v3086_v11 = vpack.c.bf16 %v3080_v23, %v3079_v56 }
0x1208   : > { %v3085_v47 = vpack.c.bf16 %v3078_v7, %v3077_v33  ;;  %v6774_v42 = vpop.eup %6773 }
0x1209   : > { %v3075_v58 = vadd.f32 1.0, %v6774_v42 }
0x120a   : > { %v6776_v5 = vpop.eup %6775  ;;  %6214 = vmatprep.mubr.msk.bf16.mxu0 %vm935_vm2, %v3085_v47 }
0x120b   : > { %6215 = vmatmul.mubr.msk.bf16.vlgmr.msra.gmra.mxu0 %vm935_vm2, %v3086_v11  ;;  %v3073_v1 = vadd.f32 1.0, %v6776_v5  ;;  %v3083_v48 = vmul.f32 %v3075_v58, %v3019_v20 }
0x120c   : > { %v6778_v10 = vpop.eup %6777 }
0x120d   : > { %v3076_v32 = vadd.f32 1.0, %v6778_v10  ;;  %v3081_v35 = vmul.f32 %v3073_v1, %v3017_v8 }
0x120e   : > { %v6780_v38 = vpop.eup %6779 }
0x120f   : > { %v3074_v9 = vadd.f32 1.0, %v6780_v38  ;;  %v3084_v49 = vmul.f32 %v3076_v32, %v3020_v26 }
0x1211   : > { %v3082_v24 = vmul.f32 %v3074_v9, %v3018_v45  ;;  %v3088_v2 = vpack.c.bf16 %v3084_v49, %v3083_v48 }
0x1213   : > { %v3087_v18 = vpack.c.bf16 %v3082_v24, %v3081_v35 }
0x1215   : > { %6218 = vmatprep.mubr.msk.bf16.mxu0 %vm935_vm2, %v3087_v18 }
0x1216   : > { %6219 = vmatmul.mubr.msk.bf16.gmra.mxu0 %vm935_vm2, %v3088_v2 }
0x12cb   : > { %v6216_v21 = vpop.f32.mrf.mxu0 }
0x12cc   : > { %v3183_v16 = vadd.f32 %v6216_v21, %v5671_v36 }
0x12cd   : > { %v3174_v27 = vpop.f32.mrf.mxu0 }
0x12ce   : > { %v3175_v17 = vadd.f32 %v5671_v36, %v3174_v27  ;;  %v3207_v63 = vadd.f32 %v3183_v16, %v7832_v43 }
0x12cf   : > { %v6217_v40 = vpop.f32.mrf.mxu0 }
0x12d0   : > { %v3205_v41 = vadd.f32 %v3175_v17, %v7825_v46  ;;  %v3186_v30 = vadd.f32 %v6217_v40, %v5671_v36  ;;  %v3221_v54 = vsel %vm1039_vm3, %v3207_v63, 0.0 }
0x12d1   : > { %v3177_v39 = vpop.f32.mrf.mxu0 }
0x12d2   : > { %v3178_v51 = vadd.f32 %v5671_v36, %v3177_v39  ;;  %v3215_v3 = vsel %vm1039_vm3, %v3205_v41, 0.0  ;;  %v3208_v22 = vadd.f32 %v3186_v30, %v7834_v61  ;;  %v6595_v30 = vld [vmem:[%s8752_s11 + $0x18] sm:$0xff]  }
0x12d3   : > { %3216 = vadd.xlane.f32.xlu0 %v3215_v3  ;;  %6222 = vmatprep.subr.bf16.mxu1 %v6595_v30 }
0x12d4   : > { %v3206_v0 = vadd.f32 %v3178_v51, %v7827_v62  ;;  %v3224_v19 = vsel %vm1039_vm3, %v3208_v22, 0.0  ;;  %6223 = vmatpush3.bf16.msra.mxu1 %v6595_v30  ;;  %v6596_v51 = vld [vmem:[%s8752_s11 + $0x10] sm:$0xff]  }
0x12d5   : > { %6224 = vmatprep.subr.bf16.mxu1 %v6596_v51 }
0x12d6   : > { %v6220_v15 = vpop.f32.mrf.mxu0  ;;  %v3218_v37 = vsel %vm1039_vm3, %v3206_v0, 0.0 }
0x12d7   : > { %3219 = vadd.xlane.f32.xlu1 %v3218_v37  ;;  %3222 = vadd.xlane.f32.xlu0 %v3221_v54  ;;  %v3199_v55 = vadd.f32 %v6220_v15, %v5671_v36 }
0x12d8   : > { %v3190_v46 = vpop.f32.mrf.mxu0  ;;  %6225 = vmatpush3.bf16.msra.mxu1 %v6596_v51 }
0x12d9   : > { %v3191_v31 = vadd.f32 %v5671_v36, %v3190_v46  ;;  %v3211_v62 = vadd.f32 %v3199_v55, %v7850_v34 }
0x12da   : > { %v6221_v43 = vpop.f32.mrf.mxu0 }
0x12db   : > { %v3209_v6 = vadd.f32 %v3191_v31, %v7842_v59  ;;  %3225 = vadd.xlane.f32.xlu1 %v3224_v19  ;;  %v3202_v61 = vadd.f32 %v6221_v43, %v5671_v36  ;;  %v3233_v53 = vsel %vm1039_vm3, %v3211_v62, 0.0 }
0x12dc   : > { %v3193_v25 = vpop.f32.mrf.mxu0 }
0x12dd   : > { %v3194_v28 = vadd.f32 %v5671_v36, %v3193_v25  ;;  %v3227_v29 = vsel %vm1039_vm3, %v3209_v6, 0.0  ;;  %v3212_v14 = vadd.f32 %v3202_v61, %v7852_v57 }
0x12de   : > { %3228 = vadd.xlane.f32.xlu0 %v3227_v29 }
0x12df   : > { %v3210_v44 = vadd.f32 %v3194_v28, %v7844_v52  ;;  %v3236_v59 = vsel %vm1039_vm3, %v3212_v14, 0.0 }
0x12e1   : > { %v3230_v4 = vsel %vm1039_vm3, %v3210_v44, 0.0 }
0x12e2   : > { %3231 = vadd.xlane.f32.xlu1 %v3230_v4  ;;  %3234 = vadd.xlane.f32.xlu0 %v3233_v53 }
0x12e6   : > { %3237 = vadd.xlane.f32.xlu1 %v3236_v59 }
0x135c   : > { %v3217_v13 = vpop.xlane.xlu0 %3216 }
0x135d   : > { %v3239_v34 = vmul.f32 0.03125, %v3217_v13 }
0x135f   : > { %v7916_v60 = vsub.f32 %v3205_v41, %v3239_v34 }
0x1360   : > { %v3220_v12 = vpop.xlane.xlu1 %3219  ;;  %v3223_v50 = vpop.xlane.xlu0 %3222 }
0x1361   : > { %v3240_v23 = vmul.f32 0.03125, %v3220_v12  ;;  %v3241_v33 = vmul.f32 0.03125, %v3223_v50  ;;  %v3255_v52 = vmul.f32 %v7916_v60, %v7916_v60  ;;  %v5680_v12 = vld [vmem:[%s8762_s21] ss:$0 sm:$0xff] }
0x1363   : > { %v7920_v57 = vsub.f32 %v3206_v0, %v3240_v23  ;;  %v7922_v7 = vsub.f32 %v3207_v63, %v3241_v33  ;;  %v3263_v56 = vsel %vm1039_vm3, %v3255_v52, 0.0 }
0x1364   : > { %v3226_v47 = vpop.xlane.xlu1 %3225  ;;  %3264 = vadd.xlane.f32.xlu0 %v3263_v56 }
0x1365   : > { %v3242_v42 = vmul.f32 0.03125, %v3226_v47  ;;  %v3256_v11 = vmul.f32 %v7920_v57, %v7920_v57  ;;  %v3257_v5 = vmul.f32 %v7922_v7, %v7922_v7 }
0x1367   : > { %v7929_v10 = vsub.f32 %v3208_v22, %v3242_v42  ;;  %v3229_v32 = vpop.xlane.xlu0 %3228  ;;  %v3266_v1 = vsel %vm1039_vm3, %v3256_v11, 0.0  ;;  %v3269_v38 = vsel %vm1039_vm3, %v3257_v5, 0.0 }
0x1368   : > { %v3243_v26 = vmul.f32 0.03125, %v3229_v32  ;;  %3267 = vadd.xlane.f32.xlu1 %v3266_v1  ;;  %3270 = vadd.xlane.f32.xlu0 %v3269_v38 }
0x1369   : > { %v3258_v58 = vmul.f32 %v7929_v10, %v7929_v10 }
0x136a   : > { %v7935_v8 = vsub.f32 %v3209_v6, %v3243_v26 }
0x136b   : > { %v3232_v45 = vpop.xlane.xlu1 %3231  ;;  %v3235_v9 = vpop.xlane.xlu0 %3234  ;;  %v3272_v20 = vsel %vm1039_vm3, %v3258_v58, 0.0 }
0x136c   : > { %v3244_v49 = vmul.f32 0.03125, %v3232_v45  ;;  %v3245_v35 = vmul.f32 0.03125, %v3235_v9  ;;  %3273 = vadd.xlane.f32.xlu1 %v3272_v20  ;;  %v3259_v24 = vmul.f32 %v7935_v8, %v7935_v8 }
0x136e   : > { %v7940_v48 = vsub.f32 %v3210_v44, %v3244_v49  ;;  %v7942_v18 = vsub.f32 %v3211_v62, %v3245_v35  ;;  %v3275_v2 = vsel %vm1039_vm3, %v3259_v24, 0.0 }
0x136f   : > { %v3238_v21 = vpop.xlane.xlu1 %3237  ;;  %3276 = vadd.xlane.f32.xlu0 %v3275_v2 }
0x1370   : > { %v3246_v36 = vmul.f32 0.03125, %v3238_v21  ;;  %v3260_v27 = vmul.f32 %v7940_v48, %v7940_v48  ;;  %v3261_v16 = vmul.f32 %v7942_v18, %v7942_v18 }
0x1372   : > { %v7949_v17 = vsub.f32 %v3212_v14, %v3246_v36  ;;  %v3278_v40 = vsel %vm1039_vm3, %v3260_v27, 0.0  ;;  %v3281_v41 = vsel %vm1039_vm3, %v3261_v16, 0.0 }
0x1373   : > { %3279 = vadd.xlane.f32.xlu1 %v3278_v40  ;;  %3282 = vadd.xlane.f32.xlu0 %v3281_v41 }
0x1374   : > { %v3262_v39 = vmul.f32 %v7949_v17, %v7949_v17 }
0x1376   : > { %v3284_v63 = vsel %vm1039_vm3, %v3262_v39, 0.0 }
0x1377   : > { %3285 = vadd.xlane.f32.xlu1 %v3284_v63 }
0x13ed   : > { %v3265_v3 = vpop.xlane.xlu0 %3264 }
0x13ee   : > { %v3287_v0 = vmul.f32 0.03125, %v3265_v3 }
0x13f0   : > { %v3295_v22 = vadd.f32 1e-12, %v3287_v0 }
0x13f1   : > { %v3268_v15 = vpop.xlane.xlu1 %3267  ;;  %v3271_v37 = vpop.xlane.xlu0 %3270 }
0x13f2   : > { %6781 = vrsqrt.f32 %v3295_v22  ;;  %v3288_v54 = vmul.f32 0.03125, %v3268_v15  ;;  %v3289_v46 = vmul.f32 0.03125, %v3271_v37 }
0x13f4   : > { %v3296_v55 = vadd.f32 1e-12, %v3288_v54  ;;  %v3297_v31 = vadd.f32 1e-12, %v3289_v46 }
0x13f5   : > { %v3274_v43 = vpop.xlane.xlu1 %3273 }
0x13f6   : > { %6783 = vrsqrt.f32 %v3296_v55  ;;  %v3290_v19 = vmul.f32 0.03125, %v3274_v43 }
0x13f7   : > { %6785 = vrsqrt.f32 %v3297_v31 }
0x13f8   : > { %v3298_v6 = vadd.f32 1e-12, %v3290_v19  ;;  %v3277_v25 = vpop.xlane.xlu0 %3276 }
0x13f9   : > { %v3291_v62 = vmul.f32 0.03125, %v3277_v25 }
0x13fa   : > { %6787 = vrsqrt.f32 %v3298_v6 }
0x13fb   : > { %v3299_v61 = vadd.f32 1e-12, %v3291_v62 }
0x13fc   : > { %v3280_v28 = vpop.xlane.xlu1 %3279  ;;  %v3283_v29 = vpop.xlane.xlu0 %3282 }
0x13fd   : > { %6789 = vrsqrt.f32 %v3299_v61  ;;  %v3292_v44 = vmul.f32 0.03125, %v3280_v28  ;;  %v3293_v14 = vmul.f32 0.03125, %v3283_v29 }
0x13ff   : > { %v6782_v4 = vpop.eup %6781  ;;  %v3300_v53 = vadd.f32 1e-12, %v3292_v44  ;;  %v3301_v59 = vadd.f32 1e-12, %v3293_v14 }
0x1400   : > { %v3286_v13 = vpop.xlane.xlu1 %3285  ;;  %v3311_v34 = vmul.f32 %v6782_v4, %v7916_v60  ;;  %v5681_v60 = vld [vmem:[%s8763_s22] ss:$0 sm:$0xff] }
0x1401   : > { %6791 = vrsqrt.f32 %v3300_v53  ;;  %v3294_v50 = vmul.f32 0.03125, %v3286_v13 }
0x1402   : > { %6793 = vrsqrt.f32 %v3301_v59  ;;  %v3325_v47 = vmul.f32 %v5680_v12, %v3311_v34 }
0x1403   : > { %v6784_v23 = vpop.eup %6783  ;;  %v3302_v33 = vadd.f32 1e-12, %v3294_v50 }
0x1404   : > { %v6786_v52 = vpop.eup %6785  ;;  %v3312_v56 = vmul.f32 %v6784_v23, %v7920_v57  ;;  %v7972_v38 = vadd.f32 %v5681_v60, %v3325_v47 }
0x1405   : > { %v3313_v42 = vmul.f32 %v6786_v52, %v7922_v7  ;;  %6795 = vrsqrt.f32 %v3302_v33 }
0x1406   : > { %v3326_v11 = vmul.f32 %v5680_v12, %v3312_v56 }
0x1407   : > { %v6788_v5 = vpop.eup %6787  ;;  %v3327_v32 = vmul.f32 %v5680_v12, %v3313_v42 }
0x1408   : > { %v3314_v1 = vmul.f32 %v6788_v5, %v7929_v10  ;;  %v7974_v26 = vadd.f32 %v5681_v60, %v3326_v11 }
0x1409   : > { %v7980_v9 = vadd.f32 %v5681_v60, %v3327_v32 }
0x140a   : > { %v6790_v58 = vpop.eup %6789  ;;  %v3328_v45 = vmul.f32 %v5680_v12, %v3314_v1  ;;  %v3347_v57 = vpack.c.bf16 %v7974_v26, %v7972_v38 }
0x140b   : > { %v3315_v7 = vmul.f32 %v6790_v58, %v7935_v8 }
0x140c   : > { %6226 = vmatprep.mubr.msk.bf16.mxu1 %vm1039_vm3, %v3347_v57  ;;  %v7982_v20 = vadd.f32 %v5681_v60, %v3328_v45 }
0x140d   : > { %v3329_v2 = vmul.f32 %v5680_v12, %v3315_v7 }
0x140e   : > { %v6792_v49 = vpop.eup %6791  ;;  %v3348_v10 = vpack.c.bf16 %v7982_v20, %v7980_v9 }
0x140f   : > { %v6794_v35 = vpop.eup %6793  ;;  %v3316_v24 = vmul.f32 %v6792_v49, %v7940_v48  ;;  %v7989_v27 = vadd.f32 %v5681_v60, %v3329_v2  ;;  %v8048_v49 = vld [vmem:[%s7338_s7] ss:$0 sm:$0xff] }
0x1410   : > { %6227 = vmatmul.mubr.msk.bf16.vlgmr.msra.gmra.mxu1 %vm1039_vm3, %v3348_v10  ;;  %v3317_v21 = vmul.f32 %v6794_v35, %v7942_v18 }
0x1411   : > { %v3330_v36 = vmul.f32 %v5680_v12, %v3316_v24 }
0x1412   : > { %v6796_v8 = vpop.eup %6795  ;;  %v3331_v41 = vmul.f32 %v5680_v12, %v3317_v21 }
0x1413   : > { %v7991_v16 = vadd.f32 %v5681_v60, %v3330_v36  ;;  %v3318_v40 = vmul.f32 %v6796_v8, %v7949_v17  ;;  %v5687_v17 = vld [vmem:[%s8753_s12 + $0x1] ss:$0 sm:$0xff] }
0x1414   : > { %v7997_v48 = vadd.f32 %v5681_v60, %v3331_v41 }
0x1415   : > { %v3349_v39 = vpack.c.bf16 %v7991_v16, %v7989_v27  ;;  %v3332_v63 = vmul.f32 %v5680_v12, %v3318_v40 }
0x1417   : > { %6230 = vmatprep.mubr.msk.bf16.mxu1 %vm1039_vm3, %v3349_v39  ;;  %v7999_v30 = vadd.f32 %v5681_v60, %v3332_v63 }
0x1419   : > { %v3350_v18 = vpack.c.bf16 %v7999_v30, %v7997_v48 }
0x141b   : > { %6231 = vmatmul.mubr.msk.bf16.gmra.mxu1 %vm1039_vm3, %v3350_v18 }
0x14d0   : > { %v6228_v51 = vpop.f32.mrf.mxu1 }
0x14d1   : > { %v3431_v0 = vadd.f32 %v6228_v51, %v5687_v17 }
0x14d2   : > { %v3422_v3 = vpop.f32.mrf.mxu1 }
0x14d3   : > { %v3423_v15 = vadd.f32 %v5687_v17, %v3422_v3  ;;  %v3455_v46 = vmul.f32 0.35355338, %v3431_v0 }
0x14d4   : > { %v6229_v22 = vpop.f32.mrf.mxu1 }
0x14d5   : > { %v3434_v37 = vadd.f32 %v6229_v22, %v5687_v17  ;;  %v3453_v43 = vmul.f32 0.35355338, %v3423_v15 }
0x14d6   : > { %v3425_v54 = vpop.f32.mrf.mxu1 }
0x14d7   : > { %v3456_v55 = vmul.f32 0.35355338, %v3434_v37  ;;  %v3426_v31 = vadd.f32 %v5687_v17, %v3425_v54  ;;  %v8025_v56 = vpack.c.bf16 %v3434_v37, %v3431_v0 }
0x14d9   : > { %v8007_v19 = vpack.c.bf16 %v3456_v55, %v3455_v46  ;;  %v3454_v6 = vmul.f32 0.35355338, %v3426_v31  ;;  %v8029_v47 = vpack.c.bf16 %v3426_v31, %v3423_v15 }
0x14db   : > { %v8009_v25 = vpack.c.bf16 %v3454_v6, %v3453_v43  ;;  %v6232_v62 = vpop.f32.mrf.mxu1 }
0x14dc   : > { %v3447_v28 = vadd.f32 %v6232_v62, %v5687_v17 }
0x14dd   : > { %v3438_v61 = vpop.f32.mrf.mxu1  ;;  %6242 = vmatprep.mubr.msk.bf16.mxu0 %vm1408_vm5, %v8009_v25 }
0x14de   : > { %v3439_v44 = vadd.f32 %v5687_v17, %v3438_v61  ;;  %v3459_v53 = vmul.f32 0.35355338, %v3447_v28 }
0x14df   : > { %v6233_v29 = vpop.f32.mrf.mxu1 }
0x14e0   : > { %v3450_v14 = vadd.f32 %v6233_v29, %v5687_v17  ;;  %v3457_v12 = vmul.f32 0.35355338, %v3439_v44 }
0x14e1   : > { %v3441_v4 = vpop.f32.mrf.mxu1 }
0x14e2   : > { %v3460_v59 = vmul.f32 0.35355338, %v3450_v14  ;;  %v8013_v13 = vpack.c.bf16 %v3450_v14, %v3447_v28  ;;  %v3442_v34 = vadd.f32 %v5687_v17, %v3441_v4 }
0x14e4   : > { %v8015_v50 = vpack.c.bf16 %v3460_v59, %v3459_v53  ;;  %v3458_v23 = vmul.f32 0.35355338, %v3442_v34  ;;  %v8017_v33 = vpack.c.bf16 %v3442_v34, %v3439_v44  ;;  %3479 = vrot.lane.b32.xlu0 %v8013_v13, %s6984_s28 }
0x14e6   : > { %v8021_v52 = vpack.c.bf16 %v3458_v23, %v3457_v12  ;;  %3477 = vrot.lane.b32.xlu1 %v8017_v33, %s6984_s28 }
0x14ea   : > { %3475 = vrot.lane.b32.xlu1 %v8025_v56, %s6984_s28 }
0x14ee   : > { %3473 = vrot.lane.b32.xlu1 %v8029_v47, %s6984_s28  ;;  %s8816_s28 = smov 88  }
0x1556   : > { %v3480_v42 = vpop.permute.xlu0 %3479 }
0x1557   : > { %6419 = vmatprep.subr.msk.bf16.mxu0 %vm1408_vm5, %v3480_v42  ;;  %v3503_v60 = vsel %vm1408_vm5, %v3480_v42, 0 }
0x1558   : > { %6235 = vmatpush3.bf16.xpose.msra.mxu0 %v3503_v60  ;;  %v3478_v11 = vpop.permute.xlu1 %3477 }
0x1559   : > { %6420 = vmatprep.subr.msk.bf16.mxu0 %vm1408_vm5, %v3478_v11  ;;  %v3500_v5 = vsel %vm1408_vm5, %v3478_v11, 0 }
0x155c   : > { %v3476_v32 = vpop.permute.xlu1 %3475 }
0x155d   : > { %v3497_v1 = vsel %vm1408_vm5, %v3476_v32, 0 }
0x1560   : > { %6237 = vmatpush3.bf16.xpose.msra.mxu0 %v3500_v5  ;;  %v3474_v58 = vpop.permute.xlu1 %3473 }
0x1561   : > { %6421 = vmatprep.subr.msk.bf16.mxu0 %vm1408_vm5, %v3476_v32  ;;  %v3494_v45 = vsel %vm1408_vm5, %v3474_v58, 0 }
0x1568   : > { %6239 = vmatpush3.bf16.xpose.msra.mxu0 %v3497_v1 }
0x1569   : > { %6422 = vmatprep.subr.msk.bf16.mxu0 %vm1408_vm5, %v3474_v58 }
0x1570   : > { %6241 = vmatpush3.bf16.xpose.msra.mxu0 %v3494_v45 }
0x1577   : > { %6243 = vmatmul.mubr.msk.bf16.vlgmr.msra.gmra.mxu0 %vm1408_vm5, %v8007_v19 }
0x1578   : > { %6246 = vmatprep.mubr.msk.bf16.mxu0 %vm1408_vm5, %v8021_v52 }
0x157f   : > { %6247 = vmatmul.mubr.msk.bf16.gmra.mxu0 %vm1408_vm5, %v8015_v50 }
0x1637   : > { %v6244_v57 = vpop.f32.mrf.mxu0 }
0x1638   : > { %v3548_v24 = vadd.f32 %v8048_v49, %v6244_v57 }
0x1639   : > { %v3539_v7 = vpop.f32.mrf.mxu0 }
0x163a   : > { %v3540_v10 = vadd.f32 %v8048_v49, %v3539_v7  ;;  %v3576_v39 = vsel %vm935_vm2, %v3548_v24, -inf }
0x163b   : > { %v6245_v35 = vpop.f32.mrf.mxu0 }
0x163c   : > { %v3570_v2 = vsel %vm935_vm2, %v3540_v10, -inf  ;;  %v3551_v40 = vadd.f32 %v8048_v49, %v6245_v35 }
0x163d   : > { %v3542_v21 = vpop.f32.mrf.mxu0  ;;  %3571 = vmax.xlane.f32.xlu0 %v3570_v2 }
0x163e   : > { %v3543_v36 = vadd.f32 %v8048_v49, %v3542_v21  ;;  %v3579_v3 = vsel %vm935_vm2, %v3551_v40, -inf }
0x163f   : > { %v6248_v8 = vpop.f32.mrf.mxu0 }
0x1640   : > { %v3573_v41 = vsel %vm935_vm2, %v3543_v36, -inf  ;;  %v3564_v51 = vadd.f32 %v8048_v49, %v6248_v8 }
0x1641   : > { %3574 = vmax.xlane.f32.xlu1 %v3573_v41  ;;  %3577 = vmax.xlane.f32.xlu0 %v3576_v39  ;;  %v3555_v63 = vpop.f32.mrf.mxu0 }
0x1642   : > { %v3556_v37 = vadd.f32 %v8048_v49, %v3555_v63  ;;  %v3588_v54 = vsel %vm935_vm2, %v3564_v51, -inf }
0x1643   : > { %v6249_v18 = vpop.f32.mrf.mxu0 }
0x1644   : > { %v3567_v17 = vadd.f32 %v8048_v49, %v6249_v18  ;;  %v3582_v55 = vsel %vm935_vm2, %v3556_v37, -inf }
0x1645   : > { %3580 = vmax.xlane.f32.xlu0 %v3579_v3  ;;  %v3558_v0 = vpop.f32.mrf.mxu0 }
0x1646   : > { %v3559_v22 = vadd.f32 %v8048_v49, %v3558_v0  ;;  %v3591_v15 = vsel %vm935_vm2, %v3567_v17, -inf }
0x1647   : > { %3592 = vmax.xlane.f32.xlu1 %v3591_v15 }
0x1648   : > { %v3585_v46 = vsel %vm935_vm2, %v3559_v22, -inf }
0x1649   : > { %3589 = vmax.xlane.f32.xlu0 %v3588_v54 }
0x164b   : > { %3586 = vmax.xlane.f32.xlu1 %v3585_v46 }
0x164d   : > { %3583 = vmax.xlane.f32.xlu0 %v3582_v55 }
0x165c   : > { %3674 = vrot.lane.b32.xlu1 %v8017_v33, %s6985_s3 }
0x1660   : > { %3672 = vrot.lane.b32.xlu1 %v8025_v56, %s6985_s3 }
0x1663   : > { %3676 = vrot.lane.b32.xlu0 %v8013_v13, %s6985_s3 }
0x1664   : > { %3670 = vrot.lane.b32.xlu1 %v8029_v47, %s6985_s3  ;;  %s8817_s3 = smov 120  }
0x16c6   : > { %v3572_v31 = vpop.xlane.xlu0 %3571 }
0x16c7   : > { %v3594_v43 = vsub.f32 %v3540_v10, %v3572_v31 }
0x16c9   : > { %v3602_v44 = vmul.f32 1.442695, %v3594_v43 }
0x16ca   : > { %v3575_v6 = vpop.xlane.xlu1 %3574  ;;  %v3578_v62 = vpop.xlane.xlu0 %3577 }
0x16cb   : > { %v3596_v61 = vsub.f32 %v3548_v24, %v3578_v62  ;;  %v3595_v28 = vsub.f32 %v3543_v36, %v3575_v6 }
0x16cd   : > { %v3606_v29 = vmul.f32 1.442695, %v3596_v61  ;;  %v3604_v59 = vmul.f32 1.442695, %v3595_v28 }
0x16ce   : > { %v3581_v14 = vpop.xlane.xlu0 %3580 }
0x16cf   : > { %v3597_v4 = vsub.f32 %v3551_v40, %v3581_v14  ;;  %6797 = vpow2.f32 %v3606_v29 }
0x16d0   : > { %v3593_v53 = vpop.xlane.xlu1 %3592  ;;  %6799 = vpow2.f32 %v3602_v44 }
0x16d1   : > { %v3608_v34 = vmul.f32 1.442695, %v3597_v4  ;;  %v3601_v12 = vsub.f32 %v3567_v17, %v3593_v53 }
0x16d2   : > { %v3590_v23 = vpop.xlane.xlu0 %3589 }
0x16d3   : > { %6801 = vpow2.f32 %v3608_v34  ;;  %v3600_v42 = vsub.f32 %v3564_v51, %v3590_v23  ;;  %v3616_v5 = vmul.f32 1.442695, %v3601_v12 }
0x16d4   : > { %v3587_v60 = vpop.xlane.xlu1 %3586  ;;  %6803 = vpow2.f32 %v3604_v59 }
0x16d5   : > { %v3614_v11 = vmul.f32 1.442695, %v3600_v42  ;;  %v3599_v32 = vsub.f32 %v3559_v22, %v3587_v60 }
0x16d6   : > { %v3584_v1 = vpop.xlane.xlu0 %3583 }
0x16d7   : > { %6805 = vpow2.f32 %v3614_v11  ;;  %v3598_v58 = vsub.f32 %v3556_v37, %v3584_v1  ;;  %v3612_v7 = vmul.f32 1.442695, %v3599_v32 }
0x16d8   : > { %v3675_v45 = vpop.permute.xlu1 %3674  ;;  %6807 = vpow2.f32 %v3616_v5 }
0x16d9   : > { %v3610_v57 = vmul.f32 1.442695, %v3598_v58 }
0x16da   : > { %v3677_v10 = vpop.permute.xlu0 %3676 }
0x16db   : > { %6809 = vpow2.f32 %v3610_v57  ;;  %6250 = vmatprep.subr.bf16.mxu1 %v3677_v10 }
0x16dc   : > { %6251 = vmatpush3.bf16.msra.mxu1 %v3677_v10  ;;  %v6798_v35 = vpop.eup %6797  ;;  %6811 = vpow2.f32 %v3612_v7  ;;  %v3673_v24 = vpop.permute.xlu1 %3672 }
0x16dd   : > { %6252 = vmatprep.subr.bf16.mxu1 %v3675_v45  ;;  %v3624_v2 = vsel %vm935_vm2, %v6798_v35, 0.0  ;;  %v6800_v21 = vpop.eup %6799 }
0x16de   : > { %3625 = vadd.xlane.f32.xlu0 %v3624_v2  ;;  %v3618_v41 = vsel %vm935_vm2, %v6800_v21, 0.0 }
0x16e0   : > { %v6802_v36 = vpop.eup %6801  ;;  %6253 = vmatpush3.bf16.msra.mxu1 %v3675_v45  ;;  %v3671_v63 = vpop.permute.xlu1 %3670 }
0x16e1   : > { %6254 = vmatprep.subr.bf16.mxu1 %v3673_v24  ;;  %v3627_v8 = vsel %vm935_vm2, %v6802_v36, 0.0  ;;  %v6804_v40 = vpop.eup %6803 }
0x16e2   : > { %3628 = vadd.xlane.f32.xlu1 %v3627_v8  ;;  %3619 = vadd.xlane.f32.xlu0 %v3618_v41  ;;  %v3621_v18 = vsel %vm935_vm2, %v6804_v40, 0.0 }
0x16e4   : > { %v6806_v39 = vpop.eup %6805  ;;  %6255 = vmatpush3.bf16.msra.mxu1 %v3673_v24 }
0x16e5   : > { %6256 = vmatprep.subr.bf16.mxu1 %v3671_v63  ;;  %v3636_v51 = vsel %vm935_vm2, %v6806_v39, 0.0  ;;  %v6808_v17 = vpop.eup %6807 }
0x16e6   : > { %3622 = vadd.xlane.f32.xlu1 %v3621_v18  ;;  %3637 = vadd.xlane.f32.xlu0 %v3636_v51  ;;  %v3639_v22 = vsel %vm935_vm2, %v6808_v17, 0.0 }
0x16e8   : > { %v6810_v3 = vpop.eup %6809  ;;  %6257 = vmatpush3.bf16.msra.mxu1 %v3671_v63 }
0x16e9   : > { %v3630_v0 = vsel %vm935_vm2, %v6810_v3, 0.0  ;;  %v6812_v15 = vpop.eup %6811 }
0x16ea   : > { %3631 = vadd.xlane.f32.xlu1 %v3630_v0  ;;  %3640 = vadd.xlane.f32.xlu0 %v3639_v22  ;;  %v3633_v37 = vsel %vm935_vm2, %v6812_v15, 0.0 }
0x16ee   : > { %3634 = vadd.xlane.f32.xlu0 %v3633_v37 }
0x16fb   : > { %3775 = vrot.lane.b32.xlu1 %v8017_v33, %s8816_s28 }
0x16ff   : > { %3773 = vrot.lane.b32.xlu1 %v8025_v56, %s8816_s28 }
0x1703   : > { %3771 = vrot.lane.b32.xlu1 %v8029_v47, %s8816_s28 }
0x1704   : > { %3777 = vrot.lane.b32.xlu0 %v8013_v13, %s8816_s28  ;;  %s8822_s28 = smov 72  }
0x1707   : > { %3765 = vrot.lane.b32.xlu1 %v8007_v19, %s8817_s3 }
0x1708   : > { %3763 = vrot.lane.b32.xlu0 %v8009_v25, %s8817_s3 }
0x170b   : > { %3769 = vrot.lane.b32.xlu1 %v8015_v50, %s8817_s3 }
0x170c   : > { %3767 = vrot.lane.b32.xlu0 %v8021_v52, %s8817_s3  ;;  %s8823_s3 = smov 104  }
0x1767   : > { %v3626_v54 = vpop.xlane.xlu0 %3625 }
0x1768   : > { %6813 = vrcp.f32 %v3626_v54 }
0x176b   : > { %v3629_v46 = vpop.xlane.xlu1 %3628  ;;  %v3620_v55 = vpop.xlane.xlu0 %3619 }
0x176c   : > { %6815 = vrcp.f32 %v3629_v46 }
0x176d   : > { %6817 = vrcp.f32 %v3620_v55 }
0x176f   : > { %v3623_v31 = vpop.xlane.xlu1 %3622  ;;  %v3638_v43 = vpop.xlane.xlu0 %3637 }
0x1770   : > { %6819 = vrcp.f32 %v3623_v31 }
0x1771   : > { %6821 = vrcp.f32 %v3638_v43 }
0x1773   : > { %v3632_v6 = vpop.xlane.xlu1 %3631  ;;  %v3641_v62 = vpop.xlane.xlu0 %3640 }
0x1774   : > { %6823 = vrcp.f32 %v3632_v6 }
0x1775   : > { %6825 = vrcp.f32 %v3641_v62  ;;  %v6814_v61 = vpop.eup %6813 }
0x1776   : > { %v3652_v28 = vmul.f32 %v6814_v61, %v6798_v35 }
0x1777   : > { %v3635_v29 = vpop.xlane.xlu0 %3634  ;;  %v3776_v57 = vpop.permute.xlu1 %3775 }
0x1778   : > { %3660 = vst.msk [vmem:[%s8102_s29 + $0x10] sm:$0xff] %vm935_vm2, %v3652_v28  ;;  %6827 = vrcp.f32 %v3635_v29 }
0x1779   : > { %v6816_v44 = vpop.eup %6815 }
0x177a   : > { %v6818_v14 = vpop.eup %6817  ;;  %v3653_v4 = vmul.f32 %v6816_v44, %v6802_v36 }
0x177b   : > { %v3650_v53 = vmul.f32 %v6818_v14, %v6800_v21  ;;  %v3778_v59 = vpop.permute.xlu0 %3777  ;;  %v3798_v21 = vsel %vm1408_vm5, %v3776_v57, 0  ;;  %v3774_v36 = vpop.permute.xlu1 %3773 }
0x177c   : > { %3661 = vst.msk [vmem:[%s8102_s29 + $0x18] sm:$0xff] %vm935_vm2, %v3653_v4  ;;  %6423 = vmatprep.subr.msk.bf16.mxu1 %vm1408_vm5, %v3778_v59  ;;  %v3667_v5 = vpack.c.bf16 %v3653_v4, %v3652_v28  ;;  %v3801_v58 = vsel %vm1408_vm5, %v3778_v59, 0  ;;  %v3795_v8 = vsel %vm1408_vm5, %v3774_v36, 0 }
0x177d   : > { %v6820_v34 = vpop.eup %6819  ;;  %3658 = vst.msk [vmem:[%s8102_s29] sm:$0xff] %vm935_vm2, %v3650_v53 }
0x177e   : > { %v6822_v12 = vpop.eup %6821  ;;  %v3651_v23 = vmul.f32 %v6820_v34, %v6804_v40 }
0x177f   : > { %v3656_v42 = vmul.f32 %v6822_v12, %v6806_v39  ;;  %v3764_v2 = vpop.permute.xlu0 %3763  ;;  %v3772_v40 = vpop.permute.xlu1 %3771 }
0x1780   : > { %3659 = vst.msk [vmem:[%s8102_s29 + $0x8] sm:$0xff] %vm935_vm2, %v3651_v23  ;;  %v3666_v60 = vpack.c.bf16 %v3651_v23, %v3650_v53  ;;  %v3792_v41 = vsel %vm1408_vm5, %v3772_v40, 0 }
0x1781   : > { %v6824_v11 = vpop.eup %6823  ;;  %3664 = vst.msk [vmem:[%s8102_s29 + $0x30] sm:$0xff] %vm935_vm2, %v3656_v42 }
0x1782   : > { %v6826_v32 = vpop.eup %6825  ;;  %6258 = vmatprep.mubr.msk.bf16.mxu1 %vm935_vm2, %v3666_v60  ;;  %v3654_v1 = vmul.f32 %v6824_v11, %v6810_v3 }
0x1783   : > { %6259 = vmatmul.mubr.msk.bf16.vlgmr.msra.gmra.mxu1 %vm935_vm2, %v3667_v5  ;;  %v3657_v45 = vmul.f32 %v6826_v32, %v6808_v17  ;;  %v3766_v39 = vpop.permute.xlu1 %3765  ;;  %v3768_v63 = vpop.permute.xlu0 %3767 }
0x1784   : > { %6267 = vmatpush3.bf16.xpose.msra.mxu1 %v3801_v58  ;;  %3662 = vst.msk [vmem:[%s8102_s29 + $0x20] sm:$0xff] %vm935_vm2, %v3654_v1 }
0x1785   : > { %6424 = vmatprep.subr.msk.bf16.mxu1 %vm1408_vm5, %v3776_v57  ;;  %3665 = vst.msk [vmem:[%s8102_s29 + $0x38] sm:$0xff] %vm935_vm2, %v3657_v45  ;;  %v6828_v7 = vpop.eup %6827  ;;  %v3669_v24 = vpack.c.bf16 %v3657_v45, %v3656_v42 }
0x1786   : > { %v3655_v10 = vmul.f32 %v6828_v7, %v6812_v15 }
0x1787   : > { %v3770_v18 = vpop.permute.xlu1 %3769 }
0x1788   : > { %3663 = vst.msk [vmem:[%s8102_s29 + $0x28] sm:$0xff] %vm935_vm2, %v3655_v10  ;;  %v3668_v35 = vpack.c.bf16 %v3655_v10, %v3654_v1 }
0x178a   : > { %6262 = vmatprep.mubr.msk.bf16.mxu1 %vm935_vm2, %v3668_v35 }
0x178b   : > { %6263 = vmatmul.mubr.msk.bf16.gmra.mxu1 %vm935_vm2, %v3669_v24 }
0x178c   : > { %6269 = vmatpush3.bf16.xpose.msra.mxu1 %v3798_v21  ;;  %6274 = vmatprep.mubr.msk.bf16.mxu1 %vm1408_vm5, %v3764_v2 }
0x178d   : > { %6425 = vmatprep.subr.msk.bf16.mxu1 %vm1408_vm5, %v3774_v36 }
0x1794   : > { %6271 = vmatpush3.bf16.xpose.msra.mxu1 %v3795_v8 }
0x1795   : > { %6426 = vmatprep.subr.msk.bf16.mxu1 %vm1408_vm5, %v3772_v40 }
0x179c   : > { %6273 = vmatpush3.bf16.xpose.msra.mxu1 %v3792_v41 }
0x17a3   : > { %6275 = vmatmul.mubr.msk.bf16.vlgmr.msra.gmra.mxu1 %vm1408_vm5, %v3766_v39 }
0x17a4   : > { %6278 = vmatprep.mubr.msk.bf16.mxu1 %vm1408_vm5, %v3768_v63 }
0x17ab   : > { %6279 = vmatmul.mubr.msk.bf16.gmra.mxu1 %vm1408_vm5, %v3770_v18 }
0x1843   : > { %v8136_v51 = vpop.f32.mrf.mxu1 }
0x1845   : > { %v8138_v17 = vpop.f32.mrf.mxu1 }
0x1847   : > { %v8140_v3 = vpop.f32.mrf.mxu1 }
0x1849   : > { %v8142_v0 = vpop.f32.mrf.mxu1 }
0x184b   : > { %v8144_v22 = vpop.f32.mrf.mxu1 }
0x184d   : > { %v8146_v15 = vpop.f32.mrf.mxu1 }
0x184f   : > { %v8148_v37 = vpop.f32.mrf.mxu1 }
0x1851   : > { %v8150_v54 = vpop.f32.mrf.mxu1 }
0x1863   : > { %v6276_v46 = vpop.f32.mrf.mxu1 }
0x1864   : > { %v3846_v6 = vadd.f32 %v8048_v49, %v6276_v46 }
0x1865   : > { %v3837_v55 = vpop.f32.mrf.mxu1 }
0x1866   : > { %v3838_v31 = vadd.f32 %v8048_v49, %v3837_v55  ;;  %v3874_v4 = vsel %vm935_vm2, %v3846_v6, -inf }
0x1867   : > { %v6277_v43 = vpop.f32.mrf.mxu1 }
0x1868   : > { %v3868_v62 = vsel %vm935_vm2, %v3838_v31, -inf  ;;  %v3849_v44 = vadd.f32 %v8048_v49, %v6277_v43 }
0x1869   : > { %v3840_v61 = vpop.f32.mrf.mxu1  ;;  %3869 = vmax.xlane.f32.xlu0 %v3868_v62 }
0x186a   : > { %v3841_v28 = vadd.f32 %v8048_v49, %v3840_v61  ;;  %v3877_v23 = vsel %vm935_vm2, %v3849_v44, -inf }
0x186b   : > { %v6280_v29 = vpop.f32.mrf.mxu1 }
0x186c   : > { %v3871_v14 = vsel %vm935_vm2, %v3841_v28, -inf  ;;  %v3862_v34 = vadd.f32 %v8048_v49, %v6280_v29 }
0x186d   : > { %3872 = vmax.xlane.f32.xlu1 %v3871_v14  ;;  %3875 = vmax.xlane.f32.xlu0 %v3874_v4  ;;  %v3853_v53 = vpop.f32.mrf.mxu1 }
0x186e   : > { %v3854_v5 = vadd.f32 %v8048_v49, %v3853_v53  ;;  %v3886_v32 = vsel %vm935_vm2, %v3862_v34, -inf }
0x186f   : > { %v6281_v59 = vpop.f32.mrf.mxu1 }
0x1870   : > { %v3865_v12 = vadd.f32 %v8048_v49, %v6281_v59  ;;  %v3880_v58 = vsel %vm935_vm2, %v3854_v5, -inf }
0x1871   : > { %3878 = vmax.xlane.f32.xlu0 %v3877_v23  ;;  %v3856_v42 = vpop.f32.mrf.mxu1 }
0x1872   : > { %v3857_v60 = vadd.f32 %v8048_v49, %v3856_v42  ;;  %v3889_v11 = vsel %vm935_vm2, %v3865_v12, -inf }
0x1873   : > { %3890 = vmax.xlane.f32.xlu1 %v3889_v11 }
0x1874   : > { %v3883_v1 = vsel %vm935_vm2, %v3857_v60, -inf }
0x1875   : > { %3887 = vmax.xlane.f32.xlu0 %v3886_v32 }
0x1877   : > { %3884 = vmax.xlane.f32.xlu1 %v3883_v1 }
0x1879   : > { %3881 = vmax.xlane.f32.xlu0 %v3880_v58 }
0x1888   : > { %3973 = vrot.lane.b32.xlu1 %v8017_v33, %s8818_s25 }
0x188c   : > { %3971 = vrot.lane.b32.xlu1 %v8025_v56, %s8818_s25 }
0x188f   : > { %3975 = vrot.lane.b32.xlu0 %v8013_v13, %s8818_s25 }
0x1890   : > { %3969 = vrot.lane.b32.xlu1 %v8029_v47, %s8818_s25 }
0x18f2   : > { %v3870_v45 = vpop.xlane.xlu0 %3869 }
0x18f3   : > { %v3892_v57 = vsub.f32 %v3838_v31, %v3870_v45 }
0x18f5   : > { %v3900_v21 = vmul.f32 1.442695, %v3892_v57 }
0x18f6   : > { %v3873_v7 = vpop.xlane.xlu1 %3872  ;;  %v3876_v10 = vpop.xlane.xlu0 %3875 }
0x18f7   : > { %v3894_v35 = vsub.f32 %v3846_v6, %v3876_v10  ;;  %v3893_v24 = vsub.f32 %v3841_v28, %v3873_v7 }
0x18f9   : > { %v3904_v2 = vmul.f32 1.442695, %v3894_v35  ;;  %v3902_v41 = vmul.f32 1.442695, %v3893_v24 }
0x18fa   : > { %v3879_v36 = vpop.xlane.xlu0 %3878 }
0x18fb   : > { %v3895_v8 = vsub.f32 %v3849_v44, %v3879_v36  ;;  %6829 = vpow2.f32 %v3904_v2 }
0x18fc   : > { %v3891_v40 = vpop.xlane.xlu1 %3890  ;;  %6831 = vpow2.f32 %v3900_v21 }
0x18fd   : > { %v3906_v39 = vmul.f32 1.442695, %v3895_v8  ;;  %v3899_v63 = vsub.f32 %v3865_v12, %v3891_v40 }
0x18fe   : > { %v3888_v18 = vpop.xlane.xlu0 %3887 }
0x18ff   : > { %6833 = vpow2.f32 %v3906_v39  ;;  %v3898_v46 = vsub.f32 %v3862_v34, %v3888_v18  ;;  %v3914_v43 = vmul.f32 1.442695, %v3899_v63 }
0x1900   : > { %v3885_v55 = vpop.xlane.xlu1 %3884  ;;  %6835 = vpow2.f32 %v3902_v41 }
0x1901   : > { %v3912_v31 = vmul.f32 1.442695, %v3898_v46  ;;  %v3897_v62 = vsub.f32 %v3857_v60, %v3885_v55 }
0x1902   : > { %v3882_v6 = vpop.xlane.xlu0 %3881 }
0x1903   : > { %6837 = vpow2.f32 %v3912_v31  ;;  %v3896_v61 = vsub.f32 %v3854_v5, %v3882_v6  ;;  %v3910_v44 = vmul.f32 1.442695, %v3897_v62 }
0x1904   : > { %v3974_v28 = vpop.permute.xlu1 %3973  ;;  %6839 = vpow2.f32 %v3914_v43 }
0x1905   : > { %v3908_v29 = vmul.f32 1.442695, %v3896_v61 }
0x1906   : > { %v3976_v14 = vpop.permute.xlu0 %3975 }
0x1907   : > { %6841 = vpow2.f32 %v3908_v29  ;;  %6282 = vmatprep.subr.bf16.mxu0 %v3976_v14 }
0x1908   : > { %6283 = vmatpush3.bf16.msra.mxu0 %v3976_v14  ;;  %v6830_v4 = vpop.eup %6829  ;;  %6843 = vpow2.f32 %v3910_v44  ;;  %v3972_v53 = vpop.permute.xlu1 %3971 }
0x1909   : > { %6284 = vmatprep.subr.bf16.mxu0 %v3974_v28  ;;  %v3922_v59 = vsel %vm935_vm2, %v6830_v4, 0.0  ;;  %v6832_v34 = vpop.eup %6831 }
0x190a   : > { %3923 = vadd.xlane.f32.xlu0 %v3922_v59  ;;  %v3916_v60 = vsel %vm935_vm2, %v6832_v34, 0.0 }
0x190c   : > { %v6834_v12 = vpop.eup %6833  ;;  %6285 = vmatpush3.bf16.msra.mxu0 %v3974_v28  ;;  %v3970_v5 = vpop.permute.xlu1 %3969 }
0x190d   : > { %6286 = vmatprep.subr.bf16.mxu0 %v3972_v53  ;;  %v3925_v23 = vsel %vm935_vm2, %v6834_v12, 0.0  ;;  %v6836_v42 = vpop.eup %6835 }
0x190e   : > { %3926 = vadd.xlane.f32.xlu1 %v3925_v23  ;;  %3917 = vadd.xlane.f32.xlu0 %v3916_v60  ;;  %v3919_v32 = vsel %vm935_vm2, %v6836_v42, 0.0 }
0x1910   : > { %v6838_v11 = vpop.eup %6837  ;;  %6287 = vmatpush3.bf16.msra.mxu0 %v3972_v53 }
0x1911   : > { %6288 = vmatprep.subr.bf16.mxu0 %v3970_v5  ;;  %v3934_v1 = vsel %vm935_vm2, %v6838_v11, 0.0  ;;  %v6840_v58 = vpop.eup %6839 }
0x1912   : > { %3920 = vadd.xlane.f32.xlu1 %v3919_v32  ;;  %3935 = vadd.xlane.f32.xlu0 %v3934_v1  ;;  %v3937_v7 = vsel %vm935_vm2, %v6840_v58, 0.0 }
0x1914   : > { %v6842_v45 = vpop.eup %6841  ;;  %6289 = vmatpush3.bf16.msra.mxu0 %v3970_v5 }
0x1915   : > { %v3928_v57 = vsel %vm935_vm2, %v6842_v45, 0.0  ;;  %v6844_v10 = vpop.eup %6843 }
0x1916   : > { %3929 = vadd.xlane.f32.xlu1 %v3928_v57  ;;  %3938 = vadd.xlane.f32.xlu0 %v3937_v7  ;;  %v3931_v35 = vsel %vm935_vm2, %v6844_v10, 0.0 }
0x191a   : > { %3932 = vadd.xlane.f32.xlu0 %v3931_v35 }
0x1927   : > { %4070 = vrot.lane.b32.xlu1 %v8017_v33, %s8819_s8 }
0x192b   : > { %4068 = vrot.lane.b32.xlu1 %v8025_v56, %s8819_s8 }
0x192f   : > { %4066 = vrot.lane.b32.xlu1 %v8029_v47, %s8819_s8 }
0x1930   : > { %4072 = vrot.lane.b32.xlu0 %v8013_v13, %s8819_s8 }
0x1933   : > { %4060 = vrot.lane.b32.xlu1 %v8007_v19, %s8820_s4 }
0x1934   : > { %4058 = vrot.lane.b32.xlu0 %v8009_v25, %s8820_s4 }
0x1937   : > { %4064 = vrot.lane.b32.xlu1 %v8015_v50, %s8820_s4 }
0x1938   : > { %4062 = vrot.lane.b32.xlu0 %v8021_v52, %s8820_s4 }
0x1993   : > { %v3924_v24 = vpop.xlane.xlu0 %3923 }
0x1994   : > { %6845 = vrcp.f32 %v3924_v24 }
0x1997   : > { %v3927_v2 = vpop.xlane.xlu1 %3926  ;;  %v3918_v21 = vpop.xlane.xlu0 %3917 }
0x1998   : > { %6847 = vrcp.f32 %v3927_v2 }
0x1999   : > { %6849 = vrcp.f32 %v3918_v21 }
0x199b   : > { %v3921_v36 = vpop.xlane.xlu1 %3920  ;;  %v3936_v8 = vpop.xlane.xlu0 %3935 }
0x199c   : > { %6851 = vrcp.f32 %v3921_v36 }
0x199d   : > { %6853 = vrcp.f32 %v3936_v8 }
0x199f   : > { %v3930_v40 = vpop.xlane.xlu1 %3929  ;;  %v3939_v41 = vpop.xlane.xlu0 %3938 }
0x19a0   : > { %6855 = vrcp.f32 %v3930_v40 }
0x19a1   : > { %6857 = vrcp.f32 %v3939_v41  ;;  %v6846_v39 = vpop.eup %6845 }
0x19a2   : > { %v3950_v63 = vmul.f32 %v6846_v39, %v6830_v4 }
0x19a3   : > { %v3933_v18 = vpop.xlane.xlu0 %3932  ;;  %v4071_v23 = vpop.permute.xlu1 %4070 }
0x19a4   : > { %5708 = vst.msk [vmem:[%s8102_s29 + $0x50] sm:$0xff] %vm935_vm2, %v3950_v63  ;;  %6859 = vrcp.f32 %v3933_v18  ;;  %v4093_v1 = vsel %vm1408_vm5, %v4071_v23, 0 }
0x19a5   : > { %v6848_v46 = vpop.eup %6847 }
0x19a6   : > { %v6850_v55 = vpop.eup %6849  ;;  %v3951_v31 = vmul.f32 %v6848_v46, %v6834_v12 }
0x19a7   : > { %v3948_v43 = vmul.f32 %v6850_v55, %v6832_v34  ;;  %v4073_v62 = vpop.permute.xlu0 %4072 }
0x19a8   : > { %5709 = vst.msk [vmem:[%s8102_s29 + $0x58] sm:$0xff] %vm935_vm2, %v3951_v31  ;;  %6427 = vmatprep.subr.msk.bf16.mxu0 %vm1408_vm5, %v4073_v62  ;;  %v3966_v4 = vpack.c.bf16 %v3951_v31, %v3950_v63  ;;  %v4096_v34 = vsel %vm1408_vm5, %v4073_v62, 0 }
0x19a9   : > { %v6852_v6 = vpop.eup %6851  ;;  %5706 = vst.msk [vmem:[%s8102_s29 + $0x40] sm:$0xff] %vm935_vm2, %v3948_v43 }
0x19aa   : > { %v6854_v61 = vpop.eup %6853  ;;  %v3949_v28 = vmul.f32 %v6852_v6, %v6836_v42 }
0x19ab   : > { %v3954_v29 = vmul.f32 %v6854_v61, %v6838_v11  ;;  %v4059_v32 = vpop.permute.xlu0 %4058 }
0x19ac   : > { %5707 = vst.msk [vmem:[%s8102_s29 + $0x48] sm:$0xff] %vm935_vm2, %v3949_v28  ;;  %v3965_v44 = vpack.c.bf16 %v3949_v28, %v3948_v43 }
0x19ad   : > { %v6856_v14 = vpop.eup %6855  ;;  %5712 = vst.msk [vmem:[%s8102_s29 + $0x70] sm:$0xff] %vm935_vm2, %v3954_v29 }
0x19ae   : > { %v6858_v53 = vpop.eup %6857  ;;  %6290 = vmatprep.mubr.msk.bf16.mxu0 %vm935_vm2, %v3965_v44  ;;  %v3952_v59 = vmul.f32 %v6856_v14, %v6842_v45 }
0x19af   : > { %6291 = vmatmul.mubr.msk.bf16.vlgmr.msra.gmra.mxu0 %vm935_vm2, %v3966_v4  ;;  %v3955_v12 = vmul.f32 %v6858_v53, %v6840_v58  ;;  %v4069_v58 = vpop.permute.xlu1 %4068  ;;  %v4063_v35 = vpop.permute.xlu0 %4062 }
0x19b0   : > { %6299 = vmatpush3.bf16.xpose.msra.mxu0 %v4096_v34  ;;  %5710 = vst.msk [vmem:[%s8102_s29 + $0x60] sm:$0xff] %vm935_vm2, %v3952_v59  ;;  %v4090_v45 = vsel %vm1408_vm5, %v4069_v58, 0 }
0x19b1   : > { %6428 = vmatprep.subr.msk.bf16.mxu0 %vm1408_vm5, %v4071_v23  ;;  %5713 = vst.msk [vmem:[%s8102_s29 + $0x78] sm:$0xff] %vm935_vm2, %v3955_v12  ;;  %v6860_v42 = vpop.eup %6859  ;;  %v3968_v5 = vpack.c.bf16 %v3955_v12, %v3954_v29 }
0x19b2   : > { %v3953_v60 = vmul.f32 %v6860_v42, %v6844_v10 }
0x19b3   : > { %v4067_v57 = vpop.permute.xlu1 %4066 }
0x19b4   : > { %5711 = vst.msk [vmem:[%s8102_s29 + $0x68] sm:$0xff] %vm935_vm2, %v3953_v60  ;;  %v3967_v11 = vpack.c.bf16 %v3953_v60, %v3952_v59  ;;  %v4087_v7 = vsel %vm1408_vm5, %v4067_v57, 0 }
0x19b6   : > { %6294 = vmatprep.mubr.msk.bf16.mxu0 %vm935_vm2, %v3967_v11 }
0x19b7   : > { %6295 = vmatmul.mubr.msk.bf16.gmra.mxu0 %vm935_vm2, %v3968_v5  ;;  %v4061_v10 = vpop.permute.xlu1 %4060 }
0x19b8   : > { %6301 = vmatpush3.bf16.xpose.msra.mxu0 %v4093_v1  ;;  %6306 = vmatprep.mubr.msk.bf16.mxu0 %vm1408_vm5, %v4059_v32 }
0x19b9   : > { %6429 = vmatprep.subr.msk.bf16.mxu0 %vm1408_vm5, %v4069_v58 }
0x19bb   : > { %v4065_v24 = vpop.permute.xlu1 %4064 }
0x19c0   : > { %6303 = vmatpush3.bf16.xpose.msra.mxu0 %v4090_v45 }
0x19c1   : > { %6430 = vmatprep.subr.msk.bf16.mxu0 %vm1408_vm5, %v4067_v57 }
0x19c8   : > { %6305 = vmatpush3.bf16.xpose.msra.mxu0 %v4087_v7 }
0x19cf   : > { %6307 = vmatmul.mubr.msk.bf16.vlgmr.msra.gmra.mxu0 %vm1408_vm5, %v4061_v10 }
0x19d0   : > { %6310 = vmatprep.mubr.msk.bf16.mxu0 %vm1408_vm5, %v4063_v35 }
0x19d7   : > { %6311 = vmatmul.mubr.msk.bf16.gmra.mxu0 %vm1408_vm5, %v4065_v24 }
0x1a6f   : > { %v8232_v2 = vpop.f32.mrf.mxu0 }
0x1a71   : > { %v8234_v21 = vpop.f32.mrf.mxu0 }
0x1a73   : > { %v8236_v36 = vpop.f32.mrf.mxu0 }
0x1a75   : > { %v8240_v40 = vpop.f32.mrf.mxu0 }
0x1a76   : > { %v6518_v41 = vpack.i.bf16 %v8240_v40, %v8234_v21 }
0x1a77   : > { %v8244_v39 = vpop.f32.mrf.mxu0 }
0x1a79   : > { %v8246_v63 = vpop.f32.mrf.mxu0 }
0x1a7b   : > { %v8248_v18 = vpop.f32.mrf.mxu0 }
0x1a7d   : > { %v8252_v55 = vpop.f32.mrf.mxu0 }
0x1a7e   : > { %v6538_v31 = vpack.i.bf16 %v8252_v55, %v8246_v63  ;;  %v8829_v55 = vpack.i.bf16 %v8248_v18, %v8244_v39 }
0x1a8f   : > { %v6308_v43 = vpop.f32.mrf.mxu0 }
0x1a90   : > { %v4141_v28 = vadd.f32 %v8048_v49, %v6308_v43 }
0x1a91   : > { %v4132_v62 = vpop.f32.mrf.mxu0 }
0x1a92   : > { %v4133_v6 = vadd.f32 %v8048_v49, %v4132_v62  ;;  %v4169_v34 = vsel %vm935_vm2, %v4141_v28, -inf }
0x1a93   : > { %v6309_v61 = vpop.f32.mrf.mxu0 }
0x1a94   : > { %v4163_v29 = vsel %vm935_vm2, %v4133_v6, -inf  ;;  %v4144_v53 = vadd.f32 %v8048_v49, %v6309_v61 }
0x1a95   : > { %v4135_v44 = vpop.f32.mrf.mxu0  ;;  %4164 = vmax.xlane.f32.xlu0 %v4163_v29 }
0x1a96   : > { %v4136_v14 = vadd.f32 %v8048_v49, %v4135_v44  ;;  %v4172_v11 = vsel %vm935_vm2, %v4144_v53, -inf }
0x1a97   : > { %v6312_v4 = vpop.f32.mrf.mxu0 }
0x1a98   : > { %v4166_v59 = vsel %vm935_vm2, %v4136_v14, -inf  ;;  %v4157_v42 = vadd.f32 %v8048_v49, %v6312_v4 }
0x1a99   : > { %4167 = vmax.xlane.f32.xlu1 %v4166_v59  ;;  %4170 = vmax.xlane.f32.xlu0 %v4169_v34  ;;  %v4148_v12 = vpop.f32.mrf.mxu0 }
0x1a9a   : > { %v4149_v58 = vadd.f32 %v8048_v49, %v4148_v12  ;;  %v4181_v45 = vsel %vm935_vm2, %v4157_v42, -inf }
0x1a9b   : > { %v6313_v23 = vpop.f32.mrf.mxu0 }
0x1a9c   : > { %v4160_v60 = vadd.f32 %v8048_v49, %v6313_v23  ;;  %v4175_v7 = vsel %vm935_vm2, %v4149_v58, -inf }
0x1a9d   : > { %4173 = vmax.xlane.f32.xlu0 %v4172_v11  ;;  %v4151_v5 = vpop.f32.mrf.mxu0 }
0x1a9e   : > { %v4152_v32 = vadd.f32 %v8048_v49, %v4151_v5  ;;  %v4184_v1 = vsel %vm935_vm2, %v4160_v60, -inf }
0x1a9f   : > { %4185 = vmax.xlane.f32.xlu1 %v4184_v1 }
0x1aa0   : > { %v4178_v57 = vsel %vm935_vm2, %v4152_v32, -inf }
0x1aa1   : > { %4182 = vmax.xlane.f32.xlu0 %v4181_v45 }
0x1aa3   : > { %4179 = vmax.xlane.f32.xlu1 %v4178_v57 }
0x1aa5   : > { %4176 = vmax.xlane.f32.xlu0 %v4175_v7 }
0x1ab4   : > { %4268 = vrot.lane.b32.xlu1 %v8017_v33, %s8821_s2 }
0x1ab8   : > { %4266 = vrot.lane.b32.xlu1 %v8025_v56, %s8821_s2 }
0x1abb   : > { %4270 = vrot.lane.b32.xlu0 %v8013_v13, %s8821_s2 }
0x1abc   : > { %4264 = vrot.lane.b32.xlu1 %v8029_v47, %s8821_s2 }
0x1b1e   : > { %v4165_v49 = vpop.xlane.xlu0 %4164 }
0x1b1f   : > { %v4187_v10 = vsub.f32 %v4133_v6, %v4165_v49 }
0x1b21   : > { %v4195_v29 = vmul.f32 1.442695, %v4187_v10 }
0x1b22   : > { %v4168_v35 = vpop.xlane.xlu1 %4167  ;;  %v4171_v24 = vpop.xlane.xlu0 %4170 }
0x1b23   : > { %v4189_v43 = vsub.f32 %v4141_v28, %v4171_v24  ;;  %v4188_v62 = vsub.f32 %v4136_v14, %v4168_v35 }
0x1b25   : > { %v4199_v61 = vmul.f32 1.442695, %v4189_v43  ;;  %v4197_v34 = vmul.f32 1.442695, %v4188_v62 }
0x1b26   : > { %v4174_v44 = vpop.xlane.xlu0 %4173 }
0x1b27   : > { %v4190_v4 = vsub.f32 %v4144_v53, %v4174_v44  ;;  %6861 = vpow2.f32 %v4199_v61 }
0x1b28   : > { %v4186_v59 = vpop.xlane.xlu1 %4185  ;;  %6863 = vpow2.f32 %v4195_v29 }
0x1b29   : > { %v4201_v12 = vmul.f32 1.442695, %v4190_v4  ;;  %v4194_v23 = vsub.f32 %v4160_v60, %v4186_v59 }
0x1b2a   : > { %v4183_v11 = vpop.xlane.xlu0 %4182 }
0x1b2b   : > { %6865 = vpow2.f32 %v4201_v12  ;;  %v4193_v5 = vsub.f32 %v4157_v42, %v4183_v11  ;;  %v4209_v45 = vmul.f32 1.442695, %v4194_v23 }
0x1b2c   : > { %v4180_v1 = vpop.xlane.xlu1 %4179  ;;  %6867 = vpow2.f32 %v4197_v34 }
0x1b2d   : > { %v4207_v6 = vmul.f32 1.442695, %v4193_v5  ;;  %v4192_v57 = vsub.f32 %v4152_v32, %v4180_v1 }
0x1b2e   : > { %v4177_v28 = vpop.xlane.xlu0 %4176 }
0x1b2f   : > { %6869 = vpow2.f32 %v4207_v6  ;;  %v4191_v14 = vsub.f32 %v4149_v58, %v4177_v28  ;;  %v4205_v53 = vmul.f32 1.442695, %v4192_v57 }
0x1b30   : > { %v4269_v7 = vpop.permute.xlu1 %4268  ;;  %6871 = vpow2.f32 %v4209_v45 }
0x1b31   : > { %v4203_v49 = vmul.f32 1.442695, %v4191_v14 }
0x1b32   : > { %v4271_v10 = vpop.permute.xlu0 %4270 }
0x1b33   : > { %6873 = vpow2.f32 %v4203_v49  ;;  %6314 = vmatprep.subr.bf16.mxu1 %v4271_v10 }
0x1b34   : > { %6315 = vmatpush3.bf16.msra.mxu1 %v4271_v10  ;;  %v6862_v60 = vpop.eup %6861  ;;  %6875 = vpow2.f32 %v4205_v53  ;;  %v4267_v42 = vpop.permute.xlu1 %4266 }
0x1b35   : > { %6316 = vmatprep.subr.bf16.mxu1 %v4269_v7  ;;  %v4217_v35 = vsel %vm935_vm2, %v6862_v60, 0.0  ;;  %v6864_v24 = vpop.eup %6863 }
0x1b36   : > { %4218 = vadd.xlane.f32.xlu0 %v4217_v35  ;;  %v4211_v62 = vsel %vm935_vm2, %v6864_v24, 0.0 }
0x1b38   : > { %v6866_v32 = vpop.eup %6865  ;;  %6317 = vmatpush3.bf16.msra.mxu1 %v4269_v7  ;;  %v4265_v29 = vpop.permute.xlu1 %4264 }
0x1b39   : > { %6318 = vmatprep.subr.bf16.mxu1 %v4267_v42  ;;  %v4220_v58 = vsel %vm935_vm2, %v6866_v32, 0.0  ;;  %v6868_v43 = vpop.eup %6867 }
0x1b3a   : > { %4221 = vadd.xlane.f32.xlu1 %v4220_v58  ;;  %4212 = vadd.xlane.f32.xlu0 %v4211_v62  ;;  %v4214_v44 = vsel %vm935_vm2, %v6868_v43, 0.0 }
0x1b3c   : > { %v6870_v61 = vpop.eup %6869  ;;  %6319 = vmatpush3.bf16.msra.mxu1 %v4267_v42 }
0x1b3d   : > { %6320 = vmatprep.subr.bf16.mxu1 %v4265_v29  ;;  %v4229_v4 = vsel %vm935_vm2, %v6870_v61, 0.0  ;;  %v6872_v59 = vpop.eup %6871 }
0x1b3e   : > { %4215 = vadd.xlane.f32.xlu1 %v4214_v44  ;;  %4230 = vadd.xlane.f32.xlu0 %v4229_v4  ;;  %v4232_v23 = vsel %vm935_vm2, %v6872_v59, 0.0 }
0x1b40   : > { %v6874_v34 = vpop.eup %6873  ;;  %6321 = vmatpush3.bf16.msra.mxu1 %v4265_v29 }
0x1b41   : > { %v4223_v12 = vsel %vm935_vm2, %v6874_v34, 0.0  ;;  %v6876_v11 = vpop.eup %6875 }
0x1b42   : > { %4224 = vadd.xlane.f32.xlu1 %v4223_v12  ;;  %4233 = vadd.xlane.f32.xlu0 %v4232_v23  ;;  %v4226_v5 = vsel %vm935_vm2, %v6876_v11, 0.0 }
0x1b46   : > { %4227 = vadd.xlane.f32.xlu0 %v4226_v5 }
0x1b53   : > { %4365 = vrot.lane.b32.xlu1 %v8017_v33, %s8822_s28 }
0x1b57   : > { %4363 = vrot.lane.b32.xlu1 %v8025_v56, %s8822_s28 }
0x1b5b   : > { %4361 = vrot.lane.b32.xlu1 %v8029_v47, %s8822_s28 }
0x1b5c   : > { %4367 = vrot.lane.b32.xlu0 %v8013_v13, %s8822_s28 }
0x1b5f   : > { %4355 = vrot.lane.b32.xlu1 %v8007_v19, %s8823_s3 }
0x1b60   : > { %4353 = vrot.lane.b32.xlu0 %v8009_v25, %s8823_s3 }
0x1b63   : > { %4359 = vrot.lane.b32.xlu1 %v8015_v50, %s8823_s3 }
0x1b64   : > { %4357 = vrot.lane.b32.xlu0 %v8021_v52, %s8823_s3 }
0x1bbf   : > { %v4219_v1 = vpop.xlane.xlu0 %4218 }
0x1bc0   : > { %6877 = vrcp.f32 %v4219_v1 }
0x1bc3   : > { %v4222_v6 = vpop.xlane.xlu1 %4221  ;;  %v4213_v45 = vpop.xlane.xlu0 %4212 }
0x1bc4   : > { %6879 = vrcp.f32 %v4222_v6 }
0x1bc5   : > { %6881 = vrcp.f32 %v4213_v45 }
0x1bc7   : > { %v4216_v57 = vpop.xlane.xlu1 %4215  ;;  %v4231_v19 = vpop.xlane.xlu0 %4230 }
0x1bc8   : > { %6883 = vrcp.f32 %v4216_v57 }
0x1bc9   : > { %6885 = vrcp.f32 %v4231_v19 }
0x1bcb   : > { %v4225_v28 = vpop.xlane.xlu1 %4224  ;;  %v4234_v25 = vpop.xlane.xlu0 %4233 }
0x1bcc   : > { %6887 = vrcp.f32 %v4225_v28 }
0x1bcd   : > { %6889 = vrcp.f32 %v4234_v25  ;;  %v6878_v50 = vpop.eup %6877 }
0x1bce   : > { %v4245_v14 = vmul.f32 %v6878_v50, %v6862_v60 }
0x1bcf   : > { %v4228_v52 = vpop.xlane.xlu0 %4227 }
0x1bd0   : > { %5724 = vst.msk [vmem:[%s8102_s29 + $0x90] sm:$0xff] %vm935_vm2, %v4245_v14  ;;  %6891 = vrcp.f32 %v4228_v52 }
0x1bd1   : > { %v6880_v7 = vpop.eup %6879 }
0x1bd2   : > { %v6882_v49 = vpop.eup %6881  ;;  %v4246_v53 = vmul.f32 %v6880_v7, %v6866_v32 }
0x1bd3   : > { %v4243_v10 = vmul.f32 %v6882_v49, %v6864_v24  ;;  %v4368_v42 = vpop.permute.xlu0 %4367 }
0x1bd4   : > { %5725 = vst.msk [vmem:[%s8102_s29 + $0x98] sm:$0xff] %vm935_vm2, %v4246_v53  ;;  %6431 = vmatprep.subr.msk.bf16.mxu1 %vm1408_vm5, %v4368_v42  ;;  %v4261_v32 = vpack.c.bf16 %v4246_v53, %v4245_v14  ;;  %v4391_v12 = vsel %vm1408_vm5, %v4368_v42, 0 }
0x1bd5   : > { %v6884_v35 = vpop.eup %6883  ;;  %5722 = vst.msk [vmem:[%s8102_s29 + $0x80] sm:$0xff] %vm935_vm2, %v4243_v10 }
0x1bd6   : > { %v6886_v58 = vpop.eup %6885  ;;  %v4244_v60 = vmul.f32 %v6884_v35, %v6868_v43  ;;  %v4366_v43 = vpop.permute.xlu1 %4365 }
0x1bd7   : > { %v4249_v62 = vmul.f32 %v6886_v58, %v6870_v61  ;;  %v4354_v45 = vpop.permute.xlu0 %4353 }
0x1bd8   : > { %5723 = vst.msk [vmem:[%s8102_s29 + $0x88] sm:$0xff] %vm935_vm2, %v4244_v60  ;;  %v4260_v29 = vpack.c.bf16 %v4244_v60, %v4243_v10 }
0x1bd9   : > { %v6888_v44 = vpop.eup %6887  ;;  %5728 = vst.msk [vmem:[%s8102_s29 + $0xb0] sm:$0xff] %vm935_vm2, %v4249_v62 }
0x1bda   : > { %v6890_v24 = vpop.eup %6889  ;;  %6322 = vmatprep.mubr.msk.bf16.mxu1 %vm935_vm2, %v4260_v29  ;;  %v4247_v4 = vmul.f32 %v6888_v44, %v6874_v34  ;;  %v4388_v34 = vsel %vm1408_vm5, %v4366_v43, 0 }
0x1bdb   : > { %6323 = vmatmul.mubr.msk.bf16.vlgmr.msra.gmra.mxu1 %vm935_vm2, %v4261_v32  ;;  %v4250_v23 = vmul.f32 %v6890_v24, %v6872_v59  ;;  %v4364_v59 = vpop.permute.xlu1 %4363  ;;  %v4358_v25 = vpop.permute.xlu0 %4357  ;;  %v6975_v24 = vld [vmem:[%s7338_s7] ss:$0 sm:$0xff]  ;;  %s8824_s7 = smov 40  }
0x1bdc   : > { %6331 = vmatpush3.bf16.xpose.msra.mxu1 %v4391_v12  ;;  %5726 = vst.msk [vmem:[%s8102_s29 + $0xa0] sm:$0xff] %vm935_vm2, %v4247_v4  ;;  %v4385_v57 = vsel %vm1408_vm5, %v4364_v59, 0 }
0x1bdd   : > { %6432 = vmatprep.subr.msk.bf16.mxu1 %vm1408_vm5, %v4366_v43  ;;  %5729 = vst.msk [vmem:[%s8102_s29 + $0xb8] sm:$0xff] %vm935_vm2, %v4250_v23  ;;  %v6892_v61 = vpop.eup %6891  ;;  %v4263_v6 = vpack.c.bf16 %v4250_v23, %v4249_v62 }
0x1bde   : > { %v4248_v5 = vmul.f32 %v6892_v61, %v6876_v11 }
0x1bdf   : > { %v4362_v11 = vpop.permute.xlu1 %4361 }
0x1be0   : > { %5727 = vst.msk [vmem:[%s8102_s29 + $0xa8] sm:$0xff] %vm935_vm2, %v4248_v5  ;;  %v4262_v1 = vpack.c.bf16 %v4248_v5, %v4247_v4  ;;  %v4382_v19 = vsel %vm1408_vm5, %v4362_v11, 0 }
0x1be2   : > { %6326 = vmatprep.mubr.msk.bf16.mxu1 %vm935_vm2, %v4262_v1 }
0x1be3   : > { %6327 = vmatmul.mubr.msk.bf16.gmra.mxu1 %vm935_vm2, %v4263_v6  ;;  %v4356_v28 = vpop.permute.xlu1 %4355 }
0x1be4   : > { %6333 = vmatpush3.bf16.xpose.msra.mxu1 %v4388_v34  ;;  %6338 = vmatprep.mubr.msk.bf16.mxu1 %vm1408_vm5, %v4354_v45 }
0x1be5   : > { %6433 = vmatprep.subr.msk.bf16.mxu1 %vm1408_vm5, %v4364_v59 }
0x1be7   : > { %v4360_v50 = vpop.permute.xlu1 %4359 }
0x1bec   : > { %6335 = vmatpush3.bf16.xpose.msra.mxu1 %v4385_v57 }
0x1bed   : > { %6434 = vmatprep.subr.msk.bf16.mxu1 %vm1408_vm5, %v4362_v11 }
0x1bf4   : > { %6337 = vmatpush3.bf16.xpose.msra.mxu1 %v4382_v19 }
0x1bfb   : > { %6339 = vmatmul.mubr.msk.bf16.vlgmr.msra.gmra.mxu1 %vm1408_vm5, %v4356_v28 }
0x1bfc   : > { %6342 = vmatprep.mubr.msk.bf16.mxu1 %vm1408_vm5, %v4358_v25 }
0x1c03   : > { %6343 = vmatmul.mubr.msk.bf16.gmra.mxu1 %vm1408_vm5, %v4360_v50 }
0x1c9b   : > { %v8336_v14 = vpop.f32.mrf.mxu1 }
0x1c9d   : > { %v8338_v52 = vpop.f32.mrf.mxu1 }
0x1c9f   : > { %v8340_v7 = vpop.f32.mrf.mxu1 }
0x1ca0   : > { %v8828_v63 = vpack.i.bf16 %v8340_v7, %v8336_v14 }
0x1ca1   : > { %v8344_v53 = vpop.f32.mrf.mxu1 }
0x1ca2   : > { %v6528_v10 = vpack.i.bf16 %v8344_v53, %v8338_v52 }
0x1ca3   : > { %v8348_v42 = vpop.f32.mrf.mxu1 }
0x1ca5   : > { %v8350_v35 = vpop.f32.mrf.mxu1 }
0x1ca7   : > { %v8352_v58 = vpop.f32.mrf.mxu1 }
0x1ca9   : > { %v8356_v62 = vpop.f32.mrf.mxu1 }
0x1cbb   : > { %v6340_v44 = vpop.f32.mrf.mxu1 }
0x1cbc   : > { %v4436_v23 = vadd.f32 %v6975_v24, %v6340_v44 }
0x1cbd   : > { %v4427_v32 = vpop.f32.mrf.mxu1 }
0x1cbe   : > { %v4428_v4 = vadd.f32 %v6975_v24, %v4427_v32  ;;  %v4464_v45 = vsel %vm935_vm2, %v4436_v23, -inf }
0x1cbf   : > { %v6341_v12 = vpop.f32.mrf.mxu1 }
0x1cc0   : > { %v4458_v43 = vsel %vm935_vm2, %v4428_v4, -inf  ;;  %v4439_v6 = vadd.f32 %v6975_v24, %v6341_v12 }
0x1cc1   : > { %v4430_v61 = vpop.f32.mrf.mxu1  ;;  %4459 = vmax.xlane.f32.xlu0 %v4458_v43 }
0x1cc2   : > { %v4431_v5 = vadd.f32 %v6975_v24, %v4430_v61  ;;  %v4467_v19 = vsel %vm935_vm2, %v4439_v6, -inf }
0x1cc3   : > { %v6344_v1 = vpop.f32.mrf.mxu1 }
0x1cc4   : > { %v4461_v34 = vsel %vm935_vm2, %v4431_v5, -inf  ;;  %v4452_v50 = vadd.f32 %v6975_v24, %v6344_v1 }
0x1cc5   : > { %4462 = vmax.xlane.f32.xlu1 %v4461_v34  ;;  %4465 = vmax.xlane.f32.xlu0 %v4464_v45  ;;  %v4443_v59 = vpop.f32.mrf.mxu1 }
0x1cc6   : > { %v4444_v11 = vadd.f32 %v6975_v24, %v4443_v59  ;;  %v4476_v61 = vsel %vm935_vm2, %v4452_v50, -inf }
0x1cc7   : > { %v6345_v57 = vpop.f32.mrf.mxu1 }
0x1cc8   : > { %v4455_v44 = vadd.f32 %v6975_v24, %v6345_v57  ;;  %v4470_v12 = vsel %vm935_vm2, %v4444_v11, -inf }
0x1cc9   : > { %4468 = vmax.xlane.f32.xlu0 %v4467_v19  ;;  %v4446_v28 = vpop.f32.mrf.mxu1 }
0x1cca   : > { %v8365_v25 = vadd.f32 %v6975_v24, %v4446_v28  ;;  %v4479_v43 = vsel %vm935_vm2, %v4455_v44, -inf }
0x1ccc   : > { %v4473_v32 = vsel %vm935_vm2, %v8365_v25, -inf }
0x1ccd   : > { %4474 = vmax.xlane.f32.xlu1 %v4473_v32  ;;  %4471 = vmax.xlane.f32.xlu0 %v4470_v12 }
0x1cd1   : > { %4480 = vmax.xlane.f32.xlu1 %v4479_v43  ;;  %4477 = vmax.xlane.f32.xlu0 %v4476_v61 }
0x1d4a   : > { %v4460_v34 = vpop.xlane.xlu0 %4459 }
0x1d4b   : > { %v4482_v45 = vsub.f32 %v4428_v4, %v4460_v34 }
0x1d4d   : > { %v4490_v57 = vmul.f32 1.442695, %v4482_v45 }
0x1d4e   : > { %v4463_v59 = vpop.xlane.xlu1 %4462  ;;  %v4466_v19 = vpop.xlane.xlu0 %4465 }
0x1d4f   : > { %v4484_v28 = vsub.f32 %v4436_v23, %v4466_v19  ;;  %v4483_v1 = vsub.f32 %v4431_v5, %v4463_v59 }
0x1d51   : > { %v4494_v24 = vmul.f32 1.442695, %v4484_v28  ;;  %v4492_v46 = vmul.f32 1.442695, %v4483_v1 }
0x1d52   : > { %v4469_v29 = vpop.xlane.xlu0 %4468 }
0x1d53   : > { %v4485_v60 = vsub.f32 %v4439_v6, %v4469_v29  ;;  %6893 = vpow2.f32 %v4494_v24 }
0x1d54   : > { %6895 = vpow2.f32 %v4490_v57 }
0x1d55   : > { %v4496_v32 = vmul.f32 1.442695, %v4485_v60 }
0x1d56   : > { %v4472_v12 = vpop.xlane.xlu0 %4471  ;;  %v4475_v59 = vpop.xlane.xlu1 %4474 }
0x1d57   : > { %6897 = vpow2.f32 %v4496_v32  ;;  %v4486_v49 = vsub.f32 %v4444_v11, %v4472_v12  ;;  %v4487_v1 = vsub.f32 %v8365_v25, %v4475_v59 }
0x1d58   : > { %6899 = vpow2.f32 %v4492_v46 }
0x1d59   : > { %v4498_v4 = vmul.f32 1.442695, %v4486_v49 }
0x1d5a   : > { %v4478_v43 = vpop.xlane.xlu0 %4477  ;;  %v4481_v19 = vpop.xlane.xlu1 %4480 }
0x1d5b   : > { %v4488_v61 = vsub.f32 %v4452_v50, %v4478_v43  ;;  %v4489_v28 = vsub.f32 %v4455_v44, %v4481_v19  ;;  %v6597_v19 = vld [vmem:[%s8754_s13 + $0x18] sm:$0xff]  }
0x1d5d   : > { %v4502_v8 = vmul.f32 1.442695, %v4488_v61  ;;  %v4504_v24 = vmul.f32 1.442695, %v4489_v28  ;;  %v6598_v28 = vld [vmem:[%s8754_s13 + $0x10] sm:$0xff]  }
0x1d5f   : > { %6901 = vpow2.f32 %v4502_v8 }
0x1d60   : > { %v6894_v34 = vpop.eup %6893  ;;  %6903 = vpow2.f32 %v4498_v4 }
0x1d61   : > { %v4512_v23 = vsel %vm935_vm2, %v6894_v34, 0.0  ;;  %v6896_v5 = vpop.eup %6895  ;;  %6905 = vpow2.f32 %v4504_v24 }
0x1d62   : > { %4513 = vadd.xlane.f32.xlu0 %v4512_v23  ;;  %v4506_v45 = vsel %vm935_vm2, %v6896_v5, 0.0 }
0x1d64   : > { %v6898_v29 = vpop.eup %6897 }
0x1d65   : > { %v4515_v6 = vsel %vm935_vm2, %v6898_v29, 0.0  ;;  %v6900_v60 = vpop.eup %6899 }
0x1d66   : > { %4516 = vadd.xlane.f32.xlu1 %v4515_v6  ;;  %4507 = vadd.xlane.f32.xlu0 %v4506_v45  ;;  %v4509_v46 = vsel %vm935_vm2, %v6900_v60, 0.0 }
0x1d6a   : > { %4510 = vadd.xlane.f32.xlu1 %v4509_v46 }
0x1d6c   : > { %v8376_v11 = vpop.eup %6901 }
0x1d6d   : > { %v4524_v8 = vsel %vm935_vm2, %v8376_v11, 0.0  ;;  %v8380_v49 = vpop.eup %6903 }
0x1d6e   : > { %4525 = vadd.xlane.f32.xlu0 %v4524_v8  ;;  %v4518_v50 = vsel %vm935_vm2, %v8380_v49, 0.0 }
0x1d72   : > { %4519 = vadd.xlane.f32.xlu0 %v4518_v50 }
0x1d7b   : > { %4563 = vrot.lane.b32.xlu1 %v8017_v33, %s8824_s7  ;;  %v4500_v33 = vmul.f32 1.442695, %v4487_v1 }
0x1d7d   : > { %6907 = vpow2.f32 %v4500_v33 }
0x1d7f   : > { %4561 = vrot.lane.b32.xlu1 %v8025_v56, %s8824_s7 }
0x1d88   : > { %4565 = vrot.lane.b32.xlu0 %v8013_v13, %s8824_s7  ;;  %v6906_v13 = vpop.eup %6905 }
0x1d89   : > { %v4527_v56 = vsel %vm935_vm2, %v6906_v13, 0.0 }
0x1d8a   : > { %v6908_v21 = vpop.eup %6907 }
0x1d8b   : > { %v4521_v40 = vsel %vm935_vm2, %v6908_v21, 0.0 }
0x1d8c   : > { %6519 = vrot.lane.b32.xlu0 %v6518_v41, %s8825_s27  ;;  %v8827_v41 = vpack.i.bf16 %v8236_v36, %v8232_v2 }
0x1d90   : > { %6529 = vrot.lane.b32.xlu0 %v6528_v10, %s8826_s1 }
0x1d94   : > { %6539 = vrot.lane.b32.xlu0 %v6538_v31, %s8825_s27 }
0x1da3   : > { %4528 = vadd.xlane.f32.xlu1 %v4527_v56 }
0x1da7   : > { %4522 = vadd.xlane.f32.xlu1 %v4521_v40  ;;  %v8831_v40 = vpack.i.bf16 %v8352_v58, %v8348_v42 }
0x1db8   : > { %4559 = vrot.lane.b32.xlu1 %v8029_v47, %s8824_s7 }
0x1dbc   : > { %6524 = vrot.lane.b32.xlu1 %v8827_v41, %s8825_s27 }
0x1dc0   : > { %6534 = vrot.lane.b32.xlu1 %v8828_v63, %s8826_s1  ;;  %v8832_v63 = vpack.i.bf16 %v8356_v62, %v8350_v35 }
0x1dc4   : > { %6544 = vrot.lane.b32.xlu1 %v8829_v55, %s8825_s27  ;;  %s8833_s27 = sshll.u32 %s8835_s26, 6 }
0x1dc5   : > { %s8713_s25 = scalar_lea.vmem %s8764_s23, %s8833_s27 }
0x1deb   : > { %v4514_v31 = vpop.xlane.xlu0 %4513 }
0x1dec   : > { %6909 = vrcp.f32 %v4514_v31 }
0x1def   : > { %v4517_v52 = vpop.xlane.xlu1 %4516  ;;  %v4508_v47 = vpop.xlane.xlu0 %4507 }
0x1df0   : > { %6911 = vrcp.f32 %v4517_v52 }
0x1df1   : > { %6913 = vrcp.f32 %v4508_v47 }
0x1df3   : > { %v4511_v2 = vpop.xlane.xlu1 %4510 }
0x1df4   : > { %6915 = vrcp.f32 %v4511_v2 }
0x1df7   : > { %v4526_v36 = vpop.xlane.xlu0 %4525  ;;  %v4564_v44 = vpop.permute.xlu1 %4563 }
0x1df8   : > { %6917 = vrcp.f32 %v4526_v36 }
0x1df9   : > { %v6910_v14 = vpop.eup %6909 }
0x1dfa   : > { %v4540_v7 = vmul.f32 %v6910_v14, %v6894_v34 }
0x1dfb   : > { %v4520_v53 = vpop.xlane.xlu0 %4519  ;;  %v4562_v4 = vpop.permute.xlu1 %4561 }
0x1dfc   : > { %5740 = vst.msk [vmem:[%s8102_s29 + $0xd0] sm:$0xff] %vm935_vm2, %v4540_v7  ;;  %6919 = vrcp.f32 %v4520_v53 }
0x1dfd   : > { %v6912_v10 = vpop.eup %6911 }
0x1dfe   : > { %v6914_v39 = vpop.eup %6913  ;;  %v4541_v18 = vmul.f32 %v6912_v10, %v6898_v29 }
0x1dff   : > { %v4538_v25 = vmul.f32 %v6914_v39, %v6896_v5  ;;  %v4566_v57 = vpop.permute.xlu0 %4565 }
0x1e00   : > { %5741 = vst.msk [vmem:[%s8102_s29 + $0xd8] sm:$0xff] %vm935_vm2, %v4541_v18  ;;  %6346 = vmatprep.subr.bf16.mxu0 %v4566_v57  ;;  %v4556_v45 = vpack.c.bf16 %v4541_v18, %v4540_v7 }
0x1e01   : > { %v6916_v32 = vpop.eup %6915  ;;  %5738 = vst.msk [vmem:[%s8102_s29 + $0xc0] sm:$0xff] %vm935_vm2, %v4538_v25  ;;  %6347 = vmatpush3.bf16.msra.mxu0 %v4566_v57 }
0x1e02   : > { %v4539_v12 = vmul.f32 %v6916_v32, %v6900_v60  ;;  %6348 = vmatprep.subr.bf16.mxu0 %v4564_v44 }
0x1e03   : > { %v6520_v14 = vpop.permute.xlu0 %6519 }
0x1e04   : > { %5739 = vst.msk [vmem:[%s8102_s29 + $0xc8] sm:$0xff] %vm935_vm2, %v4539_v12  ;;  %v4555_v43 = vpack.c.bf16 %v4539_v12, %v4538_v25  ;;  %v6522_v53 = vunpack.i.h.bf16 %v6520_v14  ;;  %v6521_v10 = vunpack.i.l.bf16 %v6520_v14 }
0x1e05   : > { %v6918_v61 = vpop.eup %6917  ;;  %6349 = vmatpush3.bf16.msra.mxu0 %v4564_v44 }
0x1e06   : > { %6354 = vmatprep.mubr.msk.bf16.mxu0 %vm935_vm2, %v4555_v43  ;;  %6350 = vmatprep.subr.bf16.mxu0 %v4562_v4  ;;  %v4544_v34 = vmul.f32 %v6918_v61, %v8376_v11  ;;  %v4745_v61 = vsel %vm1408_vm5, %v8142_v0, %v6522_v53 }
0x1e07   : > { %v6530_v42 = vpop.permute.xlu0 %6529 }
0x1e08   : > { %5744 = vst.msk [vmem:[%s8102_s29 + $0xf0] sm:$0xff] %vm935_vm2, %v4544_v34  ;;  %v6532_v44 = vunpack.i.h.bf16 %v6530_v42  ;;  %v6531_v57 = vunpack.i.l.bf16 %v6530_v42 }
0x1e09   : > { %v6920_v23 = vpop.eup %6919  ;;  %6351 = vmatpush3.bf16.msra.mxu0 %v4562_v4  ;;  %v4744_v4 = vsel %vm1408_vm5, %v8138_v17, %v6521_v10 }
0x1e0a   : > { %v4542_v5 = vmul.f32 %v6920_v23, %v8380_v49  ;;  %v4753_v0 = vsel %vm2645_vm6, %v4745_v61, %v6532_v44 }
0x1e0b   : > { %v6540_v39 = vpop.permute.xlu0 %6539 }
0x1e0c   : > { %5742 = vst.msk [vmem:[%s8102_s29 + $0xe0] sm:$0xff] %vm935_vm2, %v4542_v5 }
0x1e2c   : > { %v4529_v29 = vpop.xlane.xlu1 %4528 }
0x1e2d   : > { %6921 = vrcp.f32 %v4529_v29 }
0x1e30   : > { %v4523_v6 = vpop.xlane.xlu1 %4522 }
0x1e31   : > { %6923 = vrcp.f32 %v4523_v6 }
0x1e34   : > { %v4560_v60 = vpop.permute.xlu1 %4559 }
0x1e35   : > { %6352 = vmatprep.subr.bf16.mxu0 %v4560_v60 }
0x1e36   : > { %6353 = vmatpush3.bf16.msra.mxu0 %v4560_v60 }
0x1e37   : > { %6362 = vmatprep.subr.bf16.mxu0 %v6597_v19 }
0x1e38   : > { %v6525_v36 = vpop.permute.xlu1 %6524 }
0x1e39   : > { %6355 = vmatmul.mubr.msk.bf16.vlgmr.msra.gmra.mxu0 %vm935_vm2, %v4556_v45  ;;  %v6527_v18 = vunpack.i.h.bf16 %v6525_v36  ;;  %v6526_v35 = vunpack.i.l.bf16 %v6525_v36 }
0x1e3a   : > { %v6922_v46 = vpop.eup %6921  ;;  %6363 = vmatpush3.bf16.msra.mxu0 %v6597_v19  ;;  %v6542_v19 = vunpack.i.h.bf16 %v6540_v39 }
0x1e3b   : > { %v4545_v11 = vmul.f32 %v6922_v46, %v6906_v13  ;;  %6364 = vmatprep.subr.bf16.mxu0 %v6598_v28  ;;  %v4746_v23 = vsel %vm1408_vm5, %v8136_v51, %v6526_v35  ;;  %v4752_v46 = vsel %vm2645_vm6, %v4744_v4, %v6531_v57  ;;  %v5755_v35 = vld [vmem:[%s8755_s14 + $0x1] ss:$0 sm:$0xff] }
0x1e3c   : > { %v6535_v7 = vpop.permute.xlu1 %6534 }
0x1e3d   : > { %5745 = vst.msk [vmem:[%s8102_s29 + $0xf8] sm:$0xff] %vm935_vm2, %v4545_v11  ;;  %v4558_v59 = vpack.c.bf16 %v4545_v11, %v4544_v34  ;;  %v6537_v62 = vunpack.i.h.bf16 %v6535_v7  ;;  %v6536_v25 = vunpack.i.l.bf16 %v6535_v7  ;;  %v4747_v34 = vsel %vm1408_vm5, %v8140_v3, %v6527_v18 }
0x1e3e   : > { %v6924_v8 = vpop.eup %6923  ;;  %6365 = vmatpush3.bf16.msra.mxu0 %v6598_v28  ;;  %v6541_v28 = vunpack.i.l.bf16 %v6540_v39 }
0x1e3f   : > { %v4543_v50 = vmul.f32 %v6924_v8, %v6908_v21  ;;  %v4754_v29 = vsel %vm2645_vm6, %v4746_v23, %v6536_v25  ;;  %v4755_v6 = vsel %vm2645_vm6, %v4747_v34, %v6537_v62 }
0x1e40   : > { %v6545_v58 = vpop.permute.xlu1 %6544 }
0x1e41   : > { %5743 = vst.msk [vmem:[%s8102_s29 + $0xe8] sm:$0xff] %vm935_vm2, %v4543_v50  ;;  %v4557_v49 = vpack.c.bf16 %v4543_v50, %v4542_v5  ;;  %s8830_s29 = smov 24  }
0x1e43   : > { %6358 = vmatprep.mubr.msk.bf16.mxu0 %vm935_vm2, %v4557_v49 }
0x1e44   : > { %6359 = vmatmul.mubr.msk.bf16.gmra.mxu0 %vm935_vm2, %v4558_v59 }
0x1ef9   : > { %v6356_v1 = vpop.f32.mrf.mxu0 }
0x1efb   : > { %v4617_v24 = vpop.f32.mrf.mxu0 }
0x1efd   : > { %v6357_v33 = vpop.f32.mrf.mxu0 }
0x1efe   : > { %v6548_v13 = vpack.i.bf16 %v6357_v33, %v6356_v1  ;;  %v6547_v1 = vunpack.i.h.bf16 %v6545_v58 }
0x1eff   : > { %v4620_v56 = vpop.f32.mrf.mxu0 }
0x1f00   : > { %v6553_v21 = vpack.i.bf16 %v4620_v56, %v4617_v24  ;;  %6549 = vrot.lane.b32.xlu1 %v6548_v13, %s8830_s29  ;;  %v6546_v24 = vunpack.i.l.bf16 %v6545_v58 }
0x1f02   : > { %6554 = vrot.lane.b32.xlu0 %v6553_v21, %s8830_s29 }
0x1f04   : > { %6564 = vrot.lane.b32.xlu1 %v8831_v40, %s8826_s1  ;;  %v6360_v41 = vpop.f32.mrf.mxu0 }
0x1f06   : > { %6559 = vrot.lane.b32.xlu0 %v8832_v63, %s8826_s1  ;;  %v4633_v55 = vpop.f32.mrf.mxu0 }
0x1f08   : > { %v6361_v31 = vpop.f32.mrf.mxu0 }
0x1f09   : > { %v6573_v52 = vpack.i.bf16 %v6361_v31, %v6360_v41  ;;  %v4748_v31 = vsel %vm1408_vm5, %v8146_v15, %v6541_v28 }
0x1f0a   : > { %v4636_v47 = vpop.f32.mrf.mxu0 }
0x1f0b   : > { %v6568_v2 = vpack.i.bf16 %v4636_v47, %v4633_v55  ;;  %6574 = vrot.lane.b32.xlu1 %v6573_v52, %s8830_s29  ;;  %v4749_v55 = vsel %vm1408_vm5, %v8150_v54, %v6542_v19  ;;  %v4751_v52 = vsel %vm1408_vm5, %v8148_v37, %v6547_v1  ;;  %v4750_v47 = vsel %vm1408_vm5, %v8144_v22, %v6546_v24 }
0x1f0d   : > { %6569 = vrot.lane.b32.xlu0 %v6568_v2, %s8830_s29 }
0x1f72   : > { %v6550_v32 = vpop.permute.xlu1 %6549 }
0x1f73   : > { %v6552_v12 = vunpack.i.h.bf16 %v6550_v32  ;;  %v6551_v43 = vunpack.i.l.bf16 %v6550_v32 }
0x1f74   : > { %v6555_v5 = vpop.permute.xlu0 %6554 }
0x1f75   : > { %v6557_v60 = vunpack.i.h.bf16 %v6555_v5  ;;  %v6556_v45 = vunpack.i.l.bf16 %v6555_v5  ;;  %v4763_v11 = vsel %vm2654_vm7, %v4755_v6, %v6552_v12  ;;  %v4762_v17 = vsel %vm2654_vm7, %v4754_v29, %v6551_v43 }
0x1f76   : > { %v4769_v50 = vpack.c.bf16 %v4763_v11, %v4762_v17  ;;  %v6565_v49 = vpop.permute.xlu1 %6564 }
0x1f77   : > { %v4760_v3 = vsel %vm2654_vm7, %v4752_v46, %v6556_v45  ;;  %v4761_v8 = vsel %vm2654_vm7, %v4753_v0, %v6557_v60  ;;  %v6567_v33 = vunpack.i.h.bf16 %v6565_v49  ;;  %v6566_v13 = vunpack.i.l.bf16 %v6565_v49 }
0x1f78   : > { %v4768_v51 = vpack.c.bf16 %v4761_v8, %v4760_v3  ;;  %v6560_v59 = vpop.permute.xlu0 %6559 }
0x1f79   : > { %v6562_v56 = vunpack.i.h.bf16 %v6560_v59  ;;  %v6561_v21 = vunpack.i.l.bf16 %v6560_v59  ;;  %v4759_v36 = vsel %vm2645_vm6, %v4751_v52, %v6567_v33  ;;  %v4758_v14 = vsel %vm2645_vm6, %v4750_v47, %v6566_v13 }
0x1f7a   : > { %6366 = vmatprep.mubr.msk.bf16.mxu0 %vm1039_vm3, %v4768_v51 }
0x1f7b   : > { %6367 = vmatmul.mubr.msk.bf16.vlgmr.msra.gmra.mxu0 %vm1039_vm3, %v4769_v50  ;;  %v4756_v58 = vsel %vm2645_vm6, %v4748_v31, %v6561_v21  ;;  %v4757_v54 = vsel %vm2645_vm6, %v4749_v55, %v6562_v56 }
0x1f7d   : > { %v6575_v40 = vpop.permute.xlu1 %6574 }
0x1f7e   : > { %v6577_v41 = vunpack.i.h.bf16 %v6575_v40  ;;  %v6576_v63 = vunpack.i.l.bf16 %v6575_v40 }
0x1f7f   : > { %v6570_v2 = vpop.permute.xlu0 %6569 }
0x1f80   : > { %v6572_v7 = vunpack.i.h.bf16 %v6570_v2  ;;  %v6571_v42 = vunpack.i.l.bf16 %v6570_v2  ;;  %v4767_v53 = vsel %vm2654_vm7, %v4759_v36, %v6577_v41  ;;  %v4766_v15 = vsel %vm2654_vm7, %v4758_v14, %v6576_v63 }
0x1f81   : > { %v4771_v39 = vpack.c.bf16 %v4767_v53, %v4766_v15 }
0x1f82   : > { %v4764_v37 = vsel %vm2654_vm7, %v4756_v58, %v6571_v42  ;;  %v4765_v10 = vsel %vm2654_vm7, %v4757_v54, %v6572_v7 }
0x1f83   : > { %v4770_v22 = vpack.c.bf16 %v4765_v10, %v4764_v37 }
0x1f85   : > { %6370 = vmatprep.mubr.msk.bf16.mxu0 %vm1039_vm3, %v4770_v22 }
0x1f86   : > { %6371 = vmatmul.mubr.msk.bf16.gmra.mxu0 %vm1039_vm3, %v4771_v39 }
0x203b   : > { %v6368_v18 = vpop.f32.mrf.mxu0 }
0x203c   : > { %v4852_v25 = vadd.f32 %v6368_v18, %v5755_v35 }
0x203d   : > { %v4843_v62 = vpop.f32.mrf.mxu0 }
0x203e   : > { %v4844_v44 = vadd.f32 %v5755_v35, %v4843_v62  ;;  %v4876_v43 = vadd.f32 %v4852_v25, %v7980_v9 }
0x203f   : > { %v6369_v57 = vpop.f32.mrf.mxu0 }
0x2040   : > { %v4874_v32 = vadd.f32 %v4844_v44, %v7972_v38  ;;  %v4855_v61 = vadd.f32 %v6369_v57, %v5755_v35  ;;  %v4892_v60 = vsel %vm1039_vm3, %v4876_v43, 0.0 }
0x2041   : > { %v4846_v12 = vpop.f32.mrf.mxu0 }
0x2042   : > { %v4847_v4 = vadd.f32 %v5755_v35, %v4846_v12  ;;  %v4886_v34 = vsel %vm1039_vm3, %v4874_v32, 0.0  ;;  %v4877_v5 = vadd.f32 %v4855_v61, %v7982_v20  ;;  %v6599_v61 = vld [vmem:[%s8758_s17 + $0x18] sm:$0xff]  }
0x2043   : > { %4887 = vadd.xlane.f32.xlu0 %v4886_v34  ;;  %6374 = vmatprep.subr.bf16.mxu1 %v6599_v61 }
0x2044   : > { %v4875_v23 = vadd.f32 %v4847_v4, %v7974_v26  ;;  %v4895_v0 = vsel %vm1039_vm3, %v4877_v5, 0.0  ;;  %6375 = vmatpush3.bf16.msra.mxu1 %v6599_v61  ;;  %v6600_v4 = vld [vmem:[%s8758_s17 + $0x10] sm:$0xff]  }
0x2045   : > { %6376 = vmatprep.subr.bf16.mxu1 %v6600_v4 }
0x2046   : > { %v6372_v29 = vpop.f32.mrf.mxu0  ;;  %v4889_v6 = vsel %vm1039_vm3, %v4875_v23, 0.0 }
0x2047   : > { %4890 = vadd.xlane.f32.xlu1 %v4889_v6  ;;  %4893 = vadd.xlane.f32.xlu0 %v4892_v60  ;;  %v4868_v46 = vadd.f32 %v6372_v29, %v5755_v35 }
0x2048   : > { %v4859_v38 = vpop.f32.mrf.mxu0  ;;  %6377 = vmatpush3.bf16.msra.mxu1 %v6600_v4  ;;  %v6602_v4 = vld [vmem:[%s8760_s19 + $0x30] sm:$0xff]  }
0x2049   : > { %v4860_v45 = vadd.f32 %v5755_v35, %v4859_v38  ;;  %v4880_v8 = vadd.f32 %v4868_v46, %v7997_v48 }
0x204a   : > { %v6373_v9 = vpop.f32.mrf.mxu0 }
0x204b   : > { %v4878_v11 = vadd.f32 %v4860_v45, %v7989_v27  ;;  %4896 = vadd.xlane.f32.xlu0 %v4895_v0  ;;  %v4871_v26 = vadd.f32 %v6373_v9, %v5755_v35  ;;  %v4904_v59 = vsel %vm1039_vm3, %v4880_v8, 0.0 }
0x204c   : > { %v4862_v17 = vpop.f32.mrf.mxu0 }
0x204d   : > { %v4863_v3 = vadd.f32 %v5755_v35, %v4862_v17  ;;  %v4898_v20 = vsel %vm1039_vm3, %v4878_v11, 0.0  ;;  %v4881_v50 = vadd.f32 %v4871_v26, %v7999_v30 }
0x204f   : > { %v4879_v51 = vadd.f32 %v4863_v3, %v7991_v16  ;;  %4899 = vadd.xlane.f32.xlu0 %v4898_v20  ;;  %v4907_v27 = vsel %vm1039_vm3, %v4881_v50, 0.0 }
0x2051   : > { %v4901_v49 = vsel %vm1039_vm3, %v4879_v51, 0.0 }
0x2052   : > { %4902 = vadd.xlane.f32.xlu1 %v4901_v49 }
0x2053   : > { %4905 = vadd.xlane.f32.xlu0 %v4904_v59 }
0x2056   : > { %4908 = vadd.xlane.f32.xlu1 %v4907_v27 }
0x20cc   : > { %v4888_v19 = vpop.xlane.xlu0 %4887 }
0x20cd   : > { %v4910_v28 = vmul.f32 0.03125, %v4888_v19 }
0x20cf   : > { %v8514_v1 = vsub.f32 %v4874_v32, %v4910_v28 }
0x20d0   : > { %v4891_v24 = vpop.xlane.xlu1 %4890  ;;  %v4894_v48 = vpop.xlane.xlu0 %4893 }
0x20d1   : > { %v4911_v33 = vmul.f32 0.03125, %v4891_v24  ;;  %v4912_v16 = vmul.f32 0.03125, %v4894_v48  ;;  %v4926_v30 = vmul.f32 %v8514_v1, %v8514_v1  ;;  %v5764_v24 = vld [vmem:[%s8756_s15 + $0x1] ss:$0 sm:$0xff] }
0x20d3   : > { %v8518_v13 = vsub.f32 %v4875_v23, %v4911_v33  ;;  %v8520_v56 = vsub.f32 %v4876_v43, %v4912_v16  ;;  %v4934_v21 = vsel %vm1039_vm3, %v4926_v30, 0.0 }
0x20d4   : > { %4935 = vadd.xlane.f32.xlu0 %v4934_v21  ;;  %v4897_v40 = vpop.xlane.xlu0 %4896 }
0x20d5   : > { %v4913_v41 = vmul.f32 0.03125, %v4897_v40  ;;  %v4927_v63 = vmul.f32 %v8518_v13, %v8518_v13  ;;  %v4928_v55 = vmul.f32 %v8520_v56, %v8520_v56 }
0x20d7   : > { %v8527_v31 = vsub.f32 %v4877_v5, %v4913_v41  ;;  %v4937_v52 = vsel %vm1039_vm3, %v4927_v63, 0.0  ;;  %v4940_v47 = vsel %vm1039_vm3, %v4928_v55, 0.0 }
0x20d8   : > { %4938 = vadd.xlane.f32.xlu1 %v4937_v52  ;;  %4941 = vadd.xlane.f32.xlu0 %v4940_v47  ;;  %v4900_v2 = vpop.xlane.xlu0 %4899 }
0x20d9   : > { %v4914_v36 = vmul.f32 0.03125, %v4900_v2  ;;  %v4929_v14 = vmul.f32 %v8527_v31, %v8527_v31 }
0x20db   : > { %v8533_v7 = vsub.f32 %v4878_v11, %v4914_v36  ;;  %v4903_v42 = vpop.xlane.xlu1 %4902  ;;  %v4943_v58 = vsel %vm1039_vm3, %v4929_v14, 0.0 }
0x20dc   : > { %v4915_v54 = vmul.f32 0.03125, %v4903_v42  ;;  %4944 = vadd.xlane.f32.xlu1 %v4943_v58  ;;  %v4906_v53 = vpop.xlane.xlu0 %4905 }
0x20dd   : > { %v4916_v15 = vmul.f32 0.03125, %v4906_v53  ;;  %v4930_v37 = vmul.f32 %v8533_v7, %v8533_v7 }
0x20de   : > { %v8538_v10 = vsub.f32 %v4879_v51, %v4915_v54 }
0x20df   : > { %v8540_v22 = vsub.f32 %v4880_v8, %v4916_v15  ;;  %v4909_v39 = vpop.xlane.xlu1 %4908  ;;  %v4946_v18 = vsel %vm1039_vm3, %v4930_v37, 0.0 }
0x20e0   : > { %v4917_v35 = vmul.f32 0.03125, %v4909_v39  ;;  %4947 = vadd.xlane.f32.xlu0 %v4946_v18  ;;  %v4931_v62 = vmul.f32 %v8538_v10, %v8538_v10 }
0x20e1   : > { %v4932_v25 = vmul.f32 %v8540_v22, %v8540_v22 }
0x20e2   : > { %v8547_v44 = vsub.f32 %v4881_v50, %v4917_v35  ;;  %v4949_v57 = vsel %vm1039_vm3, %v4931_v62, 0.0 }
0x20e3   : > { %4950 = vadd.xlane.f32.xlu1 %v4949_v57  ;;  %v4952_v32 = vsel %vm1039_vm3, %v4932_v25, 0.0 }
0x20e4   : > { %4953 = vadd.xlane.f32.xlu0 %v4952_v32  ;;  %v4933_v12 = vmul.f32 %v8547_v44, %v8547_v44 }
0x20e6   : > { %v4955_v43 = vsel %vm1039_vm3, %v4933_v12, 0.0 }
0x20e7   : > { %4956 = vadd.xlane.f32.xlu1 %v4955_v43 }
0x215d   : > { %v4936_v34 = vpop.xlane.xlu0 %4935 }
0x215e   : > { %v4958_v23 = vmul.f32 0.03125, %v4936_v34  ;;  %v6603_v34 = vld [vmem:[%s8760_s19 + $0x28] sm:$0xff]  }
0x2160   : > { %v4966_v5 = vadd.f32 1e-12, %v4958_v23  ;;  %v6604_v23 = vld [vmem:[%s8760_s19 + $0x20] sm:$0xff]  }
0x2161   : > { %v4939_v29 = vpop.xlane.xlu1 %4938  ;;  %v4942_v6 = vpop.xlane.xlu0 %4941 }
0x2162   : > { %6925 = vrsqrt.f32 %v4966_v5  ;;  %v4959_v60 = vmul.f32 0.03125, %v4939_v29  ;;  %v4960_v38 = vmul.f32 0.03125, %v4942_v6  ;;  %v5771_v5 = vld [vmem:[%s8759_s18 + $0x1] ss:$0 sm:$0xff] }
0x2164   : > { %v4967_v45 = vadd.f32 1e-12, %v4959_v60  ;;  %v4968_v46 = vadd.f32 1e-12, %v4960_v38 }
0x2165   : > { %v4945_v9 = vpop.xlane.xlu1 %4944 }
0x2166   : > { %6927 = vrsqrt.f32 %v4967_v45  ;;  %v4961_v0 = vmul.f32 0.03125, %v4945_v9 }
0x2167   : > { %6929 = vrsqrt.f32 %v4968_v46 }
0x2168   : > { %v4969_v11 = vadd.f32 1e-12, %v4961_v0 }
0x2169   : > { %v4948_v17 = vpop.xlane.xlu0 %4947 }
0x216a   : > { %6931 = vrsqrt.f32 %v4969_v11  ;;  %v4962_v26 = vmul.f32 0.03125, %v4948_v17 }
0x216c   : > { %v4970_v3 = vadd.f32 1e-12, %v4962_v26  ;;  %v4951_v20 = vpop.xlane.xlu1 %4950 }
0x216d   : > { %v4963_v8 = vmul.f32 0.03125, %v4951_v20  ;;  %v4954_v51 = vpop.xlane.xlu0 %4953 }
0x216e   : > { %6933 = vrsqrt.f32 %v4970_v3  ;;  %v4964_v50 = vmul.f32 0.03125, %v4954_v51 }
0x216f   : > { %v6926_v49 = vpop.eup %6925  ;;  %v4971_v59 = vadd.f32 1e-12, %v4963_v8 }
0x2170   : > { %v4972_v27 = vadd.f32 1e-12, %v4964_v50  ;;  %v4957_v19 = vpop.xlane.xlu1 %4956  ;;  %v4982_v28 = vmul.f32 %v6926_v49, %v8514_v1  ;;  %v5765_v1 = vld [vmem:[%s8757_s16 + $0x1] ss:$0 sm:$0xff] }
0x2171   : > { %6935 = vrsqrt.f32 %v4971_v59  ;;  %v4965_v48 = vmul.f32 0.03125, %v4957_v19 }
0x2172   : > { %6937 = vrsqrt.f32 %v4972_v27  ;;  %v4996_v40 = vmul.f32 %v5764_v24, %v4982_v28 }
0x2173   : > { %v6928_v33 = vpop.eup %6927  ;;  %v4973_v16 = vadd.f32 1e-12, %v4965_v48 }
0x2174   : > { %v6930_v30 = vpop.eup %6929  ;;  %v4983_v21 = vmul.f32 %v6928_v33, %v8518_v13  ;;  %v8570_v2 = vadd.f32 %v5765_v1, %v4996_v40 }
0x2175   : > { %v4984_v41 = vmul.f32 %v6930_v30, %v8520_v56  ;;  %6939 = vrsqrt.f32 %v4973_v16 }
0x2176   : > { %v4997_v63 = vmul.f32 %v5764_v24, %v4983_v21 }
0x2177   : > { %v6932_v55 = vpop.eup %6931  ;;  %v4998_v52 = vmul.f32 %v5764_v24, %v4984_v41 }
0x2178   : > { %v4985_v47 = vmul.f32 %v6932_v55, %v8527_v31  ;;  %v8572_v36 = vadd.f32 %v5765_v1, %v4997_v63 }
0x2179   : > { %v8577_v56 = vadd.f32 %v5765_v1, %v4998_v52 }
0x217a   : > { %v4999_v14 = vmul.f32 %v5764_v24, %v4985_v47  ;;  %v5018_v13 = vpack.c.bf16 %v8572_v36, %v8570_v2 }
0x217b   : > { %v6934_v42 = vpop.eup %6933 }
0x217c   : > { %6378 = vmatprep.mubr.msk.bf16.mxu1 %vm1039_vm3, %v5018_v13  ;;  %v8579_v58 = vadd.f32 %v5765_v1, %v4999_v14  ;;  %v4986_v54 = vmul.f32 %v6934_v42, %v8533_v7 }
0x217e   : > { %v6936_v53 = vpop.eup %6935  ;;  %v5019_v31 = vpack.c.bf16 %v8579_v58, %v8577_v56  ;;  %v5000_v39 = vmul.f32 %v5764_v24, %v4986_v54 }
0x217f   : > { %v6938_v15 = vpop.eup %6937  ;;  %v4987_v37 = vmul.f32 %v6936_v53, %v8538_v10 }
0x2180   : > { %6379 = vmatmul.mubr.msk.bf16.vlgmr.msra.gmra.mxu1 %vm1039_vm3, %v5019_v31  ;;  %v4988_v18 = vmul.f32 %v6938_v15, %v8540_v22  ;;  %v8587_v25 = vadd.f32 %v5765_v1, %v5000_v39 }
0x2181   : > { %v5001_v35 = vmul.f32 %v5764_v24, %v4987_v37 }
0x2182   : > { %v6940_v62 = vpop.eup %6939  ;;  %v5002_v32 = vmul.f32 %v5764_v24, %v4988_v18 }
0x2183   : > { %v8589_v57 = vadd.f32 %v5765_v1, %v5001_v35  ;;  %v4989_v7 = vmul.f32 %v6940_v62, %v8547_v44  ;;  %v6601_v44 = vld [vmem:[%s8760_s19 + $0x38] sm:$0xff]  }
0x2184   : > { %v8595_v10 = vadd.f32 %v5765_v1, %v5002_v32  ;;  %6386 = vmatprep.subr.bf16.mxu0 %v6601_v44 }
0x2185   : > { %v5020_v12 = vpack.c.bf16 %v8589_v57, %v8587_v25  ;;  %v5003_v43 = vmul.f32 %v5764_v24, %v4989_v7  ;;  %6387 = vmatpush3.bf16.msra.mxu0 %v6601_v44 }
0x2186   : > { %6388 = vmatprep.subr.bf16.mxu0 %v6602_v4 }
0x2187   : > { %6382 = vmatprep.mubr.msk.bf16.mxu1 %vm1039_vm3, %v5020_v12  ;;  %v8597_v61 = vadd.f32 %v5765_v1, %v5003_v43 }
0x2189   : > { %v5021_v22 = vpack.c.bf16 %v8597_v61, %v8595_v10  ;;  %6389 = vmatpush3.bf16.msra.mxu0 %v6602_v4 }
0x218a   : > { %6390 = vmatprep.subr.bf16.mxu0 %v6603_v34 }
0x218b   : > { %6383 = vmatmul.mubr.msk.bf16.gmra.mxu1 %vm1039_vm3, %v5021_v22 }
0x218d   : > { %6391 = vmatpush3.bf16.msra.mxu0 %v6603_v34 }
0x218e   : > { %6392 = vmatprep.subr.bf16.mxu0 %v6604_v23 }
0x2191   : > { %6393 = vmatpush3.bf16.msra.mxu0 %v6604_v23 }
0x2240   : > { %v6380_v29 = vpop.f32.mrf.mxu1 }
0x2241   : > { %v8617_v6 = vadd.f32 %v6380_v29, %v5771_v5 }
0x2242   : > { %v5093_v60 = vpop.f32.mrf.mxu1 }
0x2243   : > { %v5134_v38 = vmul.f32 0.044715, %v8617_v6  ;;  %v8620_v45 = vadd.f32 %v5771_v5, %v5093_v60 }
0x2244   : > { %v6381_v46 = vpop.f32.mrf.mxu1 }
0x2245   : > { %v5142_v9 = vmul.f32 %v5134_v38, %v8617_v6  ;;  %v5132_v0 = vmul.f32 0.044715, %v8620_v45  ;;  %v5105_v11 = vadd.f32 %v6381_v46, %v5771_v5 }
0x2246   : > { %v5096_v17 = vpop.f32.mrf.mxu1 }
0x2247   : > { %v5150_v26 = vmul.f32 %v5142_v9, %v8617_v6  ;;  %v5140_v3 = vmul.f32 %v5132_v0, %v8620_v45  ;;  %v5135_v20 = vmul.f32 0.044715, %v5105_v11  ;;  %v5097_v8 = vadd.f32 %v5771_v5, %v5096_v17 }
0x2249   : > { %v5158_v51 = vadd.f32 %v5150_v26, %v8617_v6  ;;  %v5148_v50 = vmul.f32 %v5140_v3, %v8620_v45  ;;  %v5143_v49 = vmul.f32 %v5135_v20, %v5105_v11  ;;  %v5133_v59 = vmul.f32 0.044715, %v5097_v8 }
0x224a   : > { %v5127_v26 = vmul.f32 0.5, %v5105_v11  ;;  %v5124_v3 = vmul.f32 0.5, %v8620_v45  ;;  %v5125_v20 = vmul.f32 0.5, %v5097_v8 }
0x224b   : > { %v5166_v27 = vmul.f32 0.7978846, %v5158_v51  ;;  %v5156_v19 = vadd.f32 %v5148_v50, %v8620_v45  ;;  %v5151_v28 = vmul.f32 %v5143_v49, %v5105_v11  ;;  %v6384_v24 = vpop.f32.mrf.mxu1  ;;  %v5141_v48 = vmul.f32 %v5133_v59, %v5097_v8 }
0x224c   : > { %v8629_v33 = vadd.f32 %v6384_v24, %v5771_v5  ;;  %v5126_v50 = vmul.f32 0.5, %v8617_v6 }
0x224d   : > { %v5164_v16 = vmul.f32 0.7978846, %v5156_v19  ;;  %v5159_v30 = vadd.f32 %v5151_v28, %v5105_v11  ;;  %v5109_v21 = vpop.f32.mrf.mxu1  ;;  %6941 = vtanh.f32 %v5166_v27  ;;  %v5149_v40 = vmul.f32 %v5141_v48, %v5097_v8 }
0x224e   : > { %v5138_v41 = vmul.f32 0.044715, %v8629_v33  ;;  %v5110_v1 = vadd.f32 %v5771_v5, %v5109_v21 }
0x224f   : > { %6943 = vtanh.f32 %v5164_v16  ;;  %v5167_v63 = vmul.f32 0.7978846, %v5159_v30  ;;  %v6385_v55 = vpop.f32.mrf.mxu1  ;;  %v5157_v52 = vadd.f32 %v5149_v40, %v5097_v8 }
0x2250   : > { %v5146_v47 = vmul.f32 %v5138_v41, %v8629_v33  ;;  %v5136_v14 = vmul.f32 0.044715, %v5110_v1  ;;  %v5121_v13 = vadd.f32 %v6385_v55, %v5771_v5  ;;  %v5128_v41 = vmul.f32 0.5, %v5110_v1 }
0x2251   : > { %6945 = vtanh.f32 %v5167_v63  ;;  %v5112_v42 = vpop.f32.mrf.mxu1  ;;  %v5165_v54 = vmul.f32 0.7978846, %v5157_v52  ;;  %v5130_v55 = vmul.f32 0.5, %v8629_v33 }
0x2252   : > { %v5154_v53 = vmul.f32 %v5146_v47, %v8629_v33  ;;  %v5144_v31 = vmul.f32 %v5136_v14, %v5110_v1  ;;  %v5139_v15 = vmul.f32 0.044715, %v5121_v13  ;;  %v5113_v37 = vadd.f32 %v5771_v5, %v5112_v42 }
0x2253   : > { %6947 = vtanh.f32 %v5165_v54  ;;  %v5131_v8 = vmul.f32 0.5, %v5121_v13 }
0x2254   : > { %v5162_v39 = vadd.f32 %v5154_v53, %v8629_v33  ;;  %v5152_v18 = vmul.f32 %v5144_v31, %v5110_v1  ;;  %v5147_v35 = vmul.f32 %v5139_v15, %v5121_v13  ;;  %v5137_v62 = vmul.f32 0.044715, %v5113_v37 }
0x2255   : > { %v5129_v6 = vmul.f32 0.5, %v5113_v37 }
0x2256   : > { %v5170_v7 = vmul.f32 0.7978846, %v5162_v39  ;;  %v5160_v32 = vadd.f32 %v5152_v18, %v5110_v1  ;;  %v5155_v12 = vmul.f32 %v5147_v35, %v5121_v13  ;;  %v5145_v43 = vmul.f32 %v5137_v62, %v5113_v37 }
0x2258   : > { %v5168_v22 = vmul.f32 0.7978846, %v5160_v32  ;;  %v5163_v44 = vadd.f32 %v5155_v12, %v5121_v13  ;;  %v5153_v4 = vmul.f32 %v5145_v43, %v5113_v37  ;;  %6949 = vtanh.f32 %v5170_v7  ;;  %v5787_v13 = vld [vmem:[%s8761_s20 + $0x1] ss:$0 sm:$0xff] }
0x225a   : > { %v5171_v34 = vmul.f32 0.7978846, %v5163_v44  ;;  %v6942_v23 = vpop.eup %6941  ;;  %6951 = vtanh.f32 %v5168_v22  ;;  %v5161_v29 = vadd.f32 %v5153_v4, %v5113_v37 }
0x225b   : > { %v5182_v17 = vadd.f32 1.0, %v6942_v23 }
0x225c   : > { %v6944_v60 = vpop.eup %6943  ;;  %6953 = vtanh.f32 %v5171_v34  ;;  %v5169_v5 = vmul.f32 0.7978846, %v5161_v29 }
0x225d   : > { %v5180_v9 = vadd.f32 1.0, %v6944_v60  ;;  %v5190_v19 = vmul.f32 %v5182_v17, %v5126_v50 }
0x225e   : > { %v6946_v38 = vpop.eup %6945  ;;  %6955 = vtanh.f32 %v5169_v5 }
0x225f   : > { %v5183_v46 = vadd.f32 1.0, %v6946_v38  ;;  %v5188_v59 = vmul.f32 %v5180_v9, %v5124_v3 }
0x2260   : > { %v6948_v0 = vpop.eup %6947 }
0x2261   : > { %v5181_v51 = vadd.f32 1.0, %v6948_v0  ;;  %v5191_v49 = vmul.f32 %v5183_v46, %v5127_v26 }
0x2263   : > { %v5189_v27 = vmul.f32 %v5181_v51, %v5125_v20  ;;  %v5197_v48 = vpack.c.bf16 %v5191_v49, %v5190_v19 }
0x2265   : > { %v5196_v28 = vpack.c.bf16 %v5189_v27, %v5188_v59  ;;  %v6950_v24 = vpop.eup %6949 }
0x2266   : > { %v5186_v40 = vadd.f32 1.0, %v6950_v24 }
0x2267   : > { %v6952_v16 = vpop.eup %6951  ;;  %6394 = vmatprep.mubr.msk.bf16.mxu0 %vm935_vm2, %v5196_v28 }
0x2268   : > { %6395 = vmatmul.mubr.msk.bf16.vlgmr.msra.gmra.mxu0 %vm935_vm2, %v5197_v48  ;;  %v5184_v21 = vadd.f32 1.0, %v6952_v16  ;;  %v5194_v42 = vmul.f32 %v5186_v40, %v5130_v55 }
0x2269   : > { %v6954_v30 = vpop.eup %6953 }
0x226a   : > { %v5187_v11 = vadd.f32 1.0, %v6954_v30  ;;  %v5192_v47 = vmul.f32 %v5184_v21, %v5128_v41 }
0x226b   : > { %v6956_v45 = vpop.eup %6955 }
0x226c   : > { %v5185_v63 = vadd.f32 1.0, %v6956_v45  ;;  %v5195_v52 = vmul.f32 %v5187_v11, %v5131_v8 }
0x226e   : > { %v5193_v14 = vmul.f32 %v5185_v63, %v5129_v6  ;;  %v5199_v53 = vpack.c.bf16 %v5195_v52, %v5194_v42 }
0x2270   : > { %v5198_v54 = vpack.c.bf16 %v5193_v14, %v5192_v47 }
0x2272   : > { %6398 = vmatprep.mubr.msk.bf16.mxu0 %vm935_vm2, %v5198_v54 }
0x2273   : > { %6399 = vmatmul.mubr.msk.bf16.gmra.mxu0 %vm935_vm2, %v5199_v53 }
0x2328   : > { %v6396_v31 = vpop.f32.mrf.mxu0 }
0x2329   : > { %v5296_v1 = vadd.f32 %v6396_v31, %v5787_v13 }
0x232a   : > { %v5287_v15 = vpop.f32.mrf.mxu0 }
0x232b   : > { %v5320_v37 = vadd.f32 %v5296_v1, %v8577_v56  ;;  %v5288_v33 = vadd.f32 %v5787_v13, %v5287_v15 }
0x232c   : > { %v6397_v39 = vpop.f32.mrf.mxu0 }
0x232d   : > { %v5318_v18 = vadd.f32 %v5288_v33, %v8570_v2  ;;  %v5299_v35 = vadd.f32 %v6397_v39, %v5787_v13  ;;  %v5336_v62 = vsel %vm1039_vm3, %v5320_v37, 0.0 }
0x232e   : > { %5337 = vadd.xlane.f32.xlu0 %v5336_v62  ;;  %v5290_v7 = vpop.f32.mrf.mxu0 }
0x232f   : > { %v5321_v32 = vadd.f32 %v5299_v35, %v8579_v58  ;;  %v5291_v12 = vadd.f32 %v5787_v13, %v5290_v7  ;;  %v5330_v44 = vsel %vm1039_vm3, %v5318_v18, 0.0 }
0x2331   : > { %v5319_v43 = vadd.f32 %v5291_v12, %v8572_v36  ;;  %v5339_v22 = vsel %vm1039_vm3, %v5321_v32, 0.0 }
0x2332   : > { %5340 = vadd.xlane.f32.xlu1 %v5339_v22  ;;  %5331 = vadd.xlane.f32.xlu0 %v5330_v44 }
0x2333   : > { %v6400_v56 = vpop.f32.mrf.mxu0  ;;  %v5333_v2 = vsel %vm1039_vm3, %v5319_v43, 0.0 }
0x2334   : > { %v5312_v34 = vadd.f32 %v6400_v56, %v5787_v13 }
0x2335   : > { %v5303_v4 = vpop.f32.mrf.mxu0 }
0x2336   : > { %v5304_v23 = vadd.f32 %v5787_v13, %v5303_v4  ;;  %5334 = vadd.xlane.f32.xlu1 %v5333_v2  ;;  %v5324_v5 = vadd.f32 %v5312_v34, %v8595_v10 }
0x2337   : > { %v6401_v29 = vpop.f32.mrf.mxu0 }
0x2338   : > { %v5322_v60 = vadd.f32 %v5304_v23, %v8587_v25  ;;  %v5315_v36 = vadd.f32 %v6401_v29, %v5787_v13  ;;  %v5348_v26 = vsel %vm1039_vm3, %v5324_v5, 0.0 }
0x2339   : > { %v5306_v58 = vpop.f32.mrf.mxu0 }
0x233a   : > { %v5307_v38 = vadd.f32 %v5787_v13, %v5306_v58  ;;  %v5342_v46 = vsel %vm1039_vm3, %v5322_v60, 0.0  ;;  %v5325_v0 = vadd.f32 %v5315_v36, %v8597_v61 }
0x233b   : > { %5343 = vadd.xlane.f32.xlu0 %v5342_v46  ;;  %v5798_v46 = vld [vmem:[%s8762_s21 + $0x1] ss:$0 sm:$0xff] }
0x233c   : > { %v5323_v9 = vadd.f32 %v5307_v38, %v8589_v57  ;;  %v5351_v25 = vsel %vm1039_vm3, %v5325_v0, 0.0 }
0x233e   : > { %v5345_v17 = vsel %vm1039_vm3, %v5323_v9, 0.0 }
0x233f   : > { %5346 = vadd.xlane.f32.xlu1 %v5345_v17  ;;  %5349 = vadd.xlane.f32.xlu0 %v5348_v26  ;;  %v5799_v26 = vld [vmem:[%s8763_s22 + $0x1] ss:$0 sm:$0xff] }
0x2343   : > { %5352 = vadd.xlane.f32.xlu1 %v5351_v25 }
0x23b7   : > { %v5338_v3 = vpop.xlane.xlu0 %5337 }
0x23b8   : > { %v5356_v10 = vmul.f32 0.03125, %v5338_v3 }
0x23ba   : > { %v8661_v20 = vsub.f32 %v5320_v37, %v5356_v10 }
0x23bb   : > { %v5341_v51 = vpop.xlane.xlu1 %5340  ;;  %v5332_v50 = vpop.xlane.xlu0 %5331 }
0x23bc   : > { %v5357_v49 = vmul.f32 0.03125, %v5341_v51  ;;  %v5354_v59 = vmul.f32 0.03125, %v5332_v50  ;;  %v5372_v57 = vmul.f32 %v8661_v20, %v8661_v20 }
0x23be   : > { %v8665_v61 = vsub.f32 %v5321_v32, %v5357_v49  ;;  %v8667_v27 = vsub.f32 %v5318_v18, %v5354_v59  ;;  %v5384_v19 = vsel %vm1039_vm3, %v5372_v57, 0.0 }
0x23bf   : > { %v5335_v28 = vpop.xlane.xlu1 %5334  ;;  %5385 = vadd.xlane.f32.xlu0 %v5384_v19 }
0x23c0   : > { %v5355_v24 = vmul.f32 0.03125, %v5335_v28  ;;  %v5373_v48 = vmul.f32 %v8665_v61, %v8665_v61  ;;  %v5370_v16 = vmul.f32 %v8667_v27, %v8667_v27 }
0x23c2   : > { %v8674_v30 = vsub.f32 %v5319_v43, %v5355_v24  ;;  %v5387_v11 = vsel %vm1039_vm3, %v5373_v48, 0.0  ;;  %v5378_v21 = vsel %vm1039_vm3, %v5370_v16, 0.0 }
0x23c3   : > { %5388 = vadd.xlane.f32.xlu1 %v5387_v11  ;;  %5379 = vadd.xlane.f32.xlu0 %v5378_v21 }
0x23c4   : > { %v5344_v45 = vpop.xlane.xlu0 %5343  ;;  %v5371_v8 = vmul.f32 %v8674_v30, %v8674_v30 }
0x23c5   : > { %v5358_v40 = vmul.f32 0.03125, %v5344_v45 }
0x23c6   : > { %v5381_v41 = vsel %vm1039_vm3, %v5371_v8, 0.0 }
0x23c7   : > { %v8681_v6 = vsub.f32 %v5322_v60, %v5358_v40  ;;  %5382 = vadd.xlane.f32.xlu1 %v5381_v41 }
0x23c8   : > { %v5347_v63 = vpop.xlane.xlu1 %5346  ;;  %v5350_v55 = vpop.xlane.xlu0 %5349 }
0x23c9   : > { %v5359_v52 = vmul.f32 0.03125, %v5347_v63  ;;  %v5360_v47 = vmul.f32 0.03125, %v5350_v55  ;;  %v5374_v14 = vmul.f32 %v8681_v6, %v8681_v6 }
0x23cb   : > { %v8685_v42 = vsub.f32 %v5323_v9, %v5359_v52  ;;  %v8687_v54 = vsub.f32 %v5324_v5, %v5360_v47  ;;  %v5390_v53 = vsel %vm1039_vm3, %v5374_v14, 0.0 }
0x23cc   : > { %v5353_v13 = vpop.xlane.xlu1 %5352  ;;  %5391 = vadd.xlane.f32.xlu0 %v5390_v53 }
0x23cd   : > { %v5361_v31 = vmul.f32 0.03125, %v5353_v13  ;;  %v5375_v1 = vmul.f32 %v8685_v42, %v8685_v42  ;;  %v5376_v15 = vmul.f32 %v8687_v54, %v8687_v54 }
0x23cf   : > { %v8694_v37 = vsub.f32 %v5325_v0, %v5361_v31  ;;  %v5393_v33 = vsel %vm1039_vm3, %v5375_v1, 0.0  ;;  %v5396_v39 = vsel %vm1039_vm3, %v5376_v15, 0.0 }
0x23d0   : > { %5394 = vadd.xlane.f32.xlu1 %v5393_v33  ;;  %5397 = vadd.xlane.f32.xlu0 %v5396_v39 }
0x23d1   : > { %v5377_v18 = vmul.f32 %v8694_v37, %v8694_v37 }
0x23d3   : > { %v5399_v35 = vsel %vm1039_vm3, %v5377_v18, 0.0 }
0x23d4   : > { %5400 = vadd.xlane.f32.xlu1 %v5399_v35 }
0x2448   : > { %v5386_v62 = vpop.xlane.xlu0 %5385 }
0x2449   : > { %v5404_v7 = vmul.f32 0.03125, %v5386_v62 }
0x244b   : > { %v5412_v32 = vadd.f32 1e-12, %v5404_v7 }
0x244c   : > { %v5389_v12 = vpop.xlane.xlu1 %5388  ;;  %v5380_v43 = vpop.xlane.xlu0 %5379 }
0x244d   : > { %6957 = vrsqrt.f32 %v5412_v32  ;;  %v5405_v22 = vmul.f32 0.03125, %v5389_v12  ;;  %v5402_v44 = vmul.f32 0.03125, %v5380_v43 }
0x244f   : > { %v5413_v56 = vadd.f32 1e-12, %v5405_v22  ;;  %v5410_v4 = vadd.f32 1e-12, %v5402_v44 }
0x2450   : > { %v5383_v2 = vpop.xlane.xlu1 %5382 }
0x2451   : > { %6959 = vrsqrt.f32 %v5413_v56  ;;  %v5403_v34 = vmul.f32 0.03125, %v5383_v2 }
0x2452   : > { %6961 = vrsqrt.f32 %v5410_v4 }
0x2453   : > { %v5411_v23 = vadd.f32 1e-12, %v5403_v34 }
0x2455   : > { %6963 = vrsqrt.f32 %v5411_v23  ;;  %v5392_v29 = vpop.xlane.xlu0 %5391 }
0x2456   : > { %v5406_v60 = vmul.f32 0.03125, %v5392_v29 }
0x2458   : > { %v5414_v58 = vadd.f32 1e-12, %v5406_v60 }
0x2459   : > { %v5395_v5 = vpop.xlane.xlu1 %5394  ;;  %v5398_v36 = vpop.xlane.xlu0 %5397 }
0x245a   : > { %v6958_v38 = vpop.eup %6957  ;;  %6965 = vrsqrt.f32 %v5414_v58  ;;  %v5407_v9 = vmul.f32 0.03125, %v5395_v5  ;;  %v5408_v0 = vmul.f32 0.03125, %v5398_v36 }
0x245b   : > { %v5428_v17 = vmul.f32 %v6958_v38, %v8661_v20 }
0x245c   : > { %v5415_v25 = vadd.f32 1e-12, %v5407_v9  ;;  %v5416_v3 = vadd.f32 1e-12, %v5408_v0 }
0x245d   : > { %v5442_v10 = vmul.f32 %v5798_v46, %v5428_v17  ;;  %v5401_v51 = vpop.xlane.xlu1 %5400 }
0x245e   : > { %v6960_v50 = vpop.eup %6959  ;;  %6967 = vrsqrt.f32 %v5415_v25  ;;  %v5409_v49 = vmul.f32 0.03125, %v5401_v51 }
0x245f   : > { %v6962_v20 = vpop.eup %6961  ;;  %v5456_v59 = vadd.f32 %v5799_v26, %v5442_v10  ;;  %v5429_v57 = vmul.f32 %v6960_v50, %v8665_v61  ;;  %6969 = vrsqrt.f32 %v5416_v3 }
0x2460   : > { %v5426_v19 = vmul.f32 %v6962_v20, %v8667_v27  ;;  %v5417_v28 = vadd.f32 1e-12, %v5409_v49 }
0x2461   : > { %5464 = vst.msk [vmem:[%s8713_s25 + $0x10] sm:$0xff] %vm1039_vm3, %v5456_v59  ;;  %v5443_v24 = vmul.f32 %v5798_v46, %v5429_v57 }
0x2462   : > { %v6964_v48 = vpop.eup %6963  ;;  %v5440_v16 = vmul.f32 %v5798_v46, %v5426_v19  ;;  %6971 = vrsqrt.f32 %v5417_v28 }
0x2463   : > { %v5457_v11 = vadd.f32 %v5799_v26, %v5443_v24  ;;  %v5427_v21 = vmul.f32 %v6964_v48, %v8674_v30 }
0x2464   : > { %v5454_v45 = vadd.f32 %v5799_v26, %v5440_v16 }
0x2465   : > { %5465 = vst.msk [vmem:[%s8713_s25 + $0x18] sm:$0xff] %vm1039_vm3, %v5457_v11  ;;  %v5441_v8 = vmul.f32 %v5798_v46, %v5427_v21 }
0x2466   : > { %5462 = vst.msk [vmem:[%s8713_s25] sm:$0xff] %vm1039_vm3, %v5454_v45 }
0x2467   : > { %v6966_v61 = vpop.eup %6965  ;;  %v5455_v27 = vadd.f32 %v5799_v26, %v5441_v8 }
0x2468   : > { %v5430_v40 = vmul.f32 %v6966_v61, %v8681_v6 }
0x2469   : > { %5463 = vst.msk [vmem:[%s8713_s25 + $0x8] sm:$0xff] %vm1039_vm3, %v5455_v27 }
0x246a   : > { %v5444_v41 = vmul.f32 %v5798_v46, %v5430_v40 }
0x246b   : > { %v6968_v63 = vpop.eup %6967 }
0x246c   : > { %v6970_v55 = vpop.eup %6969  ;;  %v5458_v52 = vadd.f32 %v5799_v26, %v5444_v41  ;;  %v5431_v30 = vmul.f32 %v6968_v63, %v8685_v42 }
0x246d   : > { %v5432_v47 = vmul.f32 %v6970_v55, %v8687_v54 }
0x246e   : > { %5466 = vst.msk [vmem:[%s8713_s25 + $0x20] sm:$0xff] %vm1039_vm3, %v5458_v52  ;;  %v5445_v14 = vmul.f32 %v5798_v46, %v5431_v30 }
0x246f   : > { %v6972_v53 = vpop.eup %6971  ;;  %v5446_v13 = vmul.f32 %v5798_v46, %v5432_v47 }
0x2470   : > { %v5459_v31 = vadd.f32 %v5799_v26, %v5445_v14  ;;  %v5433_v6 = vmul.f32 %v6972_v53, %v8694_v37 }
0x2471   : > { %v5460_v1 = vadd.f32 %v5799_v26, %v5446_v13 }
0x2472   : > { %5467 = vst.msk [vmem:[%s8713_s25 + $0x28] sm:$0xff] %vm1039_vm3, %v5459_v31  ;;  %v5447_v15 = vmul.f32 %v5798_v46, %v5433_v6 }
0x2473   : > { %5468 = vst.msk [vmem:[%s8713_s25 + $0x30] sm:$0xff] %vm1039_vm3, %v5460_v1 }
0x2474   : > { %v5461_v33 = vadd.f32 %v5799_v26, %v5447_v15 }
0x2476   : > { %5469 = vst.msk [vmem:[%s8713_s25 + $0x38] sm:$0xff] %vm1039_vm3, %v5461_v33 }
0x2477 PF: > { %s35_s5 = sadd.s32 1, %s6982_s5  }
0x2478   : > { %p32_p4 = scmp.ge.s32.totalorder %s35_s5, 4  }
0x247a   :  { %34 = sbr.rel (!%p32_p4) target bundleno = 10 (0xa), region = 175 }

</bundles_post_ra>
